<compile_context>
chip_gen: v7x
topology: tpu7x:2x2x1
jax: 0.10.0
libtpu: 0.0.40
codegen_flags: <defaults>
</compile_context>

<pallas_src>
from functools import partial

import jax
import jax.numpy as jnp
from jax.experimental import pallas as pl
from jax.experimental.pallas import tpu as pltpu

LEAKY_SLOPE = 0.01   # torch.nn.LeakyReLU default negative_slope
BN_EPS = 1e-5        # torch.nn.BatchNorm2d default eps


def _round_up(v, m):
    return (v + m - 1) // m * m


def _vmem_bytes(shape, dtype):
    """Layout-aware VMEM footprint of one buffer (lane pad 128, sublane pad 32B/dtype)."""
    itemsize = jnp.dtype(dtype).itemsize
    sub = max(32 // itemsize, 1)
    if len(shape) == 1:
        return _round_up(shape[0], 128) * itemsize * sub
    lead = 1
    for s in shape[:-2]:
        lead *= int(s)
    return lead * _round_up(int(shape[-2]), sub) * _round_up(int(shape[-1]), 128) * itemsize


def _vmem_limit(footprint_bytes):
    """Scoped-VMEM limit from the measured footprint, capped by physical VMEM."""
    try:
        cap = int(pltpu.get_tpu_info().vmem_capacity_bytes)
    except Exception:
        cap = 64 << 20          # v7x physical VMEM; v5e/v6e have 128 MiB
    cap = min(cap - (8 << 20), 112 << 20)
    want = int(1.5 * footprint_bytes) + (4 << 20)
    return int(max(min(want, cap), min(32 << 20, cap)))


def _pick_toh(oh, ow, cinp, coutp, use_im2col, budget=4 << 20):
    """Largest divisor of OH whose per-tile compute buffers stay under `budget`."""
    def tile_bytes(d):
        m = d * ow
        b = m * coutp * 4                 # f32 conv accumulator
        b += 2 * m * coutp * 2            # double-buffered bf16 output tile
        if use_im2col:
            b += m * 9 * cinp * 2         # bf16 im2col scratch
        return b
    best = 1
    for d in range(1, oh + 1):
        if oh % d == 0 and tile_bytes(d) <= budget:
            best = d
    return best


# ------------------------- Pallas kernels -------------------------

def _conv_bn_lrelu_kernel(ph_ref, w_ref, b_ref, g_ref, bt_ref, o_ref,
                          sum_ref, sq_ref, k_ref, bn_ref, *col,
                          toh, ow, cinp, hq, inv_m, use_im2col):
    """One (batch element, output-row block) tile of conv3x3/s2/p1 + BN + LeakyReLU.

    Grid = (2, N, OH // toh), fully sequential.  Sweep 0 accumulates shifted
    per-channel sum / sum-of-squares of the pre-BN conv output into sublane-partial
    scratches; sweep 1 recomputes the (memory-cheap) conv tile, applies BatchNorm
    with the cached (scale, shift) and LeakyReLU, and stores the bf16 output —
    the only HBM writeback of this kernel.
    """
    phase = pl.program_id(0)
    n = pl.program_id(1)
    i = pl.program_id(2)
    oh0 = i * toh
    coutp = o_ref.shape[-1]
    m = toh * ow

    def taps():
        # Each conv tap is a contiguous slice of one stride-2 (row, col)-parity phase.
        for p in range(2):
            for q in range(2):
                base = (p * 2 + q) * hq
                slab = ph_ref[pl.ds(base + oh0, toh + 1), :, :]   # (toh+1, Wq, cinp) bf16
                for kh in ((0, 2) if p == 0 else (1,)):
                    for kw in ((0, 2) if q == 0 else (1,)):
                        t = kh * 3 + kw
                        tap = slab[kh // 2:kh // 2 + toh,
                                   kw // 2:kw // 2 + ow, :].reshape(m, cinp)
                        yield t, tap

    if use_im2col:
        # cinp is a multiple of 128: pack the 9 taps lane-aligned into the im2col
        # scratch and run ONE MXU matmul with K = 9*cinp (full contraction depth).
        col_ref = col[0]
        for t, tap in taps():
            col_ref[:, t * cinp:(t + 1) * cinp] = tap
        acc = jnp.dot(col_ref[...], w_ref[...], preferred_element_type=jnp.float32)
    else:
        # first layer: cinp = in_channels (tiny) -> per-tap matmuls are fine.
        acc = jnp.zeros((m, coutp), jnp.float32)
        for t, tap in taps():
            acc = acc + jnp.dot(tap, w_ref[t * cinp:(t + 1) * cinp, :],
                                preferred_element_type=jnp.float32)
    acc = acc + b_ref[...]                                        # (m, coutp) f32

    first = jnp.logical_and(n == 0, i == 0)

    # sublane group size for the VPU-only partial reduction
    grp = 8
    while m % grp:
        grp //= 2

    @pl.when(jnp.logical_and(phase == 0, first))
    def _init_stats():
        sum_ref[...] = jnp.zeros_like(sum_ref)
        sq_ref[...] = jnp.zeros_like(sq_ref)
        k_ref[...] = acc[0:1, :]          # per-channel shift -> stable variance

    @pl.when(phase == 0)
    def _accumulate_stats():
        c = acc - k_ref[...]
        sum_ref[0:grp, :] += jnp.sum(c.reshape(m // grp, grp, coutp), axis=0)
        sq_ref[0:grp, :] += jnp.sum((c * c).reshape(m // grp, grp, coutp), axis=0)

    @pl.when(jnp.logical_and(phase == 1, first))
    def _finalize_stats():
        s1 = jnp.sum(sum_ref[...], axis=0, keepdims=True) * inv_m   # E[x - K]
        s2 = jnp.sum(sq_ref[...], axis=0, keepdims=True) * inv_m    # E[(x - K)^2]
        var = jnp.maximum(s2 - s1 * s1, 0.0)
        mean = s1 + k_ref[...]
        scale = jax.lax.rsqrt(var + BN_EPS) * g_ref[...]
        bn_ref[0:1, :] = scale
        bn_ref[1:2, :] = bt_ref[...] - mean * scale

    @pl.when(phase == 1)
    def _apply_bn_lrelu():
        y = acc * bn_ref[0:1, :] + bn_ref[1:2, :]
        y = jnp.where(y > 0, y, LEAKY_SLOPE * y)
        o_ref[...] = y.reshape(toh, ow, coutp).astype(o_ref.dtype)


def _fc_heads_kernel(x_ref, w_ref, b_ref, o_ref):
    # Fused fc_mu / fc_var: one bf16 matmul, f32 accumulate, 128-lane-padded output.
    o_ref[...] = (jnp.dot(x_ref[...], w_ref[...], preferred_element_type=jnp.float32)
                  + b_ref[...])


# ------------------------- pallas_call wrappers -------------------------

def conv_bn_lrelu(x, layer):
    """x: (N, H, W, Cinp) bf16 NHWC (channels already lane-padded/carried).
    Returns (N, OH, OW, Coutp) bf16 with Cout lane-padded to a multiple of 128."""
    N, H, W, cinp = x.shape
    OH = (H - 1) // 2 + 1
    OW = (W - 1) // 2 + 1
    Hq, Wq = OH + 1, OW + 1
    coutp = layer["w"].shape[1]
    use_im2col = (cinp % 128 == 0)

    # conv padding (pad=1) plus extra zero rows/cols to an even 2*Hq x 2*Wq extent,
    # then split into the four stride-2 parity phases:
    #   phases[n, (p*2+q)*Hq + r, c, :] == x_pad[n, 2*r + p, 2*c + q, :]
    # TODO(synk): fuse this repack into the producing kernel's output layout.
    xp = jnp.pad(x, ((0, 0), (1, 2 * Hq - H - 1), (1, 2 * Wq - W - 1), (0, 0)))
    phases = (xp.reshape(N, Hq, 2, Wq, 2, cinp)
                .transpose(0, 2, 4, 1, 3, 5)
                .reshape(N, 4 * Hq, Wq, cinp))

    toh = _pick_toh(OH, OW, cinp, coutp, use_im2col)
    nb = OH // toh
    m = toh * OW
    m_total = N * OH * OW

    scratch = [pltpu.VMEM((8, coutp), jnp.float32),   # sublane-partial sum
               pltpu.VMEM((8, coutp), jnp.float32),   # sublane-partial sum of squares
               pltpu.VMEM((1, coutp), jnp.float32),   # per-channel shift K
               pltpu.VMEM((2, coutp), jnp.float32)]   # cached BN (scale, shift)
    if use_im2col:
        scratch.append(pltpu.VMEM((m, 9 * cinp), jnp.bfloat16))

    kern = partial(_conv_bn_lrelu_kernel, toh=toh, ow=OW, cinp=cinp, hq=Hq,
                   inv_m=1.0 / float(m_total), use_im2col=use_im2col)

    footprint = (2 * _vmem_bytes((4 * Hq, Wq, cinp), jnp.bfloat16)   # phases (2 bufs)
                 + 2 * _vmem_bytes((9 * cinp, coutp), jnp.bfloat16)  # weight
                 + 2 * _vmem_bytes((toh, OW, coutp), jnp.bfloat16)   # out tile
                 + _vmem_bytes((m, coutp), jnp.float32)              # f32 accumulator
                 + (_vmem_bytes((m, 9 * cinp), jnp.bfloat16) if use_im2col else 0)
                 + 32 * coutp * 4)                                   # stat scratches

    flops = 2 * 2 * m_total * 9 * cinp * coutp        # two grid sweeps
    bytes_acc = (2 * phases.size * 2 + layer["w"].size * 2
                 + m_total * coutp * 2 + 6 * coutp * 4)

    return pl.pallas_call(
        kern,
        out_shape=jax.ShapeDtypeStruct((N, OH, OW, coutp), jnp.bfloat16),
        grid_spec=pltpu.PrefetchScalarGridSpec(
            num_scalar_prefetch=0,
            grid=(2, N, nb),
            in_specs=[
                pl.BlockSpec((None, 4 * Hq, Wq, cinp), lambda p, n, i: (n, 0, 0, 0)),
                pl.BlockSpec((9 * cinp, coutp), lambda p, n, i: (0, 0)),
                pl.BlockSpec((1, coutp), lambda p, n, i: (0, 0)),
                pl.BlockSpec((1, coutp), lambda p, n, i: (0, 0)),
                pl.BlockSpec((1, coutp), lambda p, n, i: (0, 0)),
            ],
            # Phase-aware output map: sweep 0 (which never writes o_ref) keeps block
            # (0, 0) resident, so real output blocks are written to HBM exactly once,
            # in sweep 1.  Block (0, 0)'s visits stay consecutive across the sweep
            # boundary, so the revisit semantics are satisfied.
            out_specs=pl.BlockSpec((None, toh, OW, coutp),
                                   lambda p, n, i: (n * p, i * p, 0, 0)),
            scratch_shapes=scratch,
        ),
        compiler_params=pltpu.CompilerParams(
            # BN statistics scratch is carried across the whole grid -> every axis
            # must stay sequential ("arbitrary").  TODO(synk): on v7x split stats
            # and apply into two pallas_calls to use both TensorCores for the apply.
            dimension_semantics=("arbitrary", "arbitrary", "arbitrary"),
            vmem_limit_bytes=_vmem_limit(footprint),
        ),
        cost_estimate=pl.CostEstimate(flops=flops, transcendentals=coutp,
                                      bytes_accessed=bytes_acc),
    )(phases, layer["w"], layer["b"], layer["gamma"], layer["beta"])


def fc_heads(xf, fc):
    """xf: (N, feat) bf16 NHWC-flattened (lane-padded) features.  Returns (mu, log_var) f32."""
    N, feat = xf.shape
    lp = fc["w"].shape[1]
    tm = N
    for cand in (512, 256, 128, 64, 32, 16, 8):
        if N >= cand and N % cand == 0:
            tm = cand
            break
    footprint = (2 * _vmem_bytes((tm, feat), jnp.bfloat16)
                 + 2 * _vmem_bytes((feat, lp), jnp.bfloat16)
                 + 2 * _vmem_bytes((tm, lp), jnp.float32))
    out = pl.pallas_call(
        _fc_heads_kernel,
        out_shape=jax.ShapeDtypeStruct((N, lp), jnp.float32),
        grid_spec=pltpu.PrefetchScalarGridSpec(
            num_scalar_prefetch=0,
            grid=(N // tm,),
            in_specs=[pl.BlockSpec((tm, feat), lambda i: (i, 0)),
                      pl.BlockSpec((feat, lp), lambda i: (0, 0)),
                      pl.BlockSpec((1, lp), lambda i: (0, 0))],
            out_specs=pl.BlockSpec((tm, lp), lambda i: (i, 0)),
        ),
        compiler_params=pltpu.CompilerParams(
            dimension_semantics=("parallel",),
            vmem_limit_bytes=_vmem_limit(footprint)),
        cost_estimate=pl.CostEstimate(
            flops=2 * N * feat * lp, transcendentals=0,
            bytes_accessed=(N * feat + feat * lp) * 2 + (N + 1) * lp * 4),
    )(xf, fc["w"], fc["b"])
    latent = fc["latent"]
    return out[:, :latent], out[:, latent:2 * latent]


# ------------------------- params & forward -------------------------

def init_params(key, in_channels, latent_dim, hidden_dims, patch_size_hidden):
    """Random parameters in PyTorch layouts (Conv2d: (Cout,Cin,kh,kw), Linear: (out,in))."""
    params = {"conv": []}
    c_in = in_channels
    for h in hidden_dims:
        key, kw_, kb, kg, kbt = jax.random.split(key, 5)
        w = jax.random.normal(kw_, (h, c_in, 3, 3), jnp.float32) * 0.1
        b = jax.random.normal(kb, (h,), jnp.float32) * 0.1
        gamma = 1.0 + 0.1 * jax.random.normal(kg, (h,), jnp.float32)
        beta = 0.1 * jax.random.normal(kbt, (h,), jnp.float32)
        params["conv"].append((w, b, gamma, beta))
        c_in = h
    feat = hidden_dims[-1] * patch_size_hidden ** 2
    key, k1, k2, k3, k4 = jax.random.split(key, 5)
    params["fc_mu"] = (jax.random.normal(k1, (latent_dim, feat), jnp.float32) * 0.05,
                       jax.random.normal(k2, (latent_dim,), jnp.float32) * 0.05)
    params["fc_var"] = (jax.random.normal(k3, (latent_dim, feat), jnp.float32) * 0.05,
                        jax.random.normal(k4, (latent_dim,), jnp.float32) * 0.05)
    return params


def prepare_params(params, in_channels, patch_hw):
    """One-time packing: pad Cout to 128 lanes, carry the padded channel count into the
    next layer's weight K rows (so activations never need slicing between layers),
    bf16 MXU operands, and fuse fc_mu / fc_var into one NHWC-flatten-order matrix."""
    conv = []
    cin_carry = in_channels
    for (w, b, gamma, beta) in params["conv"]:
        cout, cin, k, _ = w.shape
        cinp = cin_carry                              # carried (possibly padded) Cin
        coutp = _round_up(cout, 128)
        wm = jnp.transpose(w, (2, 3, 1, 0))           # (kh, kw, cin, cout)
        wm = jnp.pad(wm, ((0, 0), (0, 0), (0, cinp - cin), (0, coutp - cout)))
        wm = wm.reshape(k * k * cinp, coutp).astype(jnp.bfloat16)

        def pad_row(v, coutp=coutp, cout=cout):
            return jnp.pad(v, (0, coutp - cout)).reshape(1, coutp).astype(jnp.float32)

        conv.append(dict(w=wm, b=pad_row(b), gamma=pad_row(gamma), beta=pad_row(beta),
                         cinp=int(cinp), coutp=int(coutp), cout=int(cout)))
        cin_carry = coutp

    wmu, bmu = params["fc_mu"]
    wlv, blv = params["fc_var"]
    latent, feat = wmu.shape
    c_last = params["conv"][-1][0].shape[0]
    c_lastp = cin_carry

    def to_nhwc_rows(wt):
        # torch flatten order (c, h, w) -> NHWC flatten order (h, w, c), channel-padded
        wt = wt.reshape(latent, c_last, patch_hw, patch_hw).transpose(0, 2, 3, 1)
        wt = jnp.pad(wt, ((0, 0), (0, 0), (0, 0), (0, c_lastp - c_last)))
        return wt.reshape(latent, patch_hw * patch_hw * c_lastp)

    lp = _round_up(2 * latent, 128)
    wcat = jnp.concatenate([to_nhwc_rows(wmu), to_nhwc_rows(wlv)], axis=0)       # (2L, featp)
    wcat = jnp.pad(wcat, ((0, lp - 2 * latent), (0, 0))).T.astype(jnp.bfloat16)  # (featp, lp)
    bcat = (jnp.pad(jnp.concatenate([bmu, blv]), (0, lp - 2 * latent))
               .reshape(1, lp).astype(jnp.float32))
    return dict(conv=conv, fc=dict(w=wcat, b=bcat, latent=int(latent)))


def encoder_forward(x_nchw, prep):
    """NCHW input (PyTorch convention) -> (mu, log_var)."""
    x = jnp.transpose(x_nchw, (0, 2, 3, 1)).astype(jnp.bfloat16)   # NHWC bf16 MXU operands
    for layer in prep["conv"]:
        x = conv_bn_lrelu(x, layer)      # padded channels carried to the next layer
    n = x.shape[0]
    xf = x.reshape(n, -1)                # NHWC flatten; FC weights pre-permuted to match
    return fc_heads(xf, prep["fc"])


def reference_forward(x_nchw, params):
    """Pure-JAX reference with the same bf16 rounding points (no Pallas)."""
    x = jnp.transpose(x_nchw, (0, 2, 3, 1)).astype(jnp.bfloat16)
    for (w, b, gamma, beta) in params["conv"]:
        cout, cin, _, _ = w.shape
        n, h, wd, _ = x.shape
        oh = (h - 1) // 2 + 1
        ow = (wd - 1) // 2 + 1
        xp = jnp.pad(x, ((0, 0), (1, 1), (1, 1), (0, 0)))
        taps = [xp[:, kh:kh + 2 * oh:2, kw:kw + 2 * ow:2, :]
                for kh in range(3) for kw in range(3)]
        cols = jnp.stack(taps, axis=3).reshape(n * oh * ow, 9 * cin)
        wm = jnp.transpose(w, (2, 3, 1, 0)).reshape(9 * cin, cout).astype(jnp.bfloat16)
        y = jnp.dot(cols, wm, preferred_element_type=jnp.float32) + b.reshape(1, cout)
        mean = jnp.mean(y, axis=0, keepdims=True)
        var = jnp.mean((y - mean) ** 2, axis=0, keepdims=True)
        y = (y - mean) * jax.lax.rsqrt(var + BN_EPS) * gamma.reshape(1, cout) + beta.reshape(1, cout)
        y = jnp.where(y > 0, y, LEAKY_SLOPE * y)
        x = y.reshape(n, oh, ow, cout).astype(jnp.bfloat16)
    n = x.shape[0]
    feat = jnp.transpose(x, (0, 3, 1, 2)).reshape(n, -1)           # torch flatten order
    wmu, bmu = params["fc_mu"]
    wlv, blv = params["fc_var"]
    mu = jnp.dot(feat, wmu.T.astype(jnp.bfloat16), preferred_element_type=jnp.float32) + bmu
    lv = jnp.dot(feat, wlv.T.astype(jnp.bfloat16), preferred_element_type=jnp.float32) + blv
    return mu, lv


if __name__ == "__main__":
    in_channels = 4
    latent_dim = 32
    hidden_dims = [8, 16]
    spatial = 16
    patch_size_hidden = spatial // (2 ** len(hidden_dims))   # 4 -> feat = 16*4*4 = 256
    batch = 2

    key = jax.random.PRNGKey(0)
    key, kx = jax.random.split(key)
    x = jax.random.normal(kx, (batch, in_channels, spatial, spatial), jnp.float32)
    params = init_params(key, in_channels, latent_dim, hidden_dims, patch_size_hidden)
    prep = prepare_params(params, in_channels, patch_size_hidden)

    fwd = jax.jit(lambda xb: encoder_forward(xb, prep))
    mu, log_var = fwd(x)
    jax.block_until_ready((mu, log_var))
    assert mu.shape == (batch, latent_dim)
    assert log_var.shape == (batch, latent_dim)

    # correctness check against a pure-JAX reference with matching bf16 rounding points
    mu_ref, lv_ref = jax.jit(lambda xb: reference_forward(xb, params))(x)
    assert jnp.allclose(mu, mu_ref, atol=5e-2, rtol=5e-2), "mu mismatch vs reference"
    assert jnp.allclose(log_var, lv_ref, atol=5e-2, rtol=5e-2), "log_var mismatch vs reference"
    print("KERNEL_OK")
</pallas_src>

<mosaic_0001>
module attributes {stable_mosaic.version = 11 : i64} {
  func.func @_conv_bn_lrelu_kernel(%arg0: i32, %arg1: i32, %arg2: i32, %arg3: memref<1x36x9x4xbf16, #tpu.memory_space<vmem>>, %arg4: memref<36x128xbf16, #tpu.memory_space<vmem>>, %arg5: memref<1x128xf32, #tpu.memory_space<vmem>>, %arg6: memref<1x128xf32, #tpu.memory_space<vmem>>, %arg7: memref<1x128xf32, #tpu.memory_space<vmem>>, %arg8: memref<1x8x8x128xbf16, #tpu.memory_space<vmem>>, %arg9: memref<8x128xf32, #tpu.memory_space<vmem>>, %arg10: memref<8x128xf32, #tpu.memory_space<vmem>>, %arg11: memref<1x128xf32, #tpu.memory_space<vmem>>, %arg12: memref<2x128xf32, #tpu.memory_space<vmem>>) attributes {dimension_semantics = [#tpu.dimension_semantics<arbitrary>, #tpu.dimension_semantics<arbitrary>, #tpu.dimension_semantics<arbitrary>], iteration_bounds = array<i64: 2, 2, 1>, scalar_prefetch = 0 : i64, scratch_operands = 4 : i64, tpu.core_type = #tpu.core_type<tc>, window_params = [{transform_indices = @transform_0, window_bounds = array<i64: 1, 36, 9, 4>}, {pipeline_mode = #tpu.pipeline_mode<synchronous>, transform_indices = @transform_1, window_bounds = array<i64: 36, 128>}, {pipeline_mode = #tpu.pipeline_mode<synchronous>, transform_indices = @transform_2, window_bounds = array<i64: 1, 128>}, {pipeline_mode = #tpu.pipeline_mode<synchronous>, transform_indices = @transform_3, window_bounds = array<i64: 1, 128>}, {pipeline_mode = #tpu.pipeline_mode<synchronous>, transform_indices = @transform_4, window_bounds = array<i64: 1, 128>}, {transform_indices = @transform_5, window_bounds = array<i64: 1, 8, 8, 128>}]} {
    %c8_i32 = arith.constant 8 : i32
    %0 = arith.muli %arg2, %c8_i32 : i32
    %cst = arith.constant 0.000000e+00 : f32
    %1 = vector.broadcast %cst : f32 to vector<64x128xf32>
    %c0_i32 = arith.constant 0 : i32
    %2 = arith.addi %c0_i32, %0 : i32
    %c0 = arith.constant 0 : index
    %3 = arith.index_cast %2 : i32 to index
    %c0_0 = arith.constant 0 : index
    %c0_1 = arith.constant 0 : index
    %4 = vector.load %arg3[%c0, %3, %c0_0, %c0_1] : memref<1x36x9x4xbf16, #tpu.memory_space<vmem>>, vector<1x9x9x4xbf16>
    %5 = vector.shape_cast %4 : vector<1x9x9x4xbf16> to vector<9x9x4xbf16>
    %6 = vector.extract_strided_slice %5 {offsets = [0, 0, 0], sizes = [8, 8, 4], strides = [1, 1, 1]} : vector<9x9x4xbf16> to vector<8x8x4xbf16>
    %7 = vector.shape_cast %6 : vector<8x8x4xbf16> to vector<64x4xbf16>
    %c0_2 = arith.constant 0 : index
    %c0_3 = arith.constant 0 : index
    %8 = vector.load %arg4[%c0_2, %c0_3] : memref<36x128xbf16, #tpu.memory_space<vmem>>, vector<4x128xbf16>
    %cst_4 = arith.constant dense<0.000000e+00> : vector<64x128xf32>
    %9 = tpu.matmul %7, %8, %cst_4 {dimension_numbers = #tpu.dot_dimension_numbers<[1], [0], [0], [1], [0, 0, 1, 1], [], []>} : vector<64x4xbf16>, vector<4x128xbf16>, vector<64x128xf32> -> vector<64x128xf32>
    %10 = arith.addf %1, %9 : vector<64x128xf32>
    %11 = vector.extract_strided_slice %5 {offsets = [0, 1, 0], sizes = [8, 8, 4], strides = [1, 1, 1]} : vector<9x9x4xbf16> to vector<8x8x4xbf16>
    %12 = vector.shape_cast %11 : vector<8x8x4xbf16> to vector<64x4xbf16>
    %c8 = arith.constant 8 : index
    %c0_5 = arith.constant 0 : index
    %13 = vector.load %arg4[%c8, %c0_5] : memref<36x128xbf16, #tpu.memory_space<vmem>>, vector<4x128xbf16>
    %cst_6 = arith.constant dense<0.000000e+00> : vector<64x128xf32>
    %14 = tpu.matmul %12, %13, %cst_6 {dimension_numbers = #tpu.dot_dimension_numbers<[1], [0], [0], [1], [0, 0, 1, 1], [], []>} : vector<64x4xbf16>, vector<4x128xbf16>, vector<64x128xf32> -> vector<64x128xf32>
    %15 = arith.addf %10, %14 : vector<64x128xf32>
    %16 = vector.extract_strided_slice %5 {offsets = [1, 0, 0], sizes = [8, 8, 4], strides = [1, 1, 1]} : vector<9x9x4xbf16> to vector<8x8x4xbf16>
    %17 = vector.shape_cast %16 : vector<8x8x4xbf16> to vector<64x4xbf16>
    %c24 = arith.constant 24 : index
    %c0_7 = arith.constant 0 : index
    %18 = vector.load %arg4[%c24, %c0_7] : memref<36x128xbf16, #tpu.memory_space<vmem>>, vector<4x128xbf16>
    %cst_8 = arith.constant dense<0.000000e+00> : vector<64x128xf32>
    %19 = tpu.matmul %17, %18, %cst_8 {dimension_numbers = #tpu.dot_dimension_numbers<[1], [0], [0], [1], [0, 0, 1, 1], [], []>} : vector<64x4xbf16>, vector<4x128xbf16>, vector<64x128xf32> -> vector<64x128xf32>
    %20 = arith.addf %15, %19 : vector<64x128xf32>
    %21 = vector.extract_strided_slice %5 {offsets = [1, 1, 0], sizes = [8, 8, 4], strides = [1, 1, 1]} : vector<9x9x4xbf16> to vector<8x8x4xbf16>
    %22 = vector.shape_cast %21 : vector<8x8x4xbf16> to vector<64x4xbf16>
    %c32 = arith.constant 32 : index
    %c0_9 = arith.constant 0 : index
    %23 = vector.load %arg4[%c32, %c0_9] : memref<36x128xbf16, #tpu.memory_space<vmem>>, vector<4x128xbf16>
    %cst_10 = arith.constant dense<0.000000e+00> : vector<64x128xf32>
    %24 = tpu.matmul %22, %23, %cst_10 {dimension_numbers = #tpu.dot_dimension_numbers<[1], [0], [0], [1], [0, 0, 1, 1], [], []>} : vector<64x4xbf16>, vector<4x128xbf16>, vector<64x128xf32> -> vector<64x128xf32>
    %25 = arith.addf %20, %24 : vector<64x128xf32>
    %c9_i32 = arith.constant 9 : i32
    %26 = arith.addi %c9_i32, %0 : i32
    %c0_11 = arith.constant 0 : index
    %27 = arith.index_cast %26 : i32 to index
    %c0_12 = arith.constant 0 : index
    %c0_13 = arith.constant 0 : index
    %28 = vector.load %arg3[%c0_11, %27, %c0_12, %c0_13] : memref<1x36x9x4xbf16, #tpu.memory_space<vmem>>, vector<1x9x9x4xbf16>
    %29 = vector.shape_cast %28 : vector<1x9x9x4xbf16> to vector<9x9x4xbf16>
    %30 = vector.extract_strided_slice %29 {offsets = [0, 0, 0], sizes = [8, 8, 4], strides = [1, 1, 1]} : vector<9x9x4xbf16> to vector<8x8x4xbf16>
    %31 = vector.shape_cast %30 : vector<8x8x4xbf16> to vector<64x4xbf16>
    %c4 = arith.constant 4 : index
    %c0_14 = arith.constant 0 : index
    %32 = vector.load %arg4[%c4, %c0_14] : memref<36x128xbf16, #tpu.memory_space<vmem>>, vector<4x128xbf16>
    %cst_15 = arith.constant dense<0.000000e+00> : vector<64x128xf32>
    %33 = tpu.matmul %31, %32, %cst_15 {dimension_numbers = #tpu.dot_dimension_numbers<[1], [0], [0], [1], [0, 0, 1, 1], [], []>} : vector<64x4xbf16>, vector<4x128xbf16>, vector<64x128xf32> -> vector<64x128xf32>
    %34 = arith.addf %25, %33 : vector<64x128xf32>
    %35 = vector.extract_strided_slice %29 {offsets = [1, 0, 0], sizes = [8, 8, 4], strides = [1, 1, 1]} : vector<9x9x4xbf16> to vector<8x8x4xbf16>
    %36 = vector.shape_cast %35 : vector<8x8x4xbf16> to vector<64x4xbf16>
    %c28 = arith.constant 28 : index
    %c0_16 = arith.constant 0 : index
    %37 = vector.load %arg4[%c28, %c0_16] : memref<36x128xbf16, #tpu.memory_space<vmem>>, vector<4x128xbf16>
    %cst_17 = arith.constant dense<0.000000e+00> : vector<64x128xf32>
    %38 = tpu.matmul %36, %37, %cst_17 {dimension_numbers = #tpu.dot_dimension_numbers<[1], [0], [0], [1], [0, 0, 1, 1], [], []>} : vector<64x4xbf16>, vector<4x128xbf16>, vector<64x128xf32> -> vector<64x128xf32>
    %39 = arith.addf %34, %38 : vector<64x128xf32>
    %c18_i32 = arith.constant 18 : i32
    %40 = arith.addi %c18_i32, %0 : i32
    %c0_18 = arith.constant 0 : index
    %41 = arith.index_cast %40 : i32 to index
    %c0_19 = arith.constant 0 : index
    %c0_20 = arith.constant 0 : index
    %42 = vector.load %arg3[%c0_18, %41, %c0_19, %c0_20] : memref<1x36x9x4xbf16, #tpu.memory_space<vmem>>, vector<1x9x9x4xbf16>
    %43 = vector.shape_cast %42 : vector<1x9x9x4xbf16> to vector<9x9x4xbf16>
    %44 = vector.extract_strided_slice %43 {offsets = [0, 0, 0], sizes = [8, 8, 4], strides = [1, 1, 1]} : vector<9x9x4xbf16> to vector<8x8x4xbf16>
    %45 = vector.shape_cast %44 : vector<8x8x4xbf16> to vector<64x4xbf16>
    %c12 = arith.constant 12 : index
    %c0_21 = arith.constant 0 : index
    %46 = vector.load %arg4[%c12, %c0_21] : memref<36x128xbf16, #tpu.memory_space<vmem>>, vector<4x128xbf16>
    %cst_22 = arith.constant dense<0.000000e+00> : vector<64x128xf32>
    %47 = tpu.matmul %45, %46, %cst_22 {dimension_numbers = #tpu.dot_dimension_numbers<[1], [0], [0], [1], [0, 0, 1, 1], [], []>} : vector<64x4xbf16>, vector<4x128xbf16>, vector<64x128xf32> -> vector<64x128xf32>
    %48 = arith.addf %39, %47 : vector<64x128xf32>
    %49 = vector.extract_strided_slice %43 {offsets = [0, 1, 0], sizes = [8, 8, 4], strides = [1, 1, 1]} : vector<9x9x4xbf16> to vector<8x8x4xbf16>
    %50 = vector.shape_cast %49 : vector<8x8x4xbf16> to vector<64x4xbf16>
    %c20 = arith.constant 20 : index
    %c0_23 = arith.constant 0 : index
    %51 = vector.load %arg4[%c20, %c0_23] : memref<36x128xbf16, #tpu.memory_space<vmem>>, vector<4x128xbf16>
    %cst_24 = arith.constant dense<0.000000e+00> : vector<64x128xf32>
    %52 = tpu.matmul %50, %51, %cst_24 {dimension_numbers = #tpu.dot_dimension_numbers<[1], [0], [0], [1], [0, 0, 1, 1], [], []>} : vector<64x4xbf16>, vector<4x128xbf16>, vector<64x128xf32> -> vector<64x128xf32>
    %53 = arith.addf %48, %52 : vector<64x128xf32>
    %c27_i32 = arith.constant 27 : i32
    %54 = arith.addi %c27_i32, %0 : i32
    %c0_25 = arith.constant 0 : index
    %55 = arith.index_cast %54 : i32 to index
    %c0_26 = arith.constant 0 : index
    %c0_27 = arith.constant 0 : index
    %56 = vector.load %arg3[%c0_25, %55, %c0_26, %c0_27] : memref<1x36x9x4xbf16, #tpu.memory_space<vmem>>, vector<1x9x9x4xbf16>
    %57 = vector.shape_cast %56 : vector<1x9x9x4xbf16> to vector<9x9x4xbf16>
    %58 = vector.extract_strided_slice %57 {offsets = [0, 0, 0], sizes = [8, 8, 4], strides = [1, 1, 1]} : vector<9x9x4xbf16> to vector<8x8x4xbf16>
    %59 = vector.shape_cast %58 : vector<8x8x4xbf16> to vector<64x4xbf16>
    %c16 = arith.constant 16 : index
    %c0_28 = arith.constant 0 : index
    %60 = vector.load %arg4[%c16, %c0_28] : memref<36x128xbf16, #tpu.memory_space<vmem>>, vector<4x128xbf16>
    %cst_29 = arith.constant dense<0.000000e+00> : vector<64x128xf32>
    %61 = tpu.matmul %59, %60, %cst_29 {dimension_numbers = #tpu.dot_dimension_numbers<[1], [0], [0], [1], [0, 0, 1, 1], [], []>} : vector<64x4xbf16>, vector<4x128xbf16>, vector<64x128xf32> -> vector<64x128xf32>
    %62 = arith.addf %53, %61 : vector<64x128xf32>
    %c0_30 = arith.constant 0 : index
    %c0_31 = arith.constant 0 : index
    %63 = vector.load %arg5[%c0_30, %c0_31] : memref<1x128xf32, #tpu.memory_space<vmem>>, vector<1x128xf32>
    %64 = vector.broadcast %63 : vector<1x128xf32> to vector<64x128xf32>
    %65 = arith.addf %62, %64 : vector<64x128xf32>
    %c0_i32_32 = arith.constant 0 : i32
    %66 = arith.cmpi eq, %arg1, %c0_i32_32 : i32
    %c0_i32_33 = arith.constant 0 : i32
    %67 = arith.cmpi eq, %arg2, %c0_i32_33 : i32
    %68 = arith.andi %66, %67 : i1
    %c0_i32_34 = arith.constant 0 : i32
    %69 = arith.cmpi eq, %arg0, %c0_i32_34 : i32
    %70 = arith.andi %69, %68 : i1
    %71 = arith.extui %70 : i1 to i32
    %c0_i32_35 = arith.constant 0 : i32
    %72 = arith.cmpi ne, %71, %c0_i32_35 : i32
    scf.if %72 {
      %cst_41 = arith.constant 0.000000e+00 : f32
      %83 = vector.broadcast %cst_41 : f32 to vector<8x128xf32>
      %c0_42 = arith.constant 0 : index
      %c0_43 = arith.constant 0 : index
      %84 = vector.load %arg9[%c0_42, %c0_43] : memref<8x128xf32, #tpu.memory_space<vmem>>, vector<8x128xf32>
      tpu.vector_store %arg9[%c0_42, %c0_43], %83 {strides = array<i32>} : memref<8x128xf32, #tpu.memory_space<vmem>>, vector<8x128xf32>,
      %cst_44 = arith.constant 0.000000e+00 : f32
      %85 = vector.broadcast %cst_44 : f32 to vector<8x128xf32>
      %c0_45 = arith.constant 0 : index
      %c0_46 = arith.constant 0 : index
      %86 = vector.load %arg10[%c0_45, %c0_46] : memref<8x128xf32, #tpu.memory_space<vmem>>, vector<8x128xf32>
      tpu.vector_store %arg10[%c0_45, %c0_46], %85 {strides = array<i32>} : memref<8x128xf32, #tpu.memory_space<vmem>>, vector<8x128xf32>,
      %87 = vector.extract_strided_slice %65 {offsets = [0, 0], sizes = [1, 128], strides = [1, 1]} : vector<64x128xf32> to vector<1x128xf32>
      %c0_47 = arith.constant 0 : index
      %c0_48 = arith.constant 0 : index
      %88 = vector.load %arg11[%c0_47, %c0_48] : memref<1x128xf32, #tpu.memory_space<vmem>>, vector<1x128xf32>
      tpu.vector_store %arg11[%c0_47, %c0_48], %87 {strides = array<i32>} : memref<1x128xf32, #tpu.memory_space<vmem>>, vector<1x128xf32>,
    } else {
    }
    %c0_i32_36 = arith.constant 0 : i32
    %73 = arith.cmpi eq, %arg0, %c0_i32_36 : i32
    %74 = arith.extui %73 : i1 to i32
    %c0_i32_37 = arith.constant 0 : i32
    %75 = arith.cmpi ne, %74, %c0_i32_37 : i32
    scf.if %75 {
      %c0_41 = arith.constant 0 : index
      %c0_42 = arith.constant 0 : index
      %83 = vector.load %arg11[%c0_41, %c0_42] : memref<1x128xf32, #tpu.memory_space<vmem>>, vector<1x128xf32>
      %84 = vector.broadcast %83 : vector<1x128xf32> to vector<64x128xf32>
      %85 = arith.subf %65, %84 : vector<64x128xf32>
      %c0_43 = arith.constant 0 : index
      %c0_44 = arith.constant 0 : index
      %86 = vector.load %arg9[%c0_43, %c0_44] : memref<8x128xf32, #tpu.memory_space<vmem>>, vector<8x128xf32>
      %87 = vector.shape_cast %85 : vector<64x128xf32> to vector<8x8x128xf32>
      %cst_45 = arith.constant dense<0.000000e+00> : vector<8x128xf32>
      %88 = vector.multi_reduction <add>, %87, %cst_45 [0] : vector<8x8x128xf32> to vector<8x128xf32>
      %89 = arith.addf %86, %88 : vector<8x128xf32>
      %c0_46 = arith.constant 0 : index
      %c0_47 = arith.constant 0 : index
      %90 = vector.load %arg9[%c0_46, %c0_47] : memref<8x128xf32, #tpu.memory_space<vmem>>, vector<8x128xf32>
      tpu.vector_store %arg9[%c0_46, %c0_47], %89 {strides = array<i32>} : memref<8x128xf32, #tpu.memory_space<vmem>>, vector<8x128xf32>,
      %c0_48 = arith.constant 0 : index
      %c0_49 = arith.constant 0 : index
      %91 = vector.load %arg10[%c0_48, %c0_49] : memref<8x128xf32, #tpu.memory_space<vmem>>, vector<8x128xf32>
      %92 = arith.mulf %85, %85 : vector<64x128xf32>
      %93 = vector.shape_cast %92 : vector<64x128xf32> to vector<8x8x128xf32>
      %cst_50 = arith.constant dense<0.000000e+00> : vector<8x128xf32>
      %94 = vector.multi_reduction <add>, %93, %cst_50 [0] : vector<8x8x128xf32> to vector<8x128xf32>
      %95 = arith.addf %91, %94 : vector<8x128xf32>
      %c0_51 = arith.constant 0 : index
      %c0_52 = arith.constant 0 : index
      %96 = vector.load %arg10[%c0_51, %c0_52] : memref<8x128xf32, #tpu.memory_space<vmem>>, vector<8x128xf32>
      tpu.vector_store %arg10[%c0_51, %c0_52], %95 {strides = array<i32>} : memref<8x128xf32, #tpu.memory_space<vmem>>, vector<8x128xf32>,
    } else {
    }
    %c1_i32 = arith.constant 1 : i32
    %76 = arith.cmpi eq, %arg0, %c1_i32 : i32
    %77 = arith.andi %76, %68 : i1
    %78 = arith.extui %77 : i1 to i32
    %c0_i32_38 = arith.constant 0 : i32
    %79 = arith.cmpi ne, %78, %c0_i32_38 : i32
    scf.if %79 {
      %c0_41 = arith.constant 0 : index
      %c0_42 = arith.constant 0 : index
      %83 = vector.load %arg9[%c0_41, %c0_42] : memref<8x128xf32, #tpu.memory_space<vmem>>, vector<8x128xf32>
      %cst_43 = arith.constant dense<0.000000e+00> : vector<128xf32>
      %84 = vector.multi_reduction <add>, %83, %cst_43 [0] : vector<8x128xf32> to vector<128xf32>
      %85 = vector.shape_cast %84 : vector<128xf32> to vector<1x128xf32>
      %cst_44 = arith.constant 7.812500e-03 : f32
      %86 = vector.broadcast %cst_44 : f32 to vector<1x128xf32>
      %87 = arith.mulf %85, %86 : vector<1x128xf32>
      %c0_45 = arith.constant 0 : index
      %c0_46 = arith.constant 0 : index
      %88 = vector.load %arg10[%c0_45, %c0_46] : memref<8x128xf32, #tpu.memory_space<vmem>>, vector<8x128xf32>
      %cst_47 = arith.constant dense<0.000000e+00> : vector<128xf32>
      %89 = vector.multi_reduction <add>, %88, %cst_47 [0] : vector<8x128xf32> to vector<128xf32>
      %90 = vector.shape_cast %89 : vector<128xf32> to vector<1x128xf32>
      %cst_48 = arith.constant 7.812500e-03 : f32
      %91 = vector.broadcast %cst_48 : f32 to vector<1x128xf32>
      %92 = arith.mulf %90, %91 : vector<1x128xf32>
      %93 = arith.mulf %87, %87 : vector<1x128xf32>
      %94 = arith.subf %92, %93 : vector<1x128xf32>
      %cst_49 = arith.constant 0.000000e+00 : f32
      %95 = vector.broadcast %cst_49 : f32 to vector<1x128xf32>
      %96 = arith.maximumf %94, %95 : vector<1x128xf32>
      %c0_50 = arith.constant 0 : index
      %c0_51 = arith.constant 0 : index
      %97 = vector.load %arg11[%c0_50, %c0_51] : memref<1x128xf32, #tpu.memory_space<vmem>>, vector<1x128xf32>
      %98 = arith.addf %87, %97 : vector<1x128xf32>
      %cst_52 = arith.constant 9.99999974E-6 : f32
      %99 = vector.broadcast %cst_52 : f32 to vector<1x128xf32>
      %100 = arith.addf %96, %99 : vector<1x128xf32>
      %101 = math.rsqrt %100 : vector<1x128xf32>
      %c0_53 = arith.constant 0 : index
      %c0_54 = arith.constant 0 : index
      %102 = vector.load %arg6[%c0_53, %c0_54] : memref<1x128xf32, #tpu.memory_space<vmem>>, vector<1x128xf32>
      %103 = arith.mulf %101, %102 : vector<1x128xf32>
      %c0_55 = arith.constant 0 : index
      %c0_56 = arith.constant 0 : index
      %104 = vector.load %arg12[%c0_55, %c0_56] : memref<2x128xf32, #tpu.memory_space<vmem>>, vector<1x128xf32>
      tpu.vector_store %arg12[%c0_55, %c0_56], %103 {strides = array<i32>} : memref<2x128xf32, #tpu.memory_space<vmem>>, vector<1x128xf32>,
      %c0_57 = arith.constant 0 : index
      %c0_58 = arith.constant 0 : index
      %105 = vector.load %arg7[%c0_57, %c0_58] : memref<1x128xf32, #tpu.memory_space<vmem>>, vector<1x128xf32>
      %106 = arith.mulf %98, %103 : vector<1x128xf32>
      %107 = arith.subf %105, %106 : vector<1x128xf32>
      %c1 = arith.constant 1 : index
      %c0_59 = arith.constant 0 : index
      %108 = vector.load %arg12[%c1, %c0_59] : memref<2x128xf32, #tpu.memory_space<vmem>>, vector<1x128xf32>
      tpu.vector_store %arg12[%c1, %c0_59], %107 {strides = array<i32>} : memref<2x128xf32, #tpu.memory_space<vmem>>, vector<1x128xf32>,
    } else {
    }
    %c1_i32_39 = arith.constant 1 : i32
    %80 = arith.cmpi eq, %arg0, %c1_i32_39 : i32
    %81 = arith.extui %80 : i1 to i32
    %c0_i32_40 = arith.constant 0 : i32
    %82 = arith.cmpi ne, %81, %c0_i32_40 : i32
    scf.if %82 {
      %c0_41 = arith.constant 0 : index
      %c0_42 = arith.constant 0 : index
      %83 = vector.load %arg12[%c0_41, %c0_42] : memref<2x128xf32, #tpu.memory_space<vmem>>, vector<1x128xf32>
      %84 = vector.broadcast %83 : vector<1x128xf32> to vector<64x128xf32>
      %85 = arith.mulf %65, %84 : vector<64x128xf32>
      %c1 = arith.constant 1 : index
      %c0_43 = arith.constant 0 : index
      %86 = vector.load %arg12[%c1, %c0_43] : memref<2x128xf32, #tpu.memory_space<vmem>>, vector<1x128xf32>
      %87 = vector.broadcast %86 : vector<1x128xf32> to vector<64x128xf32>
      %88 = arith.addf %85, %87 : vector<64x128xf32>
      %cst_44 = arith.constant 0.000000e+00 : f32
      %89 = vector.broadcast %cst_44 : f32 to vector<64x128xf32>
      %90 = arith.cmpf ogt, %88, %89 : vector<64x128xf32>
      %cst_45 = arith.constant 0.00999999977 : f32
      %91 = vector.broadcast %cst_45 : f32 to vector<64x128xf32>
      %92 = arith.mulf %91, %88 : vector<64x128xf32>
      %93 = arith.select %90, %88, %92 : vector<64x128xi1>, vector<64x128xf32>
      %94 = vector.shape_cast %93 : vector<64x128xf32> to vector<8x8x128xf32>
      %95 = arith.truncf %94 : vector<8x8x128xf32> to vector<8x8x128xbf16>
      %c0_46 = arith.constant 0 : index
      %c0_47 = arith.constant 0 : index
      %c0_48 = arith.constant 0 : index
      %c0_49 = arith.constant 0 : index
      %96 = vector.load %arg8[%c0_46, %c0_47, %c0_48, %c0_49] : memref<1x8x8x128xbf16, #tpu.memory_space<vmem>>, vector<1x8x8x128xbf16>
      %97 = vector.shape_cast %96 : vector<1x8x8x128xbf16> to vector<8x8x128xbf16>
      %98 = vector.shape_cast %95 : vector<8x8x128xbf16> to vector<1x8x8x128xbf16>
      tpu.vector_store %arg8[%c0_46, %c0_47, %c0_48, %c0_49], %98 {strides = array<i32>} : memref<1x8x8x128xbf16, #tpu.memory_space<vmem>>, vector<1x8x8x128xbf16>,
    } else {
    }
    return
  }
  func.func @transform_0(%arg0: i32, %arg1: i32, %arg2: i32) -> (i32, i32, i32, i32) {
    %c0_i32 = arith.constant 0 : i32
    %c0_i32_0 = arith.constant 0 : i32
    %c0_i32_1 = arith.constant 0 : i32
    %c0_i32_2 = arith.constant 0 : i32
    return %arg1, %c0_i32, %c0_i32_0, %c0_i32_1 : i32, i32, i32, i32
  }
  func.func @transform_1(%arg0: i32, %arg1: i32, %arg2: i32) -> (i32, i32) {
    %c0_i32 = arith.constant 0 : i32
    %c0_i32_0 = arith.constant 0 : i32
    %c0_i32_1 = arith.constant 0 : i32
    return %c0_i32, %c0_i32_0 : i32, i32
  }
  func.func @transform_2(%arg0: i32, %arg1: i32, %arg2: i32) -> (i32, i32) {
    %c0_i32 = arith.constant 0 : i32
    %c0_i32_0 = arith.constant 0 : i32
    %c0_i32_1 = arith.constant 0 : i32
    return %c0_i32, %c0_i32_0 : i32, i32
  }
  func.func @transform_3(%arg0: i32, %arg1: i32, %arg2: i32) -> (i32, i32) {
    %c0_i32 = arith.constant 0 : i32
    %c0_i32_0 = arith.constant 0 : i32
    %c0_i32_1 = arith.constant 0 : i32
    return %c0_i32, %c0_i32_0 : i32, i32
  }
  func.func @transform_4(%arg0: i32, %arg1: i32, %arg2: i32) -> (i32, i32) {
    %c0_i32 = arith.constant 0 : i32
    %c0_i32_0 = arith.constant 0 : i32
    %c0_i32_1 = arith.constant 0 : i32
    return %c0_i32, %c0_i32_0 : i32, i32
  }
  func.func @transform_5(%arg0: i32, %arg1: i32, %arg2: i32) -> (i32, i32, i32, i32) {
    %0 = arith.muli %arg1, %arg0 : i32
    %1 = arith.muli %arg2, %arg0 : i32
    %c0_i32 = arith.constant 0 : i32
    %c0_i32_0 = arith.constant 0 : i32
    %c0_i32_1 = arith.constant 0 : i32
    return %0, %1, %c0_i32, %c0_i32_0 : i32, i32, i32, i32
  }
}

module attributes {stable_mosaic.version = 11 : i64} {
  func.func @_conv_bn_lrelu_kernel(%arg0: i32, %arg1: i32, %arg2: i32, %arg3: memref<1x20x5x128xbf16, #tpu.memory_space<vmem>>, %arg4: memref<1152x128xbf16, #tpu.memory_space<vmem>>, %arg5: memref<1x128xf32, #tpu.memory_space<vmem>>, %arg6: memref<1x128xf32, #tpu.memory_space<vmem>>, %arg7: memref<1x128xf32, #tpu.memory_space<vmem>>, %arg8: memref<1x4x4x128xbf16, #tpu.memory_space<vmem>>, %arg9: memref<8x128xf32, #tpu.memory_space<vmem>>, %arg10: memref<8x128xf32, #tpu.memory_space<vmem>>, %arg11: memref<1x128xf32, #tpu.memory_space<vmem>>, %arg12: memref<2x128xf32, #tpu.memory_space<vmem>>, %arg13: memref<16x1152xbf16, #tpu.memory_space<vmem>>) attributes {dimension_semantics = [#tpu.dimension_semantics<arbitrary>, #tpu.dimension_semantics<arbitrary>, #tpu.dimension_semantics<arbitrary>], iteration_bounds = array<i64: 2, 2, 1>, scalar_prefetch = 0 : i64, scratch_operands = 5 : i64, tpu.core_type = #tpu.core_type<tc>, window_params = [{transform_indices = @transform_0, window_bounds = array<i64: 1, 20, 5, 128>}, {pipeline_mode = #tpu.pipeline_mode<synchronous>, transform_indices = @transform_1, window_bounds = array<i64: 1152, 128>}, {pipeline_mode = #tpu.pipeline_mode<synchronous>, transform_indices = @transform_2, window_bounds = array<i64: 1, 128>}, {pipeline_mode = #tpu.pipeline_mode<synchronous>, transform_indices = @transform_3, window_bounds = array<i64: 1, 128>}, {pipeline_mode = #tpu.pipeline_mode<synchronous>, transform_indices = @transform_4, window_bounds = array<i64: 1, 128>}, {transform_indices = @transform_5, window_bounds = array<i64: 1, 4, 4, 128>}]} {
    %c4_i32 = arith.constant 4 : i32
    %0 = arith.muli %arg2, %c4_i32 : i32
    %c0_i32 = arith.constant 0 : i32
    %1 = arith.addi %c0_i32, %0 : i32
    %c0 = arith.constant 0 : index
    %2 = arith.index_cast %1 : i32 to index
    %c0_0 = arith.constant 0 : index
    %c0_1 = arith.constant 0 : index
    %3 = vector.load %arg3[%c0, %2, %c0_0, %c0_1] : memref<1x20x5x128xbf16, #tpu.memory_space<vmem>>, vector<1x5x5x128xbf16>
    %4 = vector.shape_cast %3 : vector<1x5x5x128xbf16> to vector<5x5x128xbf16>
    %5 = vector.extract_strided_slice %4 {offsets = [0, 0, 0], sizes = [4, 4, 128], strides = [1, 1, 1]} : vector<5x5x128xbf16> to vector<4x4x128xbf16>
    %6 = vector.shape_cast %5 : vector<4x4x128xbf16> to vector<16x128xbf16>
    %c0_2 = arith.constant 0 : index
    %c0_3 = arith.constant 0 : index
    %7 = vector.load %arg13[%c0_2, %c0_3] : memref<16x1152xbf16, #tpu.memory_space<vmem>>, vector<16x128xbf16>
    tpu.vector_store %arg13[%c0_2, %c0_3], %6 {strides = array<i32>} : memref<16x1152xbf16, #tpu.memory_space<vmem>>, vector<16x128xbf16>,
    %8 = vector.extract_strided_slice %4 {offsets = [0, 1, 0], sizes = [4, 4, 128], strides = [1, 1, 1]} : vector<5x5x128xbf16> to vector<4x4x128xbf16>
    %9 = vector.shape_cast %8 : vector<4x4x128xbf16> to vector<16x128xbf16>
    %c0_4 = arith.constant 0 : index
    %c256 = arith.constant 256 : index
    %10 = vector.load %arg13[%c0_4, %c256] : memref<16x1152xbf16, #tpu.memory_space<vmem>>, vector<16x128xbf16>
    tpu.vector_store %arg13[%c0_4, %c256], %9 {strides = array<i32>} : memref<16x1152xbf16, #tpu.memory_space<vmem>>, vector<16x128xbf16>,
    %11 = vector.extract_strided_slice %4 {offsets = [1, 0, 0], sizes = [4, 4, 128], strides = [1, 1, 1]} : vector<5x5x128xbf16> to vector<4x4x128xbf16>
    %12 = vector.shape_cast %11 : vector<4x4x128xbf16> to vector<16x128xbf16>
    %c0_5 = arith.constant 0 : index
    %c768 = arith.constant 768 : index
    %13 = vector.load %arg13[%c0_5, %c768] : memref<16x1152xbf16, #tpu.memory_space<vmem>>, vector<16x128xbf16>
    tpu.vector_store %arg13[%c0_5, %c768], %12 {strides = array<i32>} : memref<16x1152xbf16, #tpu.memory_space<vmem>>, vector<16x128xbf16>,
    %14 = vector.extract_strided_slice %4 {offsets = [1, 1, 0], sizes = [4, 4, 128], strides = [1, 1, 1]} : vector<5x5x128xbf16> to vector<4x4x128xbf16>
    %15 = vector.shape_cast %14 : vector<4x4x128xbf16> to vector<16x128xbf16>
    %c0_6 = arith.constant 0 : index
    %c1024 = arith.constant 1024 : index
    %16 = vector.load %arg13[%c0_6, %c1024] : memref<16x1152xbf16, #tpu.memory_space<vmem>>, vector<16x128xbf16>
    tpu.vector_store %arg13[%c0_6, %c1024], %15 {strides = array<i32>} : memref<16x1152xbf16, #tpu.memory_space<vmem>>, vector<16x128xbf16>,
    %c5_i32 = arith.constant 5 : i32
    %17 = arith.addi %c5_i32, %0 : i32
    %c0_7 = arith.constant 0 : index
    %18 = arith.index_cast %17 : i32 to index
    %c0_8 = arith.constant 0 : index
    %c0_9 = arith.constant 0 : index
    %19 = vector.load %arg3[%c0_7, %18, %c0_8, %c0_9] : memref<1x20x5x128xbf16, #tpu.memory_space<vmem>>, vector<1x5x5x128xbf16>
    %20 = vector.shape_cast %19 : vector<1x5x5x128xbf16> to vector<5x5x128xbf16>
    %21 = vector.extract_strided_slice %20 {offsets = [0, 0, 0], sizes = [4, 4, 128], strides = [1, 1, 1]} : vector<5x5x128xbf16> to vector<4x4x128xbf16>
    %22 = vector.shape_cast %21 : vector<4x4x128xbf16> to vector<16x128xbf16>
    %c0_10 = arith.constant 0 : index
    %c128 = arith.constant 128 : index
    %23 = vector.load %arg13[%c0_10, %c128] : memref<16x1152xbf16, #tpu.memory_space<vmem>>, vector<16x128xbf16>
    tpu.vector_store %arg13[%c0_10, %c128], %22 {strides = array<i32>} : memref<16x1152xbf16, #tpu.memory_space<vmem>>, vector<16x128xbf16>,
    %24 = vector.extract_strided_slice %20 {offsets = [1, 0, 0], sizes = [4, 4, 128], strides = [1, 1, 1]} : vector<5x5x128xbf16> to vector<4x4x128xbf16>
    %25 = vector.shape_cast %24 : vector<4x4x128xbf16> to vector<16x128xbf16>
    %c0_11 = arith.constant 0 : index
    %c896 = arith.constant 896 : index
    %26 = vector.load %arg13[%c0_11, %c896] : memref<16x1152xbf16, #tpu.memory_space<vmem>>, vector<16x128xbf16>
    tpu.vector_store %arg13[%c0_11, %c896], %25 {strides = array<i32>} : memref<16x1152xbf16, #tpu.memory_space<vmem>>, vector<16x128xbf16>,
    %c10_i32 = arith.constant 10 : i32
    %27 = arith.addi %c10_i32, %0 : i32
    %c0_12 = arith.constant 0 : index
    %28 = arith.index_cast %27 : i32 to index
    %c0_13 = arith.constant 0 : index
    %c0_14 = arith.constant 0 : index
    %29 = vector.load %arg3[%c0_12, %28, %c0_13, %c0_14] : memref<1x20x5x128xbf16, #tpu.memory_space<vmem>>, vector<1x5x5x128xbf16>
    %30 = vector.shape_cast %29 : vector<1x5x5x128xbf16> to vector<5x5x128xbf16>
    %31 = vector.extract_strided_slice %30 {offsets = [0, 0, 0], sizes = [4, 4, 128], strides = [1, 1, 1]} : vector<5x5x128xbf16> to vector<4x4x128xbf16>
    %32 = vector.shape_cast %31 : vector<4x4x128xbf16> to vector<16x128xbf16>
    %c0_15 = arith.constant 0 : index
    %c384 = arith.constant 384 : index
    %33 = vector.load %arg13[%c0_15, %c384] : memref<16x1152xbf16, #tpu.memory_space<vmem>>, vector<16x128xbf16>
    tpu.vector_store %arg13[%c0_15, %c384], %32 {strides = array<i32>} : memref<16x1152xbf16, #tpu.memory_space<vmem>>, vector<16x128xbf16>,
    %34 = vector.extract_strided_slice %30 {offsets = [0, 1, 0], sizes = [4, 4, 128], strides = [1, 1, 1]} : vector<5x5x128xbf16> to vector<4x4x128xbf16>
    %35 = vector.shape_cast %34 : vector<4x4x128xbf16> to vector<16x128xbf16>
    %c0_16 = arith.constant 0 : index
    %c640 = arith.constant 640 : index
    %36 = vector.load %arg13[%c0_16, %c640] : memref<16x1152xbf16, #tpu.memory_space<vmem>>, vector<16x128xbf16>
    tpu.vector_store %arg13[%c0_16, %c640], %35 {strides = array<i32>} : memref<16x1152xbf16, #tpu.memory_space<vmem>>, vector<16x128xbf16>,
    %c15_i32 = arith.constant 15 : i32
    %37 = arith.addi %c15_i32, %0 : i32
    %c0_17 = arith.constant 0 : index
    %38 = arith.index_cast %37 : i32 to index
    %c0_18 = arith.constant 0 : index
    %c0_19 = arith.constant 0 : index
    %39 = vector.load %arg3[%c0_17, %38, %c0_18, %c0_19] : memref<1x20x5x128xbf16, #tpu.memory_space<vmem>>, vector<1x5x5x128xbf16>
    %40 = vector.shape_cast %39 : vector<1x5x5x128xbf16> to vector<5x5x128xbf16>
    %41 = vector.extract_strided_slice %40 {offsets = [0, 0, 0], sizes = [4, 4, 128], strides = [1, 1, 1]} : vector<5x5x128xbf16> to vector<4x4x128xbf16>
    %42 = vector.shape_cast %41 : vector<4x4x128xbf16> to vector<16x128xbf16>
    %c0_20 = arith.constant 0 : index
    %c512 = arith.constant 512 : index
    %43 = vector.load %arg13[%c0_20, %c512] : memref<16x1152xbf16, #tpu.memory_space<vmem>>, vector<16x128xbf16>
    tpu.vector_store %arg13[%c0_20, %c512], %42 {strides = array<i32>} : memref<16x1152xbf16, #tpu.memory_space<vmem>>, vector<16x128xbf16>,
    %c0_21 = arith.constant 0 : index
    %c0_22 = arith.constant 0 : index
    %44 = vector.load %arg13[%c0_21, %c0_22] : memref<16x1152xbf16, #tpu.memory_space<vmem>>, vector<16x1152xbf16>
    %c0_23 = arith.constant 0 : index
    %c0_24 = arith.constant 0 : index
    %45 = vector.load %arg4[%c0_23, %c0_24] : memref<1152x128xbf16, #tpu.memory_space<vmem>>, vector<1152x128xbf16>
    %cst = arith.constant dense<0.000000e+00> : vector<16x128xf32>
    %46 = tpu.matmul %44, %45, %cst {dimension_numbers = #tpu.dot_dimension_numbers<[1], [0], [0], [1], [0, 0, 1, 1], [], []>} : vector<16x1152xbf16>, vector<1152x128xbf16>, vector<16x128xf32> -> vector<16x128xf32>
    %c0_25 = arith.constant 0 : index
    %c0_26 = arith.constant 0 : index
    %47 = vector.load %arg5[%c0_25, %c0_26] : memref<1x128xf32, #tpu.memory_space<vmem>>, vector<1x128xf32>
    %48 = vector.broadcast %47 : vector<1x128xf32> to vector<16x128xf32>
    %49 = arith.addf %46, %48 : vector<16x128xf32>
    %c0_i32_27 = arith.constant 0 : i32
    %50 = arith.cmpi eq, %arg1, %c0_i32_27 : i32
    %c0_i32_28 = arith.constant 0 : i32
    %51 = arith.cmpi eq, %arg2, %c0_i32_28 : i32
    %52 = arith.andi %50, %51 : i1
    %c0_i32_29 = arith.constant 0 : i32
    %53 = arith.cmpi eq, %arg0, %c0_i32_29 : i32
    %54 = arith.andi %53, %52 : i1
    %55 = arith.extui %54 : i1 to i32
    %c0_i32_30 = arith.constant 0 : i32
    %56 = arith.cmpi ne, %55, %c0_i32_30 : i32
    scf.if %56 {
      %cst_36 = arith.constant 0.000000e+00 : f32
      %67 = vector.broadcast %cst_36 : f32 to vector<8x128xf32>
      %c0_37 = arith.constant 0 : index
      %c0_38 = arith.constant 0 : index
      %68 = vector.load %arg9[%c0_37, %c0_38] : memref<8x128xf32, #tpu.memory_space<vmem>>, vector<8x128xf32>
      tpu.vector_store %arg9[%c0_37, %c0_38], %67 {strides = array<i32>} : memref<8x128xf32, #tpu.memory_space<vmem>>, vector<8x128xf32>,
      %cst_39 = arith.constant 0.000000e+00 : f32
      %69 = vector.broadcast %cst_39 : f32 to vector<8x128xf32>
      %c0_40 = arith.constant 0 : index
      %c0_41 = arith.constant 0 : index
      %70 = vector.load %arg10[%c0_40, %c0_41] : memref<8x128xf32, #tpu.memory_space<vmem>>, vector<8x128xf32>
      tpu.vector_store %arg10[%c0_40, %c0_41], %69 {strides = array<i32>} : memref<8x128xf32, #tpu.memory_space<vmem>>, vector<8x128xf32>,
      %71 = vector.extract_strided_slice %49 {offsets = [0, 0], sizes = [1, 128], strides = [1, 1]} : vector<16x128xf32> to vector<1x128xf32>
      %c0_42 = arith.constant 0 : index
      %c0_43 = arith.constant 0 : index
      %72 = vector.load %arg11[%c0_42, %c0_43] : memref<1x128xf32, #tpu.memory_space<vmem>>, vector<1x128xf32>
      tpu.vector_store %arg11[%c0_42, %c0_43], %71 {strides = array<i32>} : memref<1x128xf32, #tpu.memory_space<vmem>>, vector<1x128xf32>,
    } else {
    }
    %c0_i32_31 = arith.constant 0 : i32
    %57 = arith.cmpi eq, %arg0, %c0_i32_31 : i32
    %58 = arith.extui %57 : i1 to i32
    %c0_i32_32 = arith.constant 0 : i32
    %59 = arith.cmpi ne, %58, %c0_i32_32 : i32
    scf.if %59 {
      %c0_36 = arith.constant 0 : index
      %c0_37 = arith.constant 0 : index
      %67 = vector.load %arg11[%c0_36, %c0_37] : memref<1x128xf32, #tpu.memory_space<vmem>>, vector<1x128xf32>
      %68 = vector.broadcast %67 : vector<1x128xf32> to vector<16x128xf32>
      %69 = arith.subf %49, %68 : vector<16x128xf32>
      %c0_38 = arith.constant 0 : index
      %c0_39 = arith.constant 0 : index
      %70 = vector.load %arg9[%c0_38, %c0_39] : memref<8x128xf32, #tpu.memory_space<vmem>>, vector<8x128xf32>
      %71 = vector.shape_cast %69 : vector<16x128xf32> to vector<2x8x128xf32>
      %cst_40 = arith.constant dense<0.000000e+00> : vector<8x128xf32>
      %72 = vector.multi_reduction <add>, %71, %cst_40 [0] : vector<2x8x128xf32> to vector<8x128xf32>
      %73 = arith.addf %70, %72 : vector<8x128xf32>
      %c0_41 = arith.constant 0 : index
      %c0_42 = arith.constant 0 : index
      %74 = vector.load %arg9[%c0_41, %c0_42] : memref<8x128xf32, #tpu.memory_space<vmem>>, vector<8x128xf32>
      tpu.vector_store %arg9[%c0_41, %c0_42], %73 {strides = array<i32>} : memref<8x128xf32, #tpu.memory_space<vmem>>, vector<8x128xf32>,
      %c0_43 = arith.constant 0 : index
      %c0_44 = arith.constant 0 : index
      %75 = vector.load %arg10[%c0_43, %c0_44] : memref<8x128xf32, #tpu.memory_space<vmem>>, vector<8x128xf32>
      %76 = arith.mulf %69, %69 : vector<16x128xf32>
      %77 = vector.shape_cast %76 : vector<16x128xf32> to vector<2x8x128xf32>
      %cst_45 = arith.constant dense<0.000000e+00> : vector<8x128xf32>
      %78 = vector.multi_reduction <add>, %77, %cst_45 [0] : vector<2x8x128xf32> to vector<8x128xf32>
      %79 = arith.addf %75, %78 : vector<8x128xf32>
      %c0_46 = arith.constant 0 : index
      %c0_47 = arith.constant 0 : index
      %80 = vector.load %arg10[%c0_46, %c0_47] : memref<8x128xf32, #tpu.memory_space<vmem>>, vector<8x128xf32>
      tpu.vector_store %arg10[%c0_46, %c0_47], %79 {strides = array<i32>} : memref<8x128xf32, #tpu.memory_space<vmem>>, vector<8x128xf32>,
    } else {
    }
    %c1_i32 = arith.constant 1 : i32
    %60 = arith.cmpi eq, %arg0, %c1_i32 : i32
    %61 = arith.andi %60, %52 : i1
    %62 = arith.extui %61 : i1 to i32
    %c0_i32_33 = arith.constant 0 : i32
    %63 = arith.cmpi ne, %62, %c0_i32_33 : i32
    scf.if %63 {
      %c0_36 = arith.constant 0 : index
      %c0_37 = arith.constant 0 : index
      %67 = vector.load %arg9[%c0_36, %c0_37] : memref<8x128xf32, #tpu.memory_space<vmem>>, vector<8x128xf32>
      %cst_38 = arith.constant dense<0.000000e+00> : vector<128xf32>
      %68 = vector.multi_reduction <add>, %67, %cst_38 [0] : vector<8x128xf32> to vector<128xf32>
      %69 = vector.shape_cast %68 : vector<128xf32> to vector<1x128xf32>
      %cst_39 = arith.constant 3.125000e-02 : f32
      %70 = vector.broadcast %cst_39 : f32 to vector<1x128xf32>
      %71 = arith.mulf %69, %70 : vector<1x128xf32>
      %c0_40 = arith.constant 0 : index
      %c0_41 = arith.constant 0 : index
      %72 = vector.load %arg10[%c0_40, %c0_41] : memref<8x128xf32, #tpu.memory_space<vmem>>, vector<8x128xf32>
      %cst_42 = arith.constant dense<0.000000e+00> : vector<128xf32>
      %73 = vector.multi_reduction <add>, %72, %cst_42 [0] : vector<8x128xf32> to vector<128xf32>
      %74 = vector.shape_cast %73 : vector<128xf32> to vector<1x128xf32>
      %cst_43 = arith.constant 3.125000e-02 : f32
      %75 = vector.broadcast %cst_43 : f32 to vector<1x128xf32>
      %76 = arith.mulf %74, %75 : vector<1x128xf32>
      %77 = arith.mulf %71, %71 : vector<1x128xf32>
      %78 = arith.subf %76, %77 : vector<1x128xf32>
      %cst_44 = arith.constant 0.000000e+00 : f32
      %79 = vector.broadcast %cst_44 : f32 to vector<1x128xf32>
      %80 = arith.maximumf %78, %79 : vector<1x128xf32>
      %c0_45 = arith.constant 0 : index
      %c0_46 = arith.constant 0 : index
      %81 = vector.load %arg11[%c0_45, %c0_46] : memref<1x128xf32, #tpu.memory_space<vmem>>, vector<1x128xf32>
      %82 = arith.addf %71, %81 : vector<1x128xf32>
      %cst_47 = arith.constant 9.99999974E-6 : f32
      %83 = vector.broadcast %cst_47 : f32 to vector<1x128xf32>
      %84 = arith.addf %80, %83 : vector<1x128xf32>
      %85 = math.rsqrt %84 : vector<1x128xf32>
      %c0_48 = arith.constant 0 : index
      %c0_49 = arith.constant 0 : index
      %86 = vector.load %arg6[%c0_48, %c0_49] : memref<1x128xf32, #tpu.memory_space<vmem>>, vector<1x128xf32>
      %87 = arith.mulf %85, %86 : vector<1x128xf32>
      %c0_50 = arith.constant 0 : index
      %c0_51 = arith.constant 0 : index
      %88 = vector.load %arg12[%c0_50, %c0_51] : memref<2x128xf32, #tpu.memory_space<vmem>>, vector<1x128xf32>
      tpu.vector_store %arg12[%c0_50, %c0_51], %87 {strides = array<i32>} : memref<2x128xf32, #tpu.memory_space<vmem>>, vector<1x128xf32>,
      %c0_52 = arith.constant 0 : index
      %c0_53 = arith.constant 0 : index
      %89 = vector.load %arg7[%c0_52, %c0_53] : memref<1x128xf32, #tpu.memory_space<vmem>>, vector<1x128xf32>
      %90 = arith.mulf %82, %87 : vector<1x128xf32>
      %91 = arith.subf %89, %90 : vector<1x128xf32>
      %c1 = arith.constant 1 : index
      %c0_54 = arith.constant 0 : index
      %92 = vector.load %arg12[%c1, %c0_54] : memref<2x128xf32, #tpu.memory_space<vmem>>, vector<1x128xf32>
      tpu.vector_store %arg12[%c1, %c0_54], %91 {strides = array<i32>} : memref<2x128xf32, #tpu.memory_space<vmem>>, vector<1x128xf32>,
    } else {
    }
    %c1_i32_34 = arith.constant 1 : i32
    %64 = arith.cmpi eq, %arg0, %c1_i32_34 : i32
    %65 = arith.extui %64 : i1 to i32
    %c0_i32_35 = arith.constant 0 : i32
    %66 = arith.cmpi ne, %65, %c0_i32_35 : i32
    scf.if %66 {
      %c0_36 = arith.constant 0 : index
      %c0_37 = arith.constant 0 : index
      %67 = vector.load %arg12[%c0_36, %c0_37] : memref<2x128xf32, #tpu.memory_space<vmem>>, vector<1x128xf32>
      %68 = vector.broadcast %67 : vector<1x128xf32> to vector<16x128xf32>
      %69 = arith.mulf %49, %68 : vector<16x128xf32>
      %c1 = arith.constant 1 : index
      %c0_38 = arith.constant 0 : index
      %70 = vector.load %arg12[%c1, %c0_38] : memref<2x128xf32, #tpu.memory_space<vmem>>, vector<1x128xf32>
      %71 = vector.broadcast %70 : vector<1x128xf32> to vector<16x128xf32>
      %72 = arith.addf %69, %71 : vector<16x128xf32>
      %cst_39 = arith.constant 0.000000e+00 : f32
      %73 = vector.broadcast %cst_39 : f32 to vector<16x128xf32>
      %74 = arith.cmpf ogt, %72, %73 : vector<16x128xf32>
      %cst_40 = arith.constant 0.00999999977 : f32
      %75 = vector.broadcast %cst_40 : f32 to vector<16x128xf32>
      %76 = arith.mulf %75, %72 : vector<16x128xf32>
      %77 = arith.select %74, %72, %76 : vector<16x128xi1>, vector<16x128xf32>
      %78 = vector.shape_cast %77 : vector<16x128xf32> to vector<4x4x128xf32>
      %79 = arith.truncf %78 : vector<4x4x128xf32> to vector<4x4x128xbf16>
      %c0_41 = arith.constant 0 : index
      %c0_42 = arith.constant 0 : index
      %c0_43 = arith.constant 0 : index
      %c0_44 = arith.constant 0 : index
      %80 = vector.load %arg8[%c0_41, %c0_42, %c0_43, %c0_44] : memref<1x4x4x128xbf16, #tpu.memory_space<vmem>>, vector<1x4x4x128xbf16>
      %81 = vector.shape_cast %80 : vector<1x4x4x128xbf16> to vector<4x4x128xbf16>
      %82 = vector.shape_cast %79 : vector<4x4x128xbf16> to vector<1x4x4x128xbf16>
      tpu.vector_store %arg8[%c0_41, %c0_42, %c0_43, %c0_44], %82 {strides = array<i32>} : memref<1x4x4x128xbf16, #tpu.memory_space<vmem>>, vector<1x4x4x128xbf16>,
    } else {
    }
    return
  }
  func.func @transform_0(%arg0: i32, %arg1: i32, %arg2: i32) -> (i32, i32, i32, i32) {
    %c0_i32 = arith.constant 0 : i32
    %c0_i32_0 = arith.constant 0 : i32
    %c0_i32_1 = arith.constant 0 : i32
    %c0_i32_2 = arith.constant 0 : i32
    return %arg1, %c0_i32, %c0_i32_0, %c0_i32_1 : i32, i32, i32, i32
  }
  func.func @transform_1(%arg0: i32, %arg1: i32, %arg2: i32) -> (i32, i32) {
    %c0_i32 = arith.constant 0 : i32
    %c0_i32_0 = arith.constant 0 : i32
    %c0_i32_1 = arith.constant 0 : i32
    return %c0_i32, %c0_i32_0 : i32, i32
  }
  func.func @transform_2(%arg0: i32, %arg1: i32, %arg2: i32) -> (i32, i32) {
    %c0_i32 = arith.constant 0 : i32
    %c0_i32_0 = arith.constant 0 : i32
    %c0_i32_1 = arith.constant 0 : i32
    return %c0_i32, %c0_i32_0 : i32, i32
  }
  func.func @transform_3(%arg0: i32, %arg1: i32, %arg2: i32) -> (i32, i32) {
    %c0_i32 = arith.constant 0 : i32
    %c0_i32_0 = arith.constant 0 : i32
    %c0_i32_1 = arith.constant 0 : i32
    return %c0_i32, %c0_i32_0 : i32, i32
  }
  func.func @transform_4(%arg0: i32, %arg1: i32, %arg2: i32) -> (i32, i32) {
    %c0_i32 = arith.constant 0 : i32
    %c0_i32_0 = arith.constant 0 : i32
    %c0_i32_1 = arith.constant 0 : i32
    return %c0_i32, %c0_i32_0 : i32, i32
  }
  func.func @transform_5(%arg0: i32, %arg1: i32, %arg2: i32) -> (i32, i32, i32, i32) {
    %0 = arith.muli %arg1, %arg0 : i32
    %1 = arith.muli %arg2, %arg0 : i32
    %c0_i32 = arith.constant 0 : i32
    %c0_i32_0 = arith.constant 0 : i32
    %c0_i32_1 = arith.constant 0 : i32
    return %0, %1, %c0_i32, %c0_i32_0 : i32, i32, i32, i32
  }
}

module attributes {stable_mosaic.version = 11 : i64} {
  func.func @_fc_heads_kernel(%arg0: i32, %arg1: memref<2x2048xbf16, #tpu.memory_space<vmem>>, %arg2: memref<2048x128xbf16, #tpu.memory_space<vmem>>, %arg3: memref<1x128xf32, #tpu.memory_space<vmem>>, %arg4: memref<2x128xf32, #tpu.memory_space<vmem>>) attributes {dimension_semantics = [#tpu.dimension_semantics<parallel>], iteration_bounds = array<i64: 1>, scalar_prefetch = 0 : i64, scratch_operands = 0 : i64, tpu.core_type = #tpu.core_type<tc>, window_params = [{transform_indices = @transform_0, window_bounds = array<i64: 2, 2048>}, {pipeline_mode = #tpu.pipeline_mode<synchronous>, transform_indices = @transform_1, window_bounds = array<i64: 2048, 128>}, {pipeline_mode = #tpu.pipeline_mode<synchronous>, transform_indices = @transform_2, window_bounds = array<i64: 1, 128>}, {transform_indices = @transform_3, window_bounds = array<i64: 2, 128>}]} {
    %c0 = arith.constant 0 : index
    %c0_0 = arith.constant 0 : index
    %0 = vector.load %arg1[%c0, %c0_0] : memref<2x2048xbf16, #tpu.memory_space<vmem>>, vector<2x2048xbf16>
    %c0_1 = arith.constant 0 : index
    %c0_2 = arith.constant 0 : index
    %1 = vector.load %arg2[%c0_1, %c0_2] : memref<2048x128xbf16, #tpu.memory_space<vmem>>, vector<2048x128xbf16>
    %cst = arith.constant dense<0.000000e+00> : vector<2x128xf32>
    %2 = tpu.matmul %0, %1, %cst {dimension_numbers = #tpu.dot_dimension_numbers<[1], [0], [0], [1], [0, 0, 1, 1], [], []>} : vector<2x2048xbf16>, vector<2048x128xbf16>, vector<2x128xf32> -> vector<2x128xf32>
    %c0_3 = arith.constant 0 : index
    %c0_4 = arith.constant 0 : index
    %3 = vector.load %arg3[%c0_3, %c0_4] : memref<1x128xf32, #tpu.memory_space<vmem>>, vector<1x128xf32>
    %4 = vector.broadcast %3 : vector<1x128xf32> to vector<2x128xf32>
    %5 = arith.addf %2, %4 : vector<2x128xf32>
    %c0_5 = arith.constant 0 : index
    %c0_6 = arith.constant 0 : index
    %6 = vector.load %arg4[%c0_5, %c0_6] : memref<2x128xf32, #tpu.memory_space<vmem>>, vector<2x128xf32>
    tpu.vector_store %arg4[%c0_5, %c0_6], %5 {strides = array<i32>} : memref<2x128xf32, #tpu.memory_space<vmem>>, vector<2x128xf32>,
    return
  }
  func.func @transform_0(%arg0: i32) -> (i32, i32) {
    %c0_i32 = arith.constant 0 : i32
    %c0_i32_0 = arith.constant 0 : i32
    return %arg0, %c0_i32 : i32, i32
  }
  func.func @transform_1(%arg0: i32) -> (i32, i32) {
    %c0_i32 = arith.constant 0 : i32
    %c0_i32_0 = arith.constant 0 : i32
    %c0_i32_1 = arith.constant 0 : i32
    return %c0_i32, %c0_i32_0 : i32, i32
  }
  func.func @transform_2(%arg0: i32) -> (i32, i32) {
    %c0_i32 = arith.constant 0 : i32
    %c0_i32_0 = arith.constant 0 : i32
    %c0_i32_1 = arith.constant 0 : i32
    return %c0_i32, %c0_i32_0 : i32, i32
  }
  func.func @transform_3(%arg0: i32) -> (i32, i32) {
    %c0_i32 = arith.constant 0 : i32
    %c0_i32_0 = arith.constant 0 : i32
    return %arg0, %c0_i32 : i32, i32
  }
}

</mosaic_0001>

<bundles_post_ra>
// kernel: _lambda_.3
= control target key start
LH: loop header
LB: loop body
LE: loop exit
PB: predicated region body
PF: predicated region fallthrough
CT: control target
= control target key end

     0   :  { %s2287_s18 = smov 0   ;;  %s2289_s19 = smov 0   ;;  %s2721_s0 = inlined_call_operand.vmem [shape: bf16[2,36,9,4], index: 0, kind: input, shape index: {}]   ;;  %s2722_s1 = inlined_call_operand.vmem [shape: bf16[36,128], index: 1, kind: input, shape index: {}]   ;;  %s2723_s2 = inlined_call_operand.vmem [shape: f32[1,128], index: 2, kind: input, shape index: {}]   ;;  %s2724_s3 = inlined_call_operand.vmem [shape: f32[1,128], index: 3, kind: input, shape index: {}]   ;;  %s2725_s4 = inlined_call_operand.vmem [shape: f32[1,128], index: 4, kind: input, shape index: {}]   ;;  %s2726_s5 = inlined_call_operand.vmem [shape: bf16[2,8,8,128], index: 5, kind: output, shape index: {}]  }
   0x1   :  { %s2291_s20 = smov 0   ;;  %s2293_s21 = smov 0  }
   0x2   :  { %s2295_s22 = smov 0  }
   0x3 LB: > { %s30_s23 = sadd.s32 1, %s2246_s20  ;;  %s34_s24 = sadd.s32 1, %s2250_s21  ;;  %s2254_s22 = sphi %s2295_s22, %s15_s22   ;;  %s2250_s21 = sphi %s2293_s21, %s2733_s21   ;;  %s2246_s20 = sphi %s2291_s20, %s2732_s20   ;;  %s2242_s19 = sphi %s2289_s19, %s2731_s19   ;;  %s2238_s18 = sphi %s2287_s18, %s2730_s18  }
   0x4   : > { %p32_p0 = scmp.ge.s32.totalorder %s30_s23, 2  ;;  %p1786_p1 = scmp.ge.s32.totalorder %s2254_s22, 1 }
   0x5   : > { %p212_p2 = scmp.lt.s32.totalorder %s2254_s22, 5 }
   0x6   : > { %s2735_s23 = smov (%p32_p0, %s30_s23), 0  ;;  %s2737_s24 = smov (!%p32_p0, %s34_s24), %s2250_s21 }
   0x7   : > { %p213_p3 = pnand %p1786_p1, %p212_p2  ;;  %p36_p4 = scmp.ge.s32.totalorder %s2737_s24, 2 }
   0x8   : > { %v2186_v0 = vld [vmem:[%s2722_s1] ss:$0 sps:$4 sm:$0xcc] (!%p213_p3)   ;;  %s251_s27 = smul.u32 (!%p213_p3), %s2238_s18, %s2242_s19  ;;  %vm430_vm0 = vcmask (!%p213_p3), 1041408   ;;  %p246_p5 = scmp.lt.s32.totalorder (!%p213_p3), %s2238_s18, 1  ;;  %vm417_vm1 = vcmask (!%p213_p3), 31744  }
   0x9   : > { %s2739_s24 = smov (%p36_p4, %s2737_s24), 0  ;;  %216 = sbr.rel (%p213_p3) target bundleno = 416 (0x1a0), region = 40 }
   0xa   : > { %v404_v1 = vld [vmem:[%s2722_s1 + $0x4] sm:$0x3] (!%p213_p3)  ;;  %v2330_v2 = vrot.slane (!%p213_p3), %v2186_v0, 2  ;;  %p254_p6 = scmp.lt.s32.totalorder (!%p213_p3), %s251_s27, 1  ;;  %v2338_v4 = vld [vmem:[%s2722_s1] sm:$0x3] (!%p213_p3) }
   0xb   : > { %2134 = vmatprep.subr.msk.bf16.mxu1 (!%p213_p3), %vm430_vm0, %v404_v1  ;;  %v432_v3 = vsel (!%p213_p3), %vm430_vm0, %v404_v1, 0  ;;  %v2351_v6 = vld [vmem:[%s2722_s1 + $0xc] ss:$0 sps:$4 sm:$0xcc] (!%p213_p3)   ;;  %vm289_vm2 = vsmask.f32 (!%p213_p3), 3328 }
   0xc   : > { %1979 = vmatpush3.bf16.msra.mxu1 (!%p213_p3), %v432_v3  ;;  %2138 = vmatprep.subr.msk.bf16.mxu0 (!%p213_p3), %vm430_vm0, %v2330_v2  ;;  %v2344_v5 = vsel (!%p213_p3), %vm430_vm0, %v2330_v2, 0  ;;  %v938_v7 = vrot.slane (!%p213_p3), %v2351_v6, 2  ;;  %v2368_v8 = vld [vmem:[%s2722_s1 + $0x4] ss:$0 sps:$4 sm:$0xcc] (!%p213_p3)   ;;  %v532_v6 = vsel (!%p213_p3), %vm430_vm0, %v2338_v4, 0 }
   0xd   : > { %2135 = vmatprep.subr.msk.bf16.mxu1 (!%p213_p3), %vm430_vm0, %v2338_v4  ;;  %2019 = vmatpush3.bf16.msra.mxu0 (!%p213_p3), %v2344_v5  ;;  %vm290_vm3 = vsmask.f32 (!%p213_p3), 7440  ;;  %v1071_v22 = vrot.slane (!%p213_p3), %v2368_v8, 2  ;;  %p1513_p7 = scmp.eq.s32.totalorder (!%p213_p3), %s2238_s18, 0  ;;  %p1517_p8 = scmp.eq.s32.totalorder (!%p213_p3), %s2242_s19, 0 }
   0xe   : > { %2140 = vmatprep.subr.msk.bf16.mxu0 (!%p213_p3), %vm430_vm0, %v938_v7  ;;  %vm2417_vm4 = vmor (!%p213_p3), %vm289_vm2, %vm290_vm3 }
   0xf   : > { %p2649_p9 = pnand (!%p213_p3), %p1517_p8, %p1513_p7 }
  0x10   : > { %s247_s30 = scalar_select %p246_p5, %s2238_s18, 1 }
  0x11   : > { %s2741_s27 = smov (!%p254_p6, %s251_s27), 1 }
  0x12   : > { %s2144_s10 = smul.u32 288, %s247_s30  ;;  %s1908_s11 = sshll.u32 %s2741_s27, 5 }
  0x13   : > { %s2363_s17 = scalar_lea.vmem %s2726_s5, %s1908_s11 }
  0x14   : > { %s2358_s14 = scalar_lea.vmem %s2721_s0, %s2144_s10 }
  0x15   : > { %v1822_v9 = vld [vmem:[%s2358_s14 + $0x48] sm:$0xf]  ;;  %v1823_v10 = vld [vmem:[%s2358_s14 + $0x50] sm:$0xf]  ;;  %v1824_v11 = vld [vmem:[%s2358_s14 + $0x58] sm:$0xf] }
  0x16   : > { %v2377_v12 = vld [vmem:[%s2358_s14 + $0x60] sm:$0xf]  ;;  %v1831_v13 = vcombine.low %v1822_v9, %v1823_v10  ;;  %v1840_v14 = vcombine.low %v1823_v10, %v1824_v11  ;;  %v271_v17 = vld [vmem:[%s2358_s14 + $0x4] sm:$0x1]  ;;  %v2385_v18 = vld [vmem:[%s2358_s14 + $0x8] sm:$0xf] }
  0x17   : > { %v1832_v15 = vcombine.low %v1824_v11, %v2377_v12  ;;  %v2381_v16 = vld [vmem:[%s2358_s14] sm:$0xf]  ;;  %v273_v19 = vld [vmem:[%s2358_s14 + $0xc] sm:$0x1]  ;;  %v2390_v20 = vld [vmem:[%s2358_s14 + $0x10] sm:$0xf] }
  0x18   : > { %2020 = vmatprep.mubr.msk.bf16.mxu0 %vm417_vm1, %v1831_v13  ;;  %v275_v21 = vld [vmem:[%s2358_s14 + $0x14] sm:$0x1]  ;;  %v2396_v23 = vld [vmem:[%s2358_s14 + $0x18] sm:$0xf]  ;;  %v293_v24 = vshrl.u32 %v2381_v16, 16  ;;  %v296_v25 = vshll.u32 %v2381_v16, 16 }
  0x19   : > { %2021 = vmatmul.mubr.msk.bf16.vlgmr.msra.gmra.mrb[0].mxu0 %vm417_vm1, %v1832_v15  ;;  %v302_v26 = vshll.u32 %v271_v17, 16  ;;  %v307_v27 = vshrl.u32 %v2385_v18, 16  ;;  %v277_v28 = vld [vmem:[%s2358_s14 + $0x1c] sm:$0x1]  ;;  %v310_v29 = vshll.u32 %v2385_v18, 16  ;;  %v316_v30 = vshll.u32 %v273_v19, 16 }
  0x1a   : > { %2030 = vmatprep.mubr.msk.bf16.mxu0 %vm417_vm1, %v1840_v14  ;;  %v321_v31 = vshrl.u32 %v2390_v20, 16  ;;  %v324_v32 = vshll.u32 %v2390_v20, 16  ;;  %v2407_v33 = vld [vmem:[%s2358_s14 + $0x20] sm:$0xf]  ;;  %v295_v34 = vrot.slane %v293_v24, 4  ;;  %v298_v35 = vrot.slane %v296_v25, 5 }
  0x1b   : > { %v304_v36 = vrot.slane %v302_v26, 5  ;;  %v309_v37 = vrot.slane %v307_v27, 4  ;;  %v312_v38 = vrot.slane %v310_v29, 5  ;;  %v318_v39 = vrot.slane %v316_v30, 5  ;;  %v2410_v42 = vld [vmem:[%s2358_s14 + $0x68] sm:$0xf] }
  0x1c   : > { %v323_v40 = vrot.slane %v321_v31, 4  ;;  %v326_v41 = vrot.slane %v324_v32, 5  ;;  %v299_v43 = vor.u32 %v298_v35, %v295_v34  ;;  %v330_v44 = vshll.u32 %v275_v21, 16  ;;  %v279_v47 = vld [vmem:[%s2358_s14 + $0x24] sm:$0x1] }
  0x1d   : > { %v335_v45 = vshrl.u32 %v2396_v23, 16  ;;  %v338_v46 = vshll.u32 %v2396_v23, 16  ;;  %v313_v49 = vor.u32 %v312_v38, %v309_v37  ;;  %v344_v51 = vshll.u32 %v277_v28, 16  ;;  %v2423_v57 = vld [vmem:[%s2358_s14 + $0x28] sm:$0xf] }
  0x1e   : > { %v327_v50 = vor.u32 %v326_v41, %v323_v40  ;;  %v349_v52 = vshrl.u32 %v2407_v33, 16  ;;  %v300_v53 = vrot.slane %v299_v43, 4  ;;  %v332_v54 = vrot.slane %v330_v44, 5  ;;  %v281_v3 = vld [vmem:[%s2358_s14 + $0x2c] sm:$0x1] }
  0x1f   : > { %v337_v55 = vrot.slane %v335_v45, 4  ;;  %v340_v56 = vrot.slane %v338_v46, 5  ;;  %v1841_v58 = vcombine.low %v2377_v12, %v2410_v42  ;;  %v314_v59 = vrot.slane %v313_v49, 4  ;;  %v2440_v13 = vld [vmem:[%s2358_s14 + $0x30] sm:$0xf] }
  0x20   : > { %v328_v60 = vrot.slane %v327_v50, 4  ;;  %v346_v61 = vrot.slane %v344_v51, 5  ;;  %v305_v62 = vsel %vm2417_vm4, %v300_v53, %v304_v36  ;;  %v351_v0 = vrot.slane %v349_v52, 4  ;;  %v283_v21 = vld [vmem:[%s2358_s14 + $0x34] sm:$0x1] }
  0x21   : > { %v341_v63 = vor.u32 %v340_v56, %v337_v55  ;;  %v352_v1 = vshll.u32 %v2407_v33, 16  ;;  %v2433_v9 = vsel %vm2417_vm4, %v314_v59, %v318_v39  ;;  %v358_v10 = vshll.u32 %v279_v47, 16  ;;  %v2452_v26 = vld [vmem:[%s2358_s14 + $0x38] sm:$0xf]  ;;  %v285_v4 = vld [vmem:[%s2358_s14 + $0x3c] sm:$0x1] }
  0x22   : > { %v952_v11 = vsel %vm430_vm0, %v938_v7, 0  ;;  %v363_v12 = vshrl.u32 %v2423_v57, 16  ;;  %v2444_v14 = vsel %vm2417_vm4, %v328_v60, %v332_v54  ;;  %v1790_v19 = vcombine.low %v305_v62, %v2433_v9  ;;  %v2466_v31 = vld [vmem:[%s2358_s14 + $0x70] sm:$0xf]  ;;  %v599_v32 = vld [vmem:[%s2722_s1 + $0xc] sm:$0x3] }
  0x23   : > { %v342_v15 = vrot.slane %v341_v63, 4  ;;  %v354_v17 = vrot.slane %v352_v1, 5  ;;  %2029 = vmatpush3.bf16.msra.mxu0 %v952_v11  ;;  %v366_v24 = vshll.u32 %v2423_v57, 16  ;;  %v372_v25 = vshll.u32 %v281_v3, 16  ;;  %v2475_v38 = vld [vmem:[%s2358_s14 + $0x78] sm:$0xf] }
  0x24   : > { %v365_v7 = vrot.slane %v363_v12, 4  ;;  %2141 = vmatprep.subr.msk.bf16.mxu0 %vm430_vm0, %v1071_v22  ;;  %1980 = vmatprep.mubr.msk.bf16.mxu1 %vm417_vm1, %v1790_v19  ;;  %v377_v29 = vshrl.u32 %v2440_v13, 16  ;;  %v380_v30 = vshll.u32 %v2440_v13, 16  ;;  %v360_v34 = vrot.slane %v358_v10, 5  ;;  %v2479_v44 = vld [vmem:[%s2358_s14 + $0x80] sm:$0xf] }
  0x25   : > { %v2459_v27 = vsel %vm2417_vm4, %v342_v15, %v346_v61  ;;  %v355_v28 = vor.u32 %v354_v17, %v351_v0  ;;  %v368_v36 = vrot.slane %v366_v24, 5  ;;  %v386_v37 = vshll.u32 %v283_v21, 16  ;;  %v1830_v50 = vld [vmem:[%s2358_s14 + $0x88] sm:$0xf]  ;;  %v1849_v55 = vld [vmem:[%s2358_s14 + $0x90] sm:$0xf] }
  0x26   : > { %v1791_v35 = vcombine.low %v2444_v14, %v2459_v27  ;;  %2031 = vmatmul.mubr.msk.bf16.vlgmr.msra.gmra.mrb[0].mxu0 %vm417_vm1, %v1841_v58  ;;  %v379_v40 = vrot.slane %v377_v29, 4  ;;  %v382_v41 = vrot.slane %v380_v30, 5  ;;  %v391_v43 = vshrl.u32 %v2452_v26, 16  ;;  %v1851_v56 = vld [vmem:[%s2358_s14 + $0x98] sm:$0xf] }
  0x27   : > { %v356_v39 = vrot.slane %v355_v28, 4  ;;  %v369_v45 = vor.u32 %v368_v36, %v365_v7  ;;  %v374_v46 = vrot.slane %v372_v25, 5  ;;  %v394_v47 = vshll.u32 %v2452_v26, 16  ;;  %v1855_v19 = vld [vmem:[%s2358_s14 + $0xa8] sm:$0xf] }
  0x28   : > { %1981 = vmatmul.mubr.msk.bf16.vlgmr.msra.gmra.mrb[0].mxu1 %vm417_vm1, %v1791_v35  ;;  %v400_v49 = vshll.u32 %v285_v4, 16  ;;  %v383_v51 = vor.u32 %v382_v41, %v379_v40  ;;  %v388_v52 = vrot.slane %v386_v37, 5  ;;  %v393_v53 = vrot.slane %v391_v43, 4  ;;  %v1857_v4 = vld [vmem:[%s2358_s14 + $0xb0] sm:$0xf] }
  0x29   : > { %1989 = vmatpush3.bf16.msra.mxu1 %v532_v6  ;;  %v1842_v54 = vcombine.low %v2466_v31, %v2475_v38  ;;  %v2490_v58 = vsel %vm2417_vm4, %v356_v39, %v360_v34  ;;  %v370_v59 = vrot.slane %v369_v45, 4  ;;  %v396_v60 = vrot.slane %v394_v47, 5  ;;  %v1859_v29 = vld [vmem:[%s2358_s14 + $0xb8] sm:$0xf]  ;;  %v2529_v36 = vld [vmem:[%s2358_s14 + $0xc0] sm:$0xf] }
  0x2a   : > { %v402_v61 = vrot.slane %v400_v49, 5  ;;  %2136 = vmatprep.subr.msk.bf16.mxu1 %vm430_vm0, %v599_v32  ;;  %v384_v62 = vrot.slane %v383_v51, 4  ;;  %v1834_v63 = vcombine.low %v2475_v38, %v2479_v44  ;;  %v1843_v0 = vcombine.low %v2479_v44, %v1830_v50  ;;  %v2204_v41 = vld [vmem:[%s2722_s1 + $0x8] ss:$0 sps:$4 sm:$0xcc]  }
  0x2b   : > { %2034 = vmatprep.mubr.msk.bf16.mxu0 %vm417_vm1, %v1842_v54  ;;  %v1085_v1 = vsel %vm430_vm0, %v1071_v22, 0  ;;  %v2502_v3 = vsel %vm2417_vm4, %v370_v59, %v374_v46  ;;  %v397_v10 = vor.u32 %v396_v60, %v393_v53  ;;  %v1865_v11 = vcombine.low %v1849_v55, %v1851_v56  ;;  %v1853_v22 = vld [vmem:[%s2358_s14 + $0xa0] sm:$0xf]  ;;  %v2537_v49 = vld [vmem:[%s2358_s14 + $0xc8] sm:$0xf] }
  0x2c   : > { %2039 = vmatpush3.bf16.msra.mxu0 %v1085_v1  ;;  %v1161_v12 = vshrl.u32 %v1849_v55, 16  ;;  %v1792_v15 = vcombine.low %v2490_v58, %v2502_v3  ;;  %v2508_v17 = vsel %vm2417_vm4, %v384_v62, %v388_v52  ;;  %v2511_v8 = vsel %vm430_vm0, %v599_v32, 0  ;;  %v1850_v54 = vld [vmem:[%s2358_s14 + $0x94] sm:$0x1] }
  0x2d   : > { %v398_v21 = vrot.slane %v397_v10, 4  ;;  %v1164_v6 = vshll.u32 %v1849_v55, 16  ;;  %v1175_v7 = vshrl.u32 %v1851_v56, 16  ;;  %v1178_v24 = vshll.u32 %v1851_v56, 16  ;;  %v1852_v55 = vld [vmem:[%s2358_s14 + $0x9c] sm:$0x1] }
  0x2e   : > { %2035 = vmatmul.mubr.msk.bf16.gmra.mrb[4].mxu0 %vm417_vm1, %v1843_v0  ;;  %1984 = vmatprep.mubr.msk.bf16.mxu1 %vm417_vm1, %v1792_v15  ;;  %v1798_v25 = vcombine.low %v2381_v16, %v2385_v18  ;;  %v1799_v28 = vcombine.low %v2390_v20, %v2396_v23  ;;  %v1163_v32 = vrot.slane %v1161_v12, 4  ;;  %v1189_v34 = vshrl.u32 %v1853_v22, 16 }
  0x2f   : > { %2040 = vmatprep.mubr.msk.bf16.mxu0 %vm417_vm1, %v1865_v11  ;;  %v2526_v30 = vsel %vm2417_vm4, %v398_v21, %v402_v61  ;;  %v1192_v35 = vshll.u32 %v1853_v22, 16  ;;  %v1866_v37 = vcombine.low %v1853_v22, %v1855_v19  ;;  %v1203_v39 = vshrl.u32 %v1855_v19, 16  ;;  %v1854_v11 = vld [vmem:[%s2358_s14 + $0xa4] sm:$0x1]  ;;  %v1856_v21 = vld [vmem:[%s2358_s14 + $0xac] sm:$0x1] }
  0x30   : > { %v1793_v16 = vcombine.low %v2508_v17, %v2526_v30  ;;  %v1206_v40 = vshll.u32 %v1855_v19, 16  ;;  %v1166_v43 = vrot.slane %v1164_v6, 5  ;;  %v1177_v45 = vrot.slane %v1175_v7, 4 }
  0x31   : > { %v1180_v46 = vrot.slane %v1178_v24, 5  ;;  %v1867_v47 = vcombine.low %v1857_v4, %v1859_v29  ;;  %v1217_v50 = vshrl.u32 %v1857_v4, 16  ;;  %v1220_v51 = vshll.u32 %v1857_v4, 16 }
  0x32   : > { %1985 = vmatmul.mubr.msk.bf16.gmra.mrb[4].mxu1 %vm417_vm1, %v1793_v16  ;;  %v1231_v52 = vshrl.u32 %v1859_v29, 16  ;;  %v1234_v53 = vshll.u32 %v1859_v29, 16  ;;  %v1191_v56 = vrot.slane %v1189_v34, 4  ;;  %v1194_v59 = vrot.slane %v1192_v35, 5 }
  0x33   : > { %1990 = vmatprep.mubr.msk.bf16.mxu1 %vm417_vm1, %v1798_v25  ;;  %v1800_v60 = vcombine.low %v2407_v33, %v2423_v57  ;;  %v1245_v61 = vshrl.u32 %v2529_v36, 16  ;;  %v1205_v62 = vrot.slane %v1203_v39, 4  ;;  %v1208_v0 = vrot.slane %v1206_v40, 5 }
  0x34   : > { %v1868_v1 = vcombine.low %v2529_v36, %v2537_v49  ;;  %v1248_v10 = vshll.u32 %v2529_v36, 16  ;;  %v1219_v12 = vrot.slane %v1217_v50, 4  ;;  %v1222_v15 = vrot.slane %v1220_v51, 5  ;;  %v1389_v36 = vld [vmem:[%s2722_s1 + $0x8] sm:$0x3] }
  0x35   : > { %v1233_v22 = vrot.slane %v1231_v52, 4  ;;  %v1259_v19 = vshrl.u32 %v2537_v49, 16  ;;  %v1236_v6 = vrot.slane %v1234_v53, 5  ;;  %v1247_v7 = vrot.slane %v1245_v61, 4  ;;  %v1858_v52 = vld [vmem:[%s2358_s14 + $0xb4] sm:$0x1] }
  0x36   : > { %2041 = vmatmul.mubr.msk.bf16.vlgmr.msra.gmra.mrb[0].mxu0 %vm417_vm1, %v1866_v37  ;;  %v1288_v24 = vrot.slane %v2204_v41, 2  ;;  %v1167_v25 = vor.u32 %v1166_v43, %v1163_v32  ;;  %v1262_v4 = vshll.u32 %v2537_v49, 16  ;;  %v1170_v29 = vshll.u32 %v1850_v54, 16  ;;  %v708_v32 = vld [vmem:[%s2722_s1 + $0x10] sm:$0x3] }
  0x37   : > { %2044 = vmatprep.mubr.msk.bf16.mxu0 %vm417_vm1, %v1867_v47  ;;  %v1181_v34 = vor.u32 %v1180_v46, %v1177_v45  ;;  %v1184_v35 = vshll.u32 %v1852_v55, 16  ;;  %v1195_v39 = vor.u32 %v1194_v59, %v1191_v56  ;;  %v1198_v40 = vshll.u32 %v1854_v11, 16  ;;  %v1862_v11 = vld [vmem:[%s2358_s14 + $0xc4] sm:$0x1] }
  0x38   : > { %2142 = vmatprep.subr.msk.bf16.mxu0 %vm430_vm0, %v1288_v24  ;;  %v1302_v16 = vsel %vm430_vm0, %v1288_v24, 0  ;;  %v1168_v37 = vrot.slane %v1167_v25, 4  ;;  %v1172_v41 = vrot.slane %v1170_v29, 5  ;;  %v1209_v46 = vor.u32 %v1208_v0, %v1205_v62  ;;  %v1864_v25 = vld [vmem:[%s2358_s14 + $0xcc] sm:$0x1] }
  0x39   : > { %2049 = vmatpush3.bf16.msra.mxu0 %v1302_v16  ;;  %v1182_v43 = vrot.slane %v1181_v34, 4  ;;  %v1186_v45 = vrot.slane %v1184_v35, 5  ;;  %v1250_v47 = vrot.slane %v1248_v10, 5  ;;  %v1196_v49 = vrot.slane %v1195_v39, 4 }
  0x3a   : > { %1991 = vmatmul.mubr.msk.bf16.vlgmr.msra.gmra.mrb[0].mxu1 %vm417_vm1, %v1799_v28  ;;  %v1200_v50 = vrot.slane %v1198_v40, 5  ;;  %v1212_v51 = vshll.u32 %v1856_v21, 16  ;;  %2143 = vmatprep.subr.msk.bf16.mxu0 %vm430_vm0, %v1389_v36  ;;  %v1173_v53 = vsel %vm2417_vm4, %v1168_v37, %v1172_v41  ;;  %v1210_v55 = vrot.slane %v1209_v46, 4  ;;  %v1860_v28 = vld [vmem:[%s2358_s14 + $0xbc] sm:$0x1] }
  0x3b   : > { %1999 = vmatpush3.bf16.msra.mxu1 %v2511_v8  ;;  %1994 = vmatprep.mubr.msk.bf16.mxu1 %vm417_vm1, %v1800_v60  ;;  %v1187_v54 = vsel %vm2417_vm4, %v1182_v43, %v1186_v45  ;;  %v1801_v56 = vcombine.low %v2440_v13, %v2452_v26  ;;  %v1261_v59 = vrot.slane %v1259_v19, 4  ;;  %v1264_v60 = vrot.slane %v1262_v4, 5 }
  0x3c   : > { %2137 = vmatprep.subr.msk.bf16.mxu1 %vm430_vm0, %v708_v32  ;;  %v1874_v61 = vcombine.low %v1173_v53, %v1187_v54  ;;  %v1214_v8 = vrot.slane %v1212_v51, 5  ;;  %v1223_v62 = vor.u32 %v1222_v15, %v1219_v12  ;;  %v1226_v0 = vshll.u32 %v1858_v52, 16  ;;  %v287_v54 = vld [vmem:[%s2358_s14 + $0x44] sm:$0x1] }
  0x3d   : > { %v1237_v10 = vor.u32 %v1236_v6, %v1233_v22  ;;  %v1201_v21 = vsel %vm2417_vm4, %v1196_v49, %v1200_v50  ;;  %v1240_v19 = vshll.u32 %v1860_v28, 16  ;;  %v1251_v29 = vor.u32 %v1250_v47, %v1247_v7  ;;  %v2211_v28 = vld [vmem:[%s2358_s14 + $0xf8] ss:$8 sps:$4 sm:$0xff]  }
  0x3e   : > { %2045 = vmatmul.mubr.msk.bf16.gmra.mrb[4].mxu0 %vm417_vm1, %v1868_v1  ;;  %v1215_v24 = vsel %vm2417_vm4, %v1210_v55, %v1214_v8  ;;  %v1806_v34 = vcombine.low %v2385_v18, %v2390_v20  ;;  %v1224_v1 = vrot.slane %v1223_v62, 4  ;;  %v1228_v4 = vrot.slane %v1226_v0, 5  ;;  %v2210_v55 = vld [vmem:[%s2358_s14 + $0xe8] ss:$8 sps:$4 sm:$0xff]  }
  0x3f   : > { %2050 = vmatprep.mubr.msk.bf16.mxu0 %vm417_vm1, %v1874_v61  ;;  %v1238_v12 = vrot.slane %v1237_v10, 4  ;;  %v1242_v15 = vrot.slane %v1240_v19, 5  ;;  %v1254_v22 = vshll.u32 %v1862_v11, 16  ;;  %v1875_v6 = vcombine.low %v1201_v21, %v1215_v24  ;;  %v2212_v61 = vld [vmem:[%s2358_s14 + $0x108] ss:$8 sps:$4 sm:$0xff]  }
  0x40   : > { %v1229_v35 = vsel %vm2417_vm4, %v1224_v1, %v1228_v4  ;;  %v1265_v16 = vor.u32 %v1264_v60, %v1261_v59  ;;  %v1268_v37 = vshll.u32 %v1864_v25, 16  ;;  %v1252_v7 = vrot.slane %v1251_v29, 4 }
  0x41   : > { %v1243_v39 = vsel %vm2417_vm4, %v1238_v12, %v1242_v15  ;;  %v1256_v40 = vrot.slane %v1254_v22, 5  ;;  %v1423_v43 = vsel %vm430_vm0, %v1389_v36, 0  ;;  %v1807_v45 = vcombine.low %v2396_v23, %v2407_v33  ;;  %v286_v23 = vld [vmem:[%s2358_s14 + $0x40] sm:$0xf] }
  0x42   : > { %1995 = vmatmul.mubr.msk.bf16.gmra.mrb[4].mxu1 %vm417_vm1, %v1801_v56  ;;  %v1876_v18 = vcombine.low %v1229_v35, %v1243_v39  ;;  %v1266_v20 = vrot.slane %v1265_v16, 4  ;;  %v1270_v41 = vrot.slane %v1268_v37, 5  ;;  %v1808_v49 = vcombine.low %v2423_v57, %v2440_v13  ;;  %v2209_v33 = vld [vmem:[%s2358_s14 + $0xd8] ss:$8 sps:$4 sm:$0xff]  }
  0x43   : > { %2000 = vmatprep.mubr.msk.bf16.mxu1 %vm417_vm1, %v1806_v34  ;;  %v1257_v46 = vsel %vm2417_vm4, %v1252_v7, %v1256_v40  ;;  %v727_v50 = vsel %vm430_vm0, %v708_v32, 0  ;;  %v695_v51 = vshrl.u32 %v286_v23, 16  ;;  %v698_v52 = vshll.u32 %v286_v23, 16 }
  0x44   : > { %v1271_v47 = vsel %vm2417_vm4, %v1266_v20, %v1270_v41  ;;  %v1809_v57 = vcombine.low %v2452_v26, %v286_v23  ;;  %v1814_v13 = vcombine.low %v2433_v9, %v2444_v14  ;;  %v704_v56 = vshll.u32 %v287_v54, 16 }
  0x45   : > { %v1877_v36 = vcombine.low %v1257_v46, %v1271_v47  ;;  %v697_v32 = vrot.slane %v695_v51, 4  ;;  %v700_v53 = vrot.slane %v698_v52, 5  ;;  %v1815_v26 = vcombine.low %v2459_v27, %v2490_v58 }
  0x46   : > { %2051 = vmatmul.mubr.msk.bf16.vlgmr.msra.gmra.mrb[0].mxu0 %vm417_vm1, %v1875_v6  ;;  %v1816_v9 = vcombine.low %v2502_v3, %v2508_v17  ;;  %v706_v59 = vrot.slane %v704_v56, 5  ;;  %v1833_v3 = vcombine.low %v2410_v42, %v2466_v31 }
  0x47   : > { %2054 = vmatprep.mubr.msk.bf16.mxu0 %vm417_vm1, %v1876_v18  ;;  %2059 = vmatpush3.bf16.msra.mxu0 %v1423_v43  ;;  %v2256_v18 = vmov (!%p2649_p9), 0.0  }
  0x48   : > { %1522 = vst [vmem:[#allocation2] sm:$0xff] (!%p2649_p9), %v2256_v18  ;;  %1523 = vst [vmem:[#allocation3] sm:$0xff] (!%p2649_p9), %v2256_v18 }
  0x4a   : > { %2001 = vmatmul.mubr.msk.bf16.vlgmr.msra.gmra.mrb[0].mxu1 %vm417_vm1, %v1807_v45 }
  0x4b   : > { %2009 = vmatpush3.bf16.msra.mxu1 %v727_v50  ;;  %2004 = vmatprep.mubr.msk.bf16.mxu1 %vm417_vm1, %v1808_v49 }
  0x4c   : > { %2139 = vmatprep.subr.msk.bf16.mxu1 %vm430_vm0, %v2330_v2  ;;  %v701_v2 = vor.u32 %v700_v53, %v697_v32 }
  0x4e   : > { %2055 = vmatmul.mubr.msk.bf16.gmra.mrb[4].mxu0 %vm417_vm1, %v1877_v36  ;;  %v702_v14 = vrot.slane %v701_v2, 4 }
  0x4f   : > { %2060 = vmatprep.mubr.msk.bf16.mxu0 %vm417_vm1, %v2209_v33 }
  0x50   : > { %v707_v27 = vsel %vm2417_vm4, %v702_v14, %v706_v59 }
  0x51   : > { %v1817_v58 = vcombine.low %v2526_v30, %v707_v27  ;;  %v1899_v30 = vld [vmem:[%s2723_s2] ss:$0 sm:$0xff] }
  0x52   : > { %2005 = vmatmul.mubr.msk.bf16.gmra.mrb[4].mxu1 %vm417_vm1, %v1809_v57 }
  0x53   : > { %2010 = vmatprep.mubr.msk.bf16.mxu1 %vm417_vm1, %v1814_v13 }
  0x56   : > { %2061 = vmatmul.mubr.msk.bf16.vlgmr.msra.gmra.mrb[0].mxu0 %vm417_vm1, %v2210_v55 }
  0x57   : > { %2064 = vmatprep.mubr.msk.bf16.mxu0 %vm417_vm1, %v2211_v28 }
  0x5a   : > { %2011 = vmatmul.mubr.msk.bf16.vlgmr.msra.gmra.mrb[0].mxu1 %vm417_vm1, %v1815_v26 }
  0x5b   : > { %2069 = vmatpush3.bf16.msra.mxu1 %v2344_v5  ;;  %2014 = vmatprep.mubr.msk.bf16.mxu1 %vm417_vm1, %v1816_v9 }
  0x5e   : > { %2065 = vmatmul.mubr.msk.bf16.gmra.mrb[4].mxu0 %vm417_vm1, %v2212_v61 }
  0x62   : > { %2015 = vmatmul.mubr.msk.bf16.gmra.mrb[4].mxu1 %vm417_vm1, %v1817_v58 }
  0x63   : > { %2024 = vmatprep.mubr.msk.bf16.mxu1 %vm417_vm1, %v1833_v3 }
  0x6e   : > { %2025 = vmatmul.mubr.msk.bf16.vlgmr.msra.gmra.mrb[4].mxu1 %vm417_vm1, %v1834_v63 }
 0x129   : > { %v2062_v5 = vpop.f32.mrb[0].mxu0 }
 0x12a   : > { %v1459_v48 = vpop.f32.mrb[1].mxu0 }
 0x12b   : > { %v2063_v17 = vpop.f32.mrb[2].mxu0 }
 0x12c   : > { %v1462_v42 = vpop.f32.mrb[3].mxu0 }
 0x12d   : > { %v2012_v31 = vpop.f32.mrb[0].mxu1 }
 0x12e   : > { %v763_v8 = vpop.f32.mrb[1].mxu1  ;;  %v2070_v38 = vadd.f32 %v2062_v5, %v2012_v31 }
 0x12f   : > { %v2013_v44 = vpop.f32.mrb[2].mxu1  ;;  %v2071_v63 = vadd.f32 %v1459_v48, %v763_v8 }
 0x130   : > { %v766_v60 = vpop.f32.mrb[3].mxu1  ;;  %v2656_v62 = vadd.f32 %v2070_v38, %v1899_v30  ;;  %v2072_v0 = vadd.f32 %v2063_v17, %v2013_v44 }
 0x131   : > { %v2066_v10 = vpop.f32.mrb[4].mxu0  ;;  %v2658_v11 = vadd.f32 %v2071_v63, %v1899_v30  ;;  %v2073_v21 = vadd.f32 %v1462_v42, %v766_v60 }
 0x132   : > { %v1475_v24 = vpop.f32.mrb[5].mxu0  ;;  %v2660_v19 = vadd.f32 %v2072_v0, %v1899_v30 }
 0x133   : > { %v2067_v25 = vpop.f32.mrb[6].mxu0  ;;  %v2662_v29 = vadd.f32 %v2073_v21, %v1899_v30  ;;  %1524 = vst [vmem:[#allocation4] sm:$0x1] (!%p2649_p9), %v2658_v11 }
 0x134   : > { %v1478_v34 = vpop.f32.mrb[7].mxu0 }
 0x141   : > { %v2026_v1 = vpop.f32.mrb[4].mxu1  ;;  %1521 = sbr.rel (%p2649_p9) target bundleno = 328 (0x148), region = 44 }
 0x142   : > { %v2074_v4 = vadd.f32 %v2066_v10, %v2026_v1  ;;  %v905_v12 = vpop.f32.mrb[5].mxu1 }
 0x143   : > { %v2075_v15 = vadd.f32 %v1475_v24, %v905_v12  ;;  %v2027_v22 = vpop.f32.mrb[6].mxu1 }
 0x144   : > { %v2664_v6 = vadd.f32 %v2074_v4, %v1899_v30  ;;  %v2076_v35 = vadd.f32 %v2067_v25, %v2027_v22  ;;  %v908_v16 = vpop.f32.mrb[7].mxu1 }
 0x145   : > { %v2666_v37 = vadd.f32 %v2075_v15, %v1899_v30  ;;  %v2077_v39 = vadd.f32 %v1478_v34, %v908_v16 }
 0x146   : > { %v2668_v7 = vadd.f32 %v2076_v35, %v1899_v30 }
 0x147   : > { %v2670_v40 = vadd.f32 %v2077_v39, %v1899_v30 }
 0x148 PF: > { %p1901_p10 = scmp.ne.s32.totalorder %s2242_s19, 0 }
 0x149   : > { %v1902_v20 = vld [vmem:[#allocation4] ss:$0 sm:$0xff] (!%p1901_p10)  ;;  %v1543_v58 = vld [vmem:[#allocation2] sm:$0xff] (!%p1901_p10)  ;;  %v1553_v48 = vld [vmem:[#allocation3] sm:$0xff] (!%p1901_p10) }
 0x14a   : > { %1527 = sbr.rel (%p1901_p10) target bundleno = 351 (0x15f), region = 48  ;;  %v1535_v41 = vsub.f32 (!%p1901_p10), %v2658_v11, %v1902_v20  ;;  %v1536_v43 = vsub.f32 (!%p1901_p10), %v2662_v29, %v1902_v20  ;;  %v1537_v45 = vsub.f32 (!%p1901_p10), %v2656_v62, %v1902_v20  ;;  %v1538_v46 = vsub.f32 (!%p1901_p10), %v2660_v19, %v1902_v20 }
 0x14b   : > { %v1539_v47 = vsub.f32 (!%p1901_p10), %v2666_v37, %v1902_v20  ;;  %v1540_v33 = vsub.f32 (!%p1901_p10), %v2670_v40, %v1902_v20  ;;  %v1541_v13 = vsub.f32 (!%p1901_p10), %v2664_v6, %v1902_v20  ;;  %v1542_v55 = vsub.f32 (!%p1901_p10), %v2668_v7, %v1902_v20 }
 0x14c   : > { %v1544_v49 = vadd.f32 (!%p1901_p10), %v1536_v43, %v1535_v41  ;;  %v1554_v50 = vmul.f32 (!%p1901_p10), %v1535_v41, %v1535_v41  ;;  %v1555_v36 = vmul.f32 (!%p1901_p10), %v1536_v43, %v1536_v43  ;;  %v1556_v23 = vmul.f32 (!%p1901_p10), %v1537_v45, %v1537_v45 }
 0x14d   : > { %v1557_v52 = vmul.f32 (!%p1901_p10), %v1538_v46, %v1538_v46  ;;  %v1558_v53 = vmul.f32 (!%p1901_p10), %v1539_v47, %v1539_v47  ;;  %v1559_v2 = vmul.f32 (!%p1901_p10), %v1540_v33, %v1540_v33  ;;  %v1560_v9 = vmul.f32 (!%p1901_p10), %v1541_v13, %v1541_v13 }
 0x14e   : > { %v1545_v51 = vadd.f32 (!%p1901_p10), %v1544_v49, %v1537_v45  ;;  %v1562_v57 = vadd.f32 (!%p1901_p10), %v1555_v36, %v1554_v50  ;;  %v1561_v61 = vmul.f32 (!%p1901_p10), %v1542_v55, %v1542_v55 }
 0x150   : > { %v1546_v32 = vadd.f32 (!%p1901_p10), %v1545_v51, %v1538_v46  ;;  %v1563_v54 = vadd.f32 (!%p1901_p10), %v1562_v57, %v1556_v23 }
 0x152   : > { %v1547_v28 = vadd.f32 %v1546_v32, %v1539_v47  ;;  %v1564_v56 = vadd.f32 %v1563_v54, %v1557_v52 }
 0x154   : > { %v1548_v26 = vadd.f32 %v1547_v28, %v1540_v33  ;;  %v1565_v14 = vadd.f32 %v1564_v56, %v1558_v53 }
 0x156   : > { %v1549_v59 = vadd.f32 %v1548_v26, %v1541_v13  ;;  %v1566_v27 = vadd.f32 %v1565_v14, %v1559_v2 }
 0x158   : > { %v1550_v3 = vadd.f32 %v1549_v59, %v1542_v55  ;;  %v1567_v5 = vadd.f32 %v1566_v27, %v1560_v9 }
 0x15a   : > { %v1551_v17 = vadd.f32 %v1550_v3, %v1543_v58  ;;  %v1568_v42 = vadd.f32 %v1567_v5, %v1561_v61 }
 0x15c   : > { %1552 = vst [vmem:[#allocation2] sm:$0xff] %v1551_v17  ;;  %v1569_v31 = vadd.f32 %v1568_v42, %v1553_v48 }
 0x15e   : > { %1570 = vst [vmem:[#allocation3] sm:$0xff] %v1569_v31 }
 0x15f PF: > { %p1571_p11 = scmp.eq.s32.totalorder %s2242_s19, 1 }
 0x161   : > { %p1572_p12 = pnand %p1571_p11, %p1513_p7 }
 0x162   : > { %v1595_v18 = vld [vmem:[#allocation4] sm:$0x1] (!%p1572_p12)  ;;  %v1599_v20 = vld [vmem:[%s2724_s3] sm:$0x1] (!%p1572_p12) }
 0x163   : > { %1575 = sbr.rel (%p1572_p12) target bundleno = 396 (0x18c), region = 52  ;;  %v1576_v30 = vld [vmem:[#allocation2] sm:$0xff] (!%p1572_p12) }
 0x164   : > { %v1577_v38 = vrot.slane (!%p1572_p12), %v1576_v30, 4  ;;  %v1602_v46 = vld [vmem:[%s2725_s4] sm:$0x1] (!%p1572_p12) }
 0x165   : > { %v1584_v8 = vld [vmem:[#allocation3] sm:$0xff] (!%p1572_p12) }
 0x166   : > { %v1585_v44 = vrot.slane (!%p1572_p12), %v1584_v8, 4  ;;  %v1578_v63 = vadd.f32 (!%p1572_p12), %v1577_v38, %v1576_v30 }
 0x168   : > { %v1586_v60 = vadd.f32 (!%p1572_p12), %v1585_v44, %v1584_v8  ;;  %v1579_v0 = vrot.slane (!%p1572_p12), %v1578_v63, 2 }
 0x16a   : > { %v1587_v10 = vrot.slane %v1586_v60, 2  ;;  %v1580_v21 = vadd.f32 %v1579_v0, %v1578_v63 }
 0x16c   : > { %v1588_v24 = vadd.f32 %v1587_v10, %v1586_v60  ;;  %v1581_v25 = vrot.slane %v1580_v21, 1 }
 0x16e   : > { %v1589_v34 = vrot.slane %v1588_v24, 1  ;;  %v1582_v1 = vadd.f32 %v1581_v25, %v1580_v21 }
 0x170   : > { %v1590_v4 = vadd.f32 %v1589_v34, %v1588_v24  ;;  %v1583_v12 = vmul.f32 0.0078125, %v1582_v1 }
 0x172   : > { %v1591_v15 = vmul.f32 0.0078125, %v1590_v4  ;;  %v1592_v22 = vmul.f32 %v1583_v12, %v1583_v12  ;;  %v1596_v41 = vadd.f32 %v1595_v18, %v1583_v12 }
 0x174   : > { %v1593_v35 = vsub.f32 %v1591_v15, %v1592_v22 }
 0x176   : > { %v1594_v16 = vmax.f32 %v1593_v35, 0.0 }
 0x178   : > { %v1597_v39 = vadd.f32 1e-05, %v1594_v16 }
 0x17a   : > { %2214 = vrsqrt.f32 %v1597_v39 }
 0x184   : > { %v2215_v43 = vpop.eup %2214 }
 0x185   : > { %v1600_v45 = vmul.f32 %v2215_v43, %v1599_v20 }
 0x187   : > { %1601 = vst [vmem:[#allocation5] sm:$0x1] %v1600_v45  ;;  %v1603_v47 = vmul.f32 %v1600_v45, %v1596_v41 }
 0x189   : > { %v1604_v49 = vsub.f32 %v1602_v46, %v1603_v47 }
 0x18b   : > { %1605 = vst [vmem:[#allocation5 + $0x1] sm:$0x1] %v1604_v49 }
 0x18c PF: > { %p1903_p13 = scmp.ne.s32.totalorder %s2242_s19, 1 }
 0x18e   : > { %1608 = sbr.rel (%p1903_p13) target bundleno = 416 (0x1a0), region = 56  ;;  %v1904_v50 = vld [vmem:[#allocation5] ss:$0 sm:$0xff] (!%p1903_p13) }
 0x18f   : > { %v1614_v23 = vmul.f32 (!%p1903_p13), %v1904_v50, %v2658_v11  ;;  %v1615_v33 = vmul.f32 (!%p1903_p13), %v1904_v50, %v2662_v29  ;;  %v1616_v51 = vmul.f32 (!%p1903_p13), %v1904_v50, %v2656_v62  ;;  %v1617_v52 = vmul.f32 (!%p1903_p13), %v1904_v50, %v2660_v19 }
 0x190   : > { %v1618_v57 = vmul.f32 (!%p1903_p13), %v1904_v50, %v2666_v37  ;;  %v1619_v13 = vmul.f32 (!%p1903_p13), %v1904_v50, %v2670_v40  ;;  %v1620_v32 = vmul.f32 (!%p1903_p13), %v1904_v50, %v2664_v6  ;;  %v1621_v53 = vmul.f32 (!%p1903_p13), %v1904_v50, %v2668_v7 }
 0x192   : > { %v1905_v36 = vld [vmem:[#allocation5 + $0x1] ss:$0 sm:$0xff] (!%p1903_p13) }
 0x193   : > { %v1627_v54 = vadd.f32 (!%p1903_p13), %v1905_v36, %v1614_v23  ;;  %v1628_v55 = vadd.f32 (!%p1903_p13), %v1905_v36, %v1615_v33  ;;  %v1629_v28 = vadd.f32 (!%p1903_p13), %v1905_v36, %v1616_v51  ;;  %v1630_v2 = vadd.f32 (!%p1903_p13), %v1905_v36, %v1617_v52 }
 0x194   : > { %v1631_v56 = vadd.f32 (!%p1903_p13), %v1905_v36, %v1618_v57  ;;  %v1632_v11 = vadd.f32 (!%p1903_p13), %v1905_v36, %v1619_v13  ;;  %v1633_v26 = vadd.f32 (!%p1903_p13), %v1905_v36, %v1620_v32  ;;  %v1634_v29 = vadd.f32 (!%p1903_p13), %v1905_v36, %v1621_v53 }
 0x195   : > { %vm1635_vm5 = vcmp.gt.f32.partialorder %v1627_v54, 0.0  ;;  %vm1636_vm6 = vcmp.gt.f32.partialorder %v1628_v55, 0.0  ;;  %v1643_v62 = vmul.f32 0.01, %v1627_v54  ;;  %v1644_v19 = vmul.f32 0.01, %v1628_v55 }
 0x196   : > { %vm1637_vm7 = vcmp.gt.f32.partialorder %v1629_v28, 0.0  ;;  %vm1638_vm8 = vcmp.gt.f32.partialorder %v1630_v2, 0.0  ;;  %v1645_v37 = vmul.f32 0.01, %v1629_v28  ;;  %v1646_v40 = vmul.f32 0.01, %v1630_v2 }
 0x197   : > { %v1651_v6 = vsel %vm1635_vm5, %v1627_v54, %v1643_v62  ;;  %v1652_v7 = vsel %vm1636_vm6, %v1628_v55, %v1644_v19  ;;  %vm1639_vm9 = vcmp.gt.f32.partialorder %v1631_v56, 0.0  ;;  %vm1640_vm10 = vcmp.gt.f32.partialorder %v1632_v11, 0.0 }
 0x198   : > { %v1913_v9 = vpack.c.bf16 %v1652_v7, %v1651_v6  ;;  %v1653_v14 = vsel %vm1637_vm7, %v1629_v28, %v1645_v37  ;;  %v1654_v59 = vsel %vm1638_vm8, %v1630_v2, %v1646_v40  ;;  %v1647_v61 = vmul.f32 0.01, %v1631_v56 }
 0x199   : > { %v1918_v27 = vpack.c.bf16 %v1654_v59, %v1653_v14  ;;  %v1648_v58 = vmul.f32 0.01, %v1632_v11  ;;  %vm1641_vm11 = vcmp.gt.f32.partialorder %v1633_v26, 0.0  ;;  %vm1642_vm12 = vcmp.gt.f32.partialorder %v1634_v29, 0.0 }
 0x19a   : > { %1914 = vst [vmem:[%s2363_s17] sm:$0xff] %v1913_v9   ;;  %v1655_v3 = vsel %vm1639_vm9, %v1631_v56, %v1647_v61  ;;  %v1649_v5 = vmul.f32 0.01, %v1633_v26  ;;  %v1650_v48 = vmul.f32 0.01, %v1634_v29 }
 0x19b   : > { %1930 = vst [vmem:[%s2363_s17 + $0x8] sm:$0xff] %v1918_v27   ;;  %v1656_v17 = vsel %vm1640_vm10, %v1632_v11, %v1648_v58 }
 0x19c   : > { %v1923_v42 = vpack.c.bf16 %v1656_v17, %v1655_v3  ;;  %v1657_v31 = vsel %vm1641_vm11, %v1633_v26, %v1649_v5  ;;  %v1658_v30 = vsel %vm1642_vm12, %v1634_v29, %v1650_v48 }
 0x19d   : > { %v1928_v8 = vpack.c.bf16 %v1658_v30, %v1657_v31 }
 0x19e   : > { %1931 = vst [vmem:[%s2363_s17 + $0x10] sm:$0xff] %v1923_v42  }
 0x19f   : > { %1932 = vst [vmem:[%s2363_s17 + $0x18] sm:$0xff] %v1928_v8  }
 0x1a0 PF: > { %s15_s22 = sadd.s32 1, %s2254_s22   ;;  %s2730_s18 = smov %s2246_s20 }
 0x1a1   : > { %p12_p0 = scmp.ge.s32.totalorder %s15_s22, 6   ;;  %s2731_s19 = smov %s2250_s21 }
 0x1a2   : > { %s2732_s20 = smov %s2735_s23  ;;  %s2733_s21 = smov %s2739_s24 }
 0x1a3   :  { %14 = sbr.rel (!%p12_p0) target bundleno = 3 (0x3), region = 90 }

// kernel: _lambda_.4
= control target key start
LH: loop header
LB: loop body
LE: loop exit
PB: predicated region body
PF: predicated region fallthrough
CT: control target
= control target key end

     0   :  { %s2128_s18 = smov 0   ;;  %s2130_s19 = smov 0   ;;  %s2602_s0 = inlined_call_operand.vmem [shape: bf16[2,20,5,128], index: 0, kind: input, shape index: {}]   ;;  %s2603_s1 = inlined_call_operand.vmem [shape: bf16[1152,128], index: 1, kind: input, shape index: {}]   ;;  %s2604_s2 = inlined_call_operand.vmem [shape: f32[1,128], index: 2, kind: input, shape index: {}]   ;;  %s2605_s3 = inlined_call_operand.vmem [shape: f32[1,128], index: 3, kind: input, shape index: {}]   ;;  %s2606_s4 = inlined_call_operand.vmem [shape: f32[1,128], index: 4, kind: input, shape index: {}]   ;;  %s2607_s5 = inlined_call_operand.vmem [shape: bf16[2,4,4,128], index: 5, kind: output, shape index: {}]  }
   0x1   :  { %s2132_s20 = smov 0   ;;  %s2134_s21 = smov 0  }
   0x2   :  { %s2136_s22 = smov 0  }
   0x3 LB: > { %s30_s23 = sadd.s32 1, %s2084_s20  ;;  %s34_s24 = sadd.s32 1, %s2088_s21  ;;  %s2092_s22 = sphi %s2136_s22, %s15_s22   ;;  %s2088_s21 = sphi %s2134_s21, %s2616_s21   ;;  %s2084_s20 = sphi %s2132_s20, %s2615_s20   ;;  %s2080_s19 = sphi %s2130_s19, %s2614_s19   ;;  %s2076_s18 = sphi %s2128_s18, %s2613_s18  }
   0x4   : > { %p32_p0 = scmp.ge.s32.totalorder %s30_s23, 2  ;;  %p1704_p1 = scmp.ge.s32.totalorder %s2092_s22, 1 }
   0x5   : > { %p212_p2 = scmp.lt.s32.totalorder %s2092_s22, 5 }
   0x6   : > { %s2618_s23 = smov (%p32_p0, %s30_s23), 0  ;;  %s2620_s24 = smov (!%p32_p0, %s34_s24), %s2088_s21 }
   0x7   : > { %p213_p3 = pnand %p1704_p1, %p212_p2  ;;  %p36_p4 = scmp.ge.s32.totalorder %s2620_s24, 2 }
   0x8   : > { %s251_s25 = smul.u32 (!%p213_p3), %s2076_s18, %s2080_s19  ;;  %v1966_v0 = vld [vmem:[%s2603_s1 + $0x40] sm:$0xff] (!%p213_p3)   ;;  %v1970_v4 = vld [vmem:[%s2603_s1 + $0x48] sm:$0xff] (!%p213_p3)   ;;  %v1974_v8 = vld [vmem:[%s2603_s1 + $0x50] sm:$0xff] (!%p213_p3)   ;;  %p246_p6 = scmp.lt.s32.totalorder (!%p213_p3), %s2076_s18, 1  ;;  %v283_v29 = vlaneseq (!%p213_p3)  ;;  %v2094_v34 = vmov (!%p213_p3), 1983009808  }
   0x9   : > { %s2622_s24 = smov (%p36_p4, %s2620_s24), 0  ;;  %216 = sbr.rel (%p213_p3) target bundleno = 399 (0x18f), region = 40 }
   0xa   : > { %v1967_v1 = vld [vmem:[%s2603_s1] sm:$0xff] (!%p213_p3)   ;;  %p254_p5 = scmp.lt.s32.totalorder (!%p213_p3), %s251_s25, 1  ;;  %1804 = vmatprep.subr.bf16.mxu0 (!%p213_p3), %v1966_v0  ;;  %v1971_v5 = vld [vmem:[%s2603_s1 + $0x8] sm:$0xff] (!%p213_p3)   ;;  %v1975_v9 = vld [vmem:[%s2603_s1 + $0x10] sm:$0xff] (!%p213_p3)   ;;  %v281_v35 = vunpack.c.l.s4 (!%p213_p3), %v2094_v34  ;;  %v284_v36 = vshrl.u32 (!%p213_p3), %v283_v29, 7  ;;  %vm2096_vm7 = vmmov (!%p213_p3), 0  }
   0xb   : > { %v1968_v2 = vld [vmem:[%s2603_s1 + $0xc0] sm:$0xff] (!%p213_p3)   ;;  %1805 = vmatpush3.bf16.msra.mxu0 (!%p213_p3), %v1967_v1  ;;  %v1972_v6 = vld [vmem:[%s2603_s1 + $0xc8] sm:$0xff] (!%p213_p3)   ;;  %v1976_v10 = vld [vmem:[%s2603_s1 + $0xd0] sm:$0xff] (!%p213_p3)   ;;  %vm329_vm0 = vsmask.f32 (!%p213_p3), 1280  ;;  %p1487_p7 = scmp.eq.s32.totalorder (!%p213_p3), %s2076_s18, 0 }
   0xc   : > { %v1969_v3 = vld [vmem:[%s2603_s1 + $0x80] sm:$0xff] (!%p213_p3)   ;;  %1826 = vmatprep.subr.bf16.mxu1 (!%p213_p3), %v1968_v2  ;;  %1806 = vmatprep.subr.bf16.mxu0 (!%p213_p3), %v1970_v4  ;;  %v1973_v7 = vld [vmem:[%s2603_s1 + $0x88] sm:$0xff] (!%p213_p3)   ;;  %v1977_v11 = vld [vmem:[%s2603_s1 + $0x90] sm:$0xff] (!%p213_p3)   ;;  %v282_v40 = vunpack.c.0.s8 (!%p213_p3), %v281_v35  ;;  %vm330_vm1 = vsmask.f32 (!%p213_p3), 3336  ;;  %p1491_p8 = scmp.eq.s32.totalorder (!%p213_p3), %s2080_s19, 0 }
   0xd   : > { %1827 = vmatpush3.bf16.msra.mxu1 (!%p213_p3), %v1969_v3  ;;  %v1978_v12 = vld [vmem:[%s2603_s1 + $0x58] sm:$0xff] (!%p213_p3)   ;;  %v1982_v16 = vld [vmem:[%s2603_s1 + $0x60] sm:$0xff] (!%p213_p3)   ;;  %v1986_v20 = vld [vmem:[%s2603_s1 + $0x68] sm:$0xff] (!%p213_p3)   ;;  %vm332_vm3 = vsmask.f32 (!%p213_p3), 5392 }
   0xe   : > { %1828 = vmatprep.subr.bf16.mxu1 (!%p213_p3), %v1972_v6  ;;  %v1979_v13 = vld [vmem:[%s2603_s1 + $0x18] sm:$0xff] (!%p213_p3)   ;;  %v1983_v17 = vld [vmem:[%s2603_s1 + $0x20] sm:$0xff] (!%p213_p3)   ;;  %v1987_v21 = vld [vmem:[%s2603_s1 + $0x28] sm:$0xff] (!%p213_p3)   ;;  %v2296_v48 = vsub.s32 (!%p213_p3), %v282_v40, %v284_v36  ;;  %vm334_vm4 = vsmask.f32 (!%p213_p3), 7448  ;;  %p2554_p9 = pnand (!%p213_p3), %p1491_p8, %p1487_p7 }
   0xf   : > { %1807 = vmatpush3.bf16.msra.mxu0 (!%p213_p3), %v1971_v5  ;;  %v1980_v14 = vld [vmem:[%s2603_s1 + $0xd8] sm:$0xff] (!%p213_p3)   ;;  %v1984_v18 = vld [vmem:[%s2603_s1 + $0xe0] sm:$0xff] (!%p213_p3)   ;;  %v1988_v22 = vld [vmem:[%s2603_s1 + $0xe8] sm:$0xff] (!%p213_p3)  }
  0x10   : > { %s2624_s25 = smov (!%p254_p5, %s251_s25), 1  ;;  %1808 = vmatprep.subr.bf16.mxu0 %v1974_v8  ;;  %v1981_v15 = vld [vmem:[%s2603_s1 + $0x98] sm:$0xff]   ;;  %v1985_v19 = vld [vmem:[%s2603_s1 + $0xa0] sm:$0xff]   ;;  %v1989_v23 = vld [vmem:[%s2603_s1 + $0xa8] sm:$0xff]  }
  0x11   : > { %s1802_s13 = sshll.u32 %s2624_s25, 3  ;;  %1829 = vmatpush3.bf16.msra.mxu1 %v1973_v7  ;;  %v1990_v24 = vld [vmem:[%s2603_s1 + $0x70] sm:$0xff]   ;;  %v1994_v28 = vld [vmem:[%s2603_s1 + $0x78] sm:$0xff]   ;;  %v2004_v50 = vld [vmem:[%s2603_s1 + $0x140] sm:$0xff]  }
  0x12   : > { %s2188_s26 = scalar_lea.vmem %s2607_s5, %s1802_s13  ;;  %1830 = vmatprep.subr.bf16.mxu1 %v1976_v10  ;;  %v1991_v25 = vld [vmem:[%s2603_s1 + $0x30] sm:$0xff]   ;;  %v1995_v30 = vld [vmem:[%s2603_s1 + $0x38] sm:$0xff]   ;;  %v2008_v61 = vld [vmem:[%s2603_s1 + $0x1c0] sm:$0xff]  }
  0x13   : > { %1809 = vmatpush3.bf16.msra.mxu0 %v1975_v9  ;;  %s247_s16 = scalar_select %p246_p6, %s2076_s18, 1  ;;  %v1992_v26 = vld [vmem:[%s2603_s1 + $0xf0] sm:$0xff]   ;;  %v1996_v31 = vld [vmem:[%s2603_s1 + $0xf8] sm:$0xff]   ;;  %v2007_v2 = vld [vmem:[%s2603_s1 + $0x100] sm:$0xff]  }
  0x14   : > { %1810 = vmatprep.subr.bf16.mxu0 %v1978_v12  ;;  %v1993_v27 = vld [vmem:[%s2603_s1 + $0xb0] sm:$0xff]   ;;  %v2001_v39 = vld [vmem:[%s2603_s1 + $0xb8] sm:$0xff]   ;;  %v2010_v6 = vld [vmem:[%s2603_s1 + $0x148] sm:$0xff]  }
  0x15   : > { %1831 = vmatpush3.bf16.msra.mxu1 %v1977_v11  ;;  %s1921_s8 = smul.u32 80, %s247_s16  ;;  %vm331_vm2 = vmor %vm329_vm0, %vm330_vm1 }
  0x16   : > { %1832 = vmatprep.subr.bf16.mxu1 %v1980_v14  ;;  %vm2374_vm5 = vmor %vm331_vm2, %vm332_vm3 }
  0x17   : > { %1811 = vmatpush3.bf16.msra.mxu0 %v1979_v13  ;;  %s2267_s28 = scalar_lea.vmem %s2602_s0, %s1921_s8  ;;  %v2011_v13 = vld [vmem:[%s2603_s1 + $0x108] sm:$0xff]   ;;  %vm2383_vm6 = vmor %vm2374_vm5, %vm334_vm4 }
  0x18   : > { %1812 = vmatprep.subr.bf16.mxu0 %v1982_v16  ;;  %v1708_v32 = vld [vmem:[%s2267_s28 + $0x14] sm:$0x7]  ;;  %v2271_v33 = vld [vmem:[%s2267_s28 + $0x18] sm:$0x7]  ;;  %v2274_v37 = vld [vmem:[%s2267_s28 + $0x1c] sm:$0x7] }
  0x19   : > { %1833 = vmatpush3.bf16.msra.mxu1 %v1981_v15  ;;  %v2277_v38 = vld [vmem:[%s2267_s28 + $0x20] sm:$0x7]  ;;  %v484_v41 = vcombine.low %v1708_v32, %v2271_v33  ;;  %v2287_v44 = vld [vmem:[%s2267_s28 + $0x4] sm:$0x7]  ;;  %v2290_v45 = vld [vmem:[%s2267_s28 + $0x8] sm:$0x7] }
  0x1a   : > { %1834 = vmatprep.subr.bf16.mxu1 %v1984_v18  ;;  %v485_v42 = vcombine.low %v2274_v37, %v2277_v38  ;;  %v269_v43 = vld [vmem:[%s2267_s28] sm:$0x7]  ;;  %v2293_v46 = vld [vmem:[%s2267_s28 + $0xc] sm:$0x7]  ;;  %v1713_v51 = vld [vmem:[%s2267_s28 + $0x28] sm:$0x7] }
  0x1b   : > { %1813 = vmatpush3.bf16.msra.mxu0 %v1983_v17  ;;  %v278_v47 = vcombine.low %v269_v43, %v2287_v44  ;;  %v279_v49 = vcombine.low %v2290_v45, %v2293_v46  ;;  %v1714_v52 = vld [vmem:[%s2267_s28 + $0x2c] sm:$0x7]  ;;  %v1715_v53 = vld [vmem:[%s2267_s28 + $0x30] sm:$0x7]  ;;  %v1716_v54 = vld [vmem:[%s2267_s28 + $0x34] sm:$0x7]  ;;  %v492_v56 = vrot.slane %v484_v41, %v2296_v48  ;;  %v303_v60 = vrot.slane %v269_v43, %v2296_v48 }
  0x1c   : > { %1814 = vmatprep.subr.bf16.mxu0 %v1986_v20  ;;  %v534_v55 = vcombine.low %v1713_v51, %v1714_v52  ;;  %v499_v57 = vrot.slane %v485_v42, %v2296_v48  ;;  %v535_v0 = vcombine.low %v1715_v53, %v1716_v54  ;;  %v559_v3 = vrot.slane %v1713_v51, %v2296_v48 }
  0x1d   : > { %1835 = vmatpush3.bf16.msra.mxu1 %v1985_v19  ;;  %v286_v58 = vrot.slane %v278_v47, %v2296_v48  ;;  %v293_v59 = vrot.slane %v279_v49, %v2296_v48  ;;  %v567_v5 = vrot.slane %v1714_v52, %v2296_v48  ;;  %v337_v7 = vshrl.u32 %v303_v60, 16  ;;  %v2018_v49 = vld [vmem:[%s2603_s1 + $0x158] sm:$0xff]  }
  0x1e   : > { %1836 = vmatprep.subr.bf16.mxu1 %v1988_v22  ;;  %v500_v62 = vcombine.low %v492_v56, %v499_v57  ;;  %v542_v1 = vrot.slane %v534_v55, %v2296_v48  ;;  %v549_v4 = vrot.slane %v535_v0, %v2296_v48  ;;  %v340_v8 = vshll.u32 %v303_v60, 16  ;;  %v2019_v52 = vld [vmem:[%s2603_s1 + $0x118] sm:$0xff]  }
  0x1f   : > { %1815 = vmatpush3.bf16.msra.mxu0 %v1987_v21  ;;  %v294_v63 = vcombine.low %v286_v58, %v293_v59  ;;  %v560_v9 = vcombine.high %v559_v3, %v559_v3  ;;  %v2326_v10 = vrot.slane %v1715_v53, %v2296_v48  ;;  %v586_v12 = vshrl.u32 %v559_v3, 16 }
  0x20   : > { %1816 = vmatprep.subr.bf16.mxu0 %v1990_v24  ;;  %1314 = vmatprep.mubr.bf16.mxu0 %v500_v62  ;;  %v550_v11 = vcombine.low %v542_v1, %v549_v4  ;;  %v568_v14 = vcombine.high %v567_v5, %v567_v5  ;;  %v589_v15 = vshll.u32 %v559_v3, 16  ;;  %v600_v17 = vshrl.u32 %v567_v5, 16  ;;  %v2048_v4 = vld [vmem:[%s2603_s1 + $0x230] sm:$0xff]  }
  0x21   : > { %1837 = vmatpush3.bf16.msra.mxu1 %v1989_v23  ;;  %v2331_v16 = vshll.u32 %v560_v9, 16  ;;  %v2334_v18 = vrot.slane %v1716_v54, %v2296_v48  ;;  %v603_v19 = vshll.u32 %v567_v5, 16  ;;  %v614_v20 = vshrl.u32 %v2326_v10, 16 }
  0x22   : > { %1838 = vmatprep.subr.bf16.mxu1 %v1992_v26  ;;  %1355 = vmatprep.mubr.bf16.mxu1 %v550_v11  ;;  %v617_v21 = vshll.u32 %v2326_v10, 16  ;;  %v311_v22 = vrot.slane %v2287_v44, %v2296_v48  ;;  %v339_v23 = vrot.slane %v337_v7, 6  ;;  %v342_v24 = vrot.slane %v340_v8, 7  ;;  %v2014_v26 = vld [vmem:[%s2603_s1 + $0x150] sm:$0xff]  }
  0x23   : > { %1817 = vmatpush3.bf16.msra.mxu0 %v1991_v25  ;;  %v2340_v25 = vrot.slane %v586_v12, 6  ;;  %v2350_v29 = vrot.slane %v589_v15, 7  ;;  %v327_v32 = vrot.slane %v2293_v46, %v2296_v48  ;;  %v597_v34 = vrot.slane %v2331_v16, 7 }
  0x24   : > { %1818 = vmatprep.subr.bf16.mxu0 %v1994_v28  ;;  %v319_v28 = vrot.slane %v2290_v45, %v2296_v48  ;;  %v2357_v35 = vrot.slane %v600_v17, 6  ;;  %v312_v36 = vcombine.high %v311_v22, %v311_v22  ;;  %v2361_v40 = vrot.slane %v614_v20, 6  ;;  %v2022_v20 = vld [vmem:[%s2603_s1 + $0x160] sm:$0xff]  }
  0x25   : > { %1839 = vmatpush3.bf16.msra.mxu1 %v1993_v27  ;;  %v2015_v27 = vld [vmem:[%s2603_s1 + $0x110] sm:$0xff]   ;;  %v2363_v41 = vrot.slane %v617_v21, 7  ;;  %v628_v42 = vshrl.u32 %v2334_v18, 16  ;;  %v343_v47 = vor.u32 %v342_v24, %v339_v23  ;;  %v328_v53 = vcombine.high %v327_v32, %v327_v32  ;;  %v2023_v24 = vld [vmem:[%s2603_s1 + $0x120] sm:$0xff]  }
  0x26   : > { %1840 = vmatprep.subr.bf16.mxu1 %v1996_v31  ;;  %v304_v31 = vcombine.high %v303_v60, %v303_v60  ;;  %v320_v43 = vcombine.high %v319_v28, %v319_v28  ;;  %v351_v55 = vshrl.u32 %v311_v22, 16  ;;  %v354_v56 = vshll.u32 %v311_v22, 16 }
  0x27   : > { %1819 = vmatpush3.bf16.msra.mxu0 %v1995_v30  ;;  %v2352_v30 = vshll.u32 %v568_v14, 16  ;;  %v360_v57 = vshll.u32 %v312_v36, 16  ;;  %v344_v58 = vrot.slane %v343_v47, 2  ;;  %v365_v60 = vshrl.u32 %v319_v28, 16 }
  0x28   : > { %1848 = vmatprep.subr.bf16.mxu0 %v2004_v50  ;;  %v576_v50 = vcombine.high %v2326_v10, %v2326_v10  ;;  %v346_v51 = vshll.u32 %v304_v31, 16  ;;  %v353_v62 = vrot.slane %v351_v55, 6  ;;  %v374_v0 = vshll.u32 %v320_v43, 16 }
  0x29   : > { %1841 = vmatpush3.bf16.msra.mxu1 %v2001_v39  ;;  %v2359_v39 = vrot.slane %v603_v19, 7  ;;  %v379_v1 = vshrl.u32 %v327_v32, 16  ;;  %v631_v3 = vshll.u32 %v2334_v18, 16  ;;  %v362_v5 = vrot.slane %v360_v57, 7 }
  0x2a   : > { %1870 = vmatprep.subr.bf16.mxu1 %v2008_v61  ;;  %1315 = vmatmul.mubr.bf16.vlgmr.msra.gmra.mrb[0].mxu0 %v294_v63  ;;  %v348_v59 = vrot.slane %v346_v51, 7  ;;  %v368_v61 = vshll.u32 %v319_v28, 16  ;;  %v356_v63 = vrot.slane %v354_v56, 7  ;;  %v382_v10 = vshll.u32 %v327_v32, 16  ;;  %v2012_v56 = vld [vmem:[%s2603_s1 + $0x1c8] sm:$0xff]  }
  0x2b   : > { %1849 = vmatpush3.bf16.msra.mxu0 %v2007_v2  ;;  %v1712_v2 = vld [vmem:[%s2267_s28 + $0x24] sm:$0x7]  ;;  %v381_v9 = vrot.slane %v379_v1, 6  ;;  %v388_v11 = vshll.u32 %v328_v53, 16  ;;  %v584_v12 = vcombine.high %v2334_v18, %v2334_v18  ;;  %v376_v17 = vrot.slane %v374_v0, 7 }
  0x2c   : > { %1850 = vmatprep.subr.bf16.mxu0 %v2010_v6  ;;  %v367_v6 = vrot.slane %v365_v60, 6  ;;  %v370_v7 = vrot.slane %v368_v61, 7  ;;  %v357_v8 = vor.u32 %v356_v63, %v353_v62  ;;  %v349_v14 = vsel %vm2383_vm6, %v344_v58, %v348_v59  ;;  %v2009_v53 = vld [vmem:[%s2603_s1 + $0x180] sm:$0xff]   ;;  %v2030_v58 = vld [vmem:[%s2603_s1 + $0x170] sm:$0xff]  }
  0x2d   : > { %v384_v19 = vrot.slane %v382_v10, 7  ;;  %v623_v21 = vshll.u32 %v576_v50, 16  ;;  %v390_v23 = vrot.slane %v388_v11, 7  ;;  %v504_v18 = vcombine.low %v2271_v33, %v2274_v37  ;;  %v2031_v63 = vld [vmem:[%s2603_s1 + $0x130] sm:$0xff]  }
  0x2e   : > { %v358_v15 = vrot.slane %v357_v8, 2  ;;  %v630_v31 = vrot.slane %v628_v42, 6  ;;  %v633_v32 = vrot.slane %v631_v3, 7  ;;  %v592_v43 = vor.u32 %v2350_v29, %v2340_v25  ;;  %v2026_v25 = vld [vmem:[%s2603_s1 + $0x168] sm:$0xff]   ;;  %v2016_v3 = vld [vmem:[%s2603_s1 + $0x1d0] sm:$0xff]  }
  0x2f   : > { %1851 = vmatpush3.bf16.msra.mxu0 %v2011_v13  ;;  %v371_v13 = vor.u32 %v370_v7, %v367_v6  ;;  %v385_v28 = vor.u32 %v384_v19, %v381_v9  ;;  %v637_v47 = vshll.u32 %v584_v12, 16  ;;  %v512_v29 = vrot.slane %v504_v18, %v2296_v48  ;;  %v2034_v6 = vld [vmem:[%s2603_s1 + $0x178] sm:$0xff]   ;;  %v2017_v10 = vld [vmem:[%s2603_s1 + $0x190] sm:$0xff]  }
  0x30   : > { %1852 = vmatprep.subr.bf16.mxu0 %v2014_v26  ;;  %v505_v26 = vcombine.low %v2277_v38, %v1712_v2  ;;  %v606_v38 = vor.u32 %v2359_v39, %v2357_v35  ;;  %v611_v51 = vrot.slane %v2352_v30, 7  ;;  %v593_v54 = vrot.slane %v592_v43, 2  ;;  %v2013_v2 = vld [vmem:[%s2603_s1 + $0x188] sm:$0xff]   ;;  %v2035_v9 = vld [vmem:[%s2603_s1 + $0x138] sm:$0xff]   ;;  %v273_v19 = vld [vmem:[%s2267_s28 + $0x10] sm:$0x7] }
  0x31   : > { %v372_v22 = vrot.slane %v371_v13, 2  ;;  %v386_v37 = vrot.slane %v385_v28, 2  ;;  %v639_v55 = vrot.slane %v637_v47, 7  ;;  %v2020_v12 = vld [vmem:[%s2603_s1 + $0x1d8] sm:$0xff]  }
  0x32   : > { %v519_v50 = vrot.slane %v505_v26, %v2296_v48  ;;  %v607_v57 = vrot.slane %v606_v38, 2  ;;  %v598_v59 = vsel %vm2383_vm6, %v593_v54, %v597_v34  ;;  %v2025_v26 = vld [vmem:[%s2603_s1 + $0x1a0] sm:$0xff]   ;;  %v2044_v38 = vld [vmem:[%s2603_s1 + $0x210] sm:$0xff]  }
  0x33   : > { %1853 = vmatpush3.bf16.msra.mxu0 %v2015_v27  ;;  %v2402_v27 = vsel %vm2383_vm6, %v358_v15, %v362_v5  ;;  %v2409_v33 = vsel %vm2383_vm6, %v372_v22, %v376_v17  ;;  %v2417_v42 = vsel %vm2383_vm6, %v386_v37, %v390_v23  ;;  %v2095_v15 = vmov 0.0   ;;  %v2053_v17 = vld.sshfl [vmem:[%s2267_s28 + $0x44] sm:$0x5f pattern:$0x76325410] }
  0x34   : > { %1854 = vmatprep.subr.bf16.mxu0 %v2018_v49  ;;  %v392_v36 = vcombine.low %v349_v14, %v2402_v27  ;;  %v620_v49 = vor.u32 %v2363_v41, %v2361_v40  ;;  %v393_v35 = vcombine.low %v2409_v33, %v2417_v42  ;;  %v2027_v40 = vld [vmem:[%s2603_s1 + $0x128] sm:$0xff]   ;;  %v625_v41 = vrot.slane %v623_v21, 7  ;;  %v2052_v14 = vld.sshfl [vmem:[%s2267_s28 + $0x3c] sm:$0x5f pattern:$0x76325410] }
  0x35   : > { %v520_v61 = vcombine.low %v512_v29, %v519_v50  ;;  %v612_v0 = vsel %vm2383_vm6, %v607_v57, %v611_v51  ;;  %v2021_v21 = vld [vmem:[%s2603_s1 + $0x198] sm:$0xff]   ;;  %v2040_v22 = vld [vmem:[%s2603_s1 + $0x200] sm:$0xff]   ;;  %v2029_v37 = vld [vmem:[%s2603_s1 + $0x1a8] sm:$0xff]   ;;  %v413_v29 = vcombine.low %v2293_v46, %v273_v19 }
  0x36   : > { %v400_v39 = vrot.slane %v392_v36, %v2296_v48  ;;  %v407_v30 = vrot.slane %v393_v35, %v2296_v48  ;;  %v621_v60 = vrot.slane %v620_v49, 2  ;;  %v641_v34 = vcombine.low %v598_v59, %v612_v0  ;;  %v2024_v23 = vld [vmem:[%s2603_s1 + $0x1e0] sm:$0xff]   ;;  %v2032_v49 = vld [vmem:[%s2603_s1 + $0x1f0] sm:$0xff]   ;;  %v2045_v35 = vld [vmem:[%s2603_s1 + $0x218] sm:$0xff]  }
  0x37   : > { %1855 = vmatpush3.bf16.msra.mxu0 %v2019_v52  ;;  %v634_v52 = vor.u32 %v633_v32, %v630_v31  ;;  %v2043_v31 = vld [vmem:[%s2603_s1 + $0x208] sm:$0xff]   ;;  %v1721_v0 = vld [vmem:[%s2604_s2] ss:$0 sm:$0xff] }
  0x38   : > { %1856 = vmatprep.subr.bf16.mxu0 %v2022_v20  ;;  %v408_v62 = vcombine.low %v400_v39, %v407_v30  ;;  %v626_v16 = vsel %vm2383_vm6, %v621_v60, %v625_v41  ;;  %v649_v8 = vrot.slane %v641_v34, %v2296_v48  ;;  %v437_v20 = vrot.slane %v273_v19, %v2296_v48  ;;  %v2028_v32 = vld [vmem:[%s2603_s1 + $0x1e8] sm:$0xff]   ;;  %v2036_v39 = vld [vmem:[%s2603_s1 + $0x1f8] sm:$0xff]  }
  0x39   : > { %v635_v1 = vrot.slane %v634_v52, 2  ;;  %v2033_v52 = vld [vmem:[%s2603_s1 + $0x1b0] sm:$0xff]   ;;  %v2037_v41 = vld [vmem:[%s2603_s1 + $0x1b8] sm:$0xff]   ;;  %v2047_v30 = vld [vmem:[%s2603_s1 + $0x228] sm:$0xff]  }
  0x3a   : > { %1356 = vmatmul.mubr.bf16.vlgmr.msra.gmra.mrb[0].mxu1 %v408_v62  ;;  %v440_v18 = vshrl.u32 %v437_v20, 16  ;;  %v443_v28 = vshll.u32 %v437_v20, 16  ;;  %v438_v36 = vcombine.high %v437_v20, %v437_v20 }
  0x3b   : > { %1857 = vmatpush3.bf16.msra.mxu0 %v2023_v24  ;;  %v640_v5 = vsel %vm2383_vm6, %v635_v1, %v639_v55  ;;  %1871 = vmatpush3.bf16.msra.mxu1 %v2009_v53  ;;  %v687_v24 = vcombine.low %v2052_v14, %v2053_v17  ;;  %v2046_v53 = vld [vmem:[%s2603_s1 + $0x220] sm:$0xff]  }
  0x3c   : > { %1858 = vmatprep.subr.bf16.mxu0 %v2026_v25  ;;  %v642_v7 = vcombine.low %v626_v16, %v640_v5  ;;  %1437 = vmatprep.mubr.bf16.mxu1 %v520_v61  ;;  %v442_v43 = vrot.slane %v440_v18, 6  ;;  %v445_v47 = vrot.slane %v443_v28, 7  ;;  %v412_v25 = vcombine.low %v2287_v44, %v2290_v45 }
  0x3d   : > { %1872 = vmatprep.subr.bf16.mxu1 %v2012_v56  ;;  %v449_v51 = vshll.u32 %v438_v36, 16  ;;  %v427_v45 = vrot.slane %v413_v29, %v2296_v48  ;;  %v453_v56 = vcombine.low %v2402_v27, %v2409_v33  ;;  %v2049_v27 = vld [vmem:[%s2603_s1 + $0x238] sm:$0xff]  }
  0x3e   : > { %v656_v11 = vrot.slane %v642_v7, %v2296_v48  ;;  %v446_v50 = vor.u32 %v445_v47, %v442_v43  ;;  %v420_v44 = vrot.slane %v412_v25, %v2296_v48 }
  0x3f   : > { %1859 = vmatpush3.bf16.msra.mxu0 %v2027_v40  ;;  %1873 = vmatpush3.bf16.msra.mxu1 %v2013_v2  ;;  %v451_v40 = vrot.slane %v449_v51, 7 }
  0x40   : > { %1860 = vmatprep.subr.bf16.mxu0 %v2030_v58  ;;  %v657_v13 = vcombine.low %v649_v8, %v656_v11  ;;  %1874 = vmatprep.subr.bf16.mxu1 %v2016_v3  ;;  %v447_v46 = vrot.slane %v446_v50, 2  ;;  %v428_v54 = vcombine.low %v420_v44, %v427_v45  ;;  %v461_v58 = vrot.slane %v453_v56, %v2296_v48 }
  0x42   : > { %1396 = vmatprep.mubr.bf16.mxu0 %v657_v13  ;;  %v452_v55 = vsel %vm2383_vm6, %v447_v46, %v451_v40 }
  0x43   : > { %1861 = vmatpush3.bf16.msra.mxu0 %v2031_v63  ;;  %1875 = vmatpush3.bf16.msra.mxu1 %v2017_v10  ;;  %v454_v57 = vcombine.low %v2417_v42, %v452_v55 }
  0x44   : > { %1862 = vmatprep.subr.bf16.mxu0 %v2034_v6  ;;  %1876 = vmatprep.subr.bf16.mxu1 %v2020_v12 }
  0x45   : > { %v468_v59 = vrot.slane %v454_v57, %v2296_v48 }
  0x47   : > { %1863 = vmatpush3.bf16.msra.mxu0 %v2035_v9  ;;  %1877 = vmatpush3.bf16.msra.mxu1 %v2021_v21  ;;  %v469_v33 = vcombine.low %v461_v58, %v468_v59 }
  0x48   : > { %1901 = vmatprep.subr.bf16.mxu0 %v2095_v15  ;;  %1878 = vmatprep.subr.bf16.mxu1 %v2024_v23 }
  0x4a   : > { %1397 = vmatmul.mubr.bf16.vlgmr.msra.gmra.mrb[4].mxu0 %v687_v24 }
  0x4b   : > { %1902 = vmatpush3.bf16.msra.mxu0 %v2040_v22  ;;  %1917 = vmatprep.mubr.msk.bf16.mxu0 %vm2096_vm7, %v2095_v15 }
  0x4c   : > { %1903 = vmatprep.subr.bf16.mxu0 %v2095_v15  ;;  %1879 = vmatpush3.bf16.msra.mxu1 %v2025_v26 }
  0x4d   : > { %1880 = vmatprep.subr.bf16.mxu1 %v2028_v32 }
  0x4f   : > { %1904 = vmatpush3.bf16.msra.mxu0 %v2043_v31 }
  0x50   : > { %1905 = vmatprep.subr.bf16.mxu0 %v2095_v15  ;;  %1881 = vmatpush3.bf16.msra.mxu1 %v2029_v37 }
  0x51   : > { %1882 = vmatprep.subr.bf16.mxu1 %v2032_v49 }
  0x53   : > { %1906 = vmatpush3.bf16.msra.mxu0 %v2044_v38  ;;  %v2097_v38 = vmov (!%p2554_p9), 0.0  }
  0x54   : > { %1907 = vmatprep.subr.bf16.mxu0 %v2095_v15  ;;  %1883 = vmatpush3.bf16.msra.mxu1 %v2033_v52  ;;  %1496 = vst [vmem:[#allocation2] sm:$0xff] (!%p2554_p9), %v2097_v38  ;;  %1497 = vst [vmem:[#allocation3] sm:$0xff] (!%p2554_p9), %v2097_v38 }
  0x55   : > { %1884 = vmatprep.subr.bf16.mxu1 %v2036_v39 }
  0x57   : > { %1908 = vmatpush3.bf16.msra.mxu0 %v2045_v35 }
  0x58   : > { %1909 = vmatprep.subr.bf16.mxu0 %v2095_v15  ;;  %1885 = vmatpush3.bf16.msra.mxu1 %v2037_v41 }
  0x5b   : > { %1910 = vmatpush3.bf16.msra.mxu0 %v2046_v53  ;;  %1438 = vmatmul.mubr.bf16.vlgmr.msra.gmra.mrb[4].mxu1 %v428_v54 }
  0x5c   : > { %1911 = vmatprep.subr.bf16.mxu0 %v2095_v15 }
  0x5f   : > { %1912 = vmatpush3.bf16.msra.mxu0 %v2047_v30 }
  0x60   : > { %1913 = vmatprep.subr.bf16.mxu0 %v2095_v15 }
  0x63   : > { %1914 = vmatpush3.bf16.msra.mxu0 %v2048_v4 }
  0x64   : > { %1915 = vmatprep.subr.bf16.mxu0 %v2095_v15 }
  0x67   : > { %1916 = vmatpush3.bf16.msra.mxu0 %v2049_v27 }
  0x6a   : > { %1918 = vmatmul.mubr.bf16.vlgmr.msra.gmra.mrb[8].mxu0 %v469_v33 }
  0xfd   : > { %v1820_v42 = vpop.f32.mrb[0].mxu0 }
  0xfe   : > { %v1821_v60 = vpop.f32.mrb[1].mxu0 }
  0xff   : > { %v1822_v48 = vadd.f32 %v1821_v60, %v1820_v42  ;;  %v1823_v61 = vpop.f32.mrb[2].mxu0 }
 0x100   : > { %v1824_v62 = vpop.f32.mrb[3].mxu0 }
 0x101   : > { %v1825_v63 = vadd.f32 %v1824_v62, %v1823_v61  ;;  %v1317_v1 = vadd.f32 %v1822_v48, %v1721_v0 }
 0x103   : > { %v1320_v34 = vadd.f32 %v1825_v63, %v1721_v0 }
 0x10d   : > { %v1842_v2 = vpop.f32.mrb[0].mxu1 }
 0x10e   : > { %v1843_v16 = vpop.f32.mrb[1].mxu1 }
 0x10f   : > { %v1844_v3 = vadd.f32 %v1843_v16, %v1842_v2  ;;  %v1845_v5 = vpop.f32.mrb[2].mxu1 }
 0x110   : > { %v1846_v6 = vpop.f32.mrb[3].mxu1 }
 0x111   : > { %v1358_v7 = vadd.f32 %v1844_v3, %v1317_v1  ;;  %v1847_v8 = vadd.f32 %v1846_v6, %v1845_v5 }
 0x113   : > { %v1361_v9 = vadd.f32 %v1847_v8, %v1320_v34 }
 0x11d   : > { %v1864_v10 = vpop.f32.mrb[4].mxu0 }
 0x11e   : > { %v1865_v11 = vpop.f32.mrb[5].mxu0 }
 0x11f   : > { %v1866_v12 = vadd.f32 %v1865_v11, %v1864_v10  ;;  %v1867_v13 = vpop.f32.mrb[6].mxu0 }
 0x120   : > { %v1868_v14 = vpop.f32.mrb[7].mxu0 }
 0x121   : > { %v1399_v15 = vadd.f32 %v1866_v12, %v1358_v7  ;;  %v1869_v17 = vadd.f32 %v1868_v14, %v1867_v13 }
 0x123   : > { %v1402_v19 = vadd.f32 %v1869_v17, %v1361_v9 }
 0x12e   : > { %v1886_v20 = vpop.f32.mrb[4].mxu1 }
 0x12f   : > { %v1887_v21 = vpop.f32.mrb[5].mxu1 }
 0x130   : > { %v1888_v22 = vadd.f32 %v1887_v21, %v1886_v20  ;;  %v1889_v23 = vpop.f32.mrb[6].mxu1 }
 0x131   : > { %v1890_v24 = vpop.f32.mrb[7].mxu1 }
 0x132   : > { %v1891_v18 = vadd.f32 %v1890_v24, %v1889_v23  ;;  %v1440_v26 = vadd.f32 %v1888_v22, %v1399_v15 }
 0x134   : > { %v1443_v28 = vadd.f32 %v1891_v18, %v1402_v19 }
 0x13a   : > { %1495 = sbr.rel (%p2554_p9) target bundleno = 321 (0x141), region = 44 }
 0x13d   : > { %v1480_v31 = vpop.f32.mrb[8].mxu0 }
 0x13e   : > { %v2561_v32 = vadd.f32 %v1480_v31, %v1440_v26  ;;  %v1919_v36 = vpop.f32.mrb[9].mxu0 }
 0x13f   : > { %v1483_v43 = vpop.f32.mrb[10].mxu0 }
 0x140   : > { %v2563_v47 = vadd.f32 %v1483_v43, %v1443_v28  ;;  %v1920_v37 = vpop.f32.mrb[11].mxu0  ;;  %1498 = vst [vmem:[#allocation4] sm:$0x1] (!%p2554_p9), %v2561_v32 }
 0x141 PF: > { %p1795_p10 = scmp.ne.s32.totalorder %s2080_s19, 0 }
 0x142   : > { %v1511_v50 = vld [vmem:[#allocation2] sm:$0xff] (!%p1795_p10)  ;;  %v1515_v39 = vld [vmem:[#allocation3] sm:$0xff] (!%p1795_p10) }
 0x143   : > { %1501 = sbr.rel (%p1795_p10) target bundleno = 337 (0x151), region = 48 }
 0x147   : > { %v1796_v49 = vld [vmem:[#allocation4] ss:$0 sm:$0xff] (!%p1795_p10) }
 0x148   : > { %v1509_v25 = vsub.f32 (!%p1795_p10), %v2561_v32, %v1796_v49  ;;  %v1510_v29 = vsub.f32 (!%p1795_p10), %v2563_v47, %v1796_v49 }
 0x14a   : > { %v1512_v51 = vadd.f32 %v1510_v29, %v1509_v25  ;;  %v1516_v52 = vmul.f32 %v1509_v25, %v1509_v25  ;;  %v1517_v35 = vmul.f32 %v1510_v29, %v1510_v29 }
 0x14c   : > { %v1513_v44 = vadd.f32 %v1512_v51, %v1511_v50  ;;  %v1518_v45 = vadd.f32 %v1517_v35, %v1516_v52 }
 0x14e   : > { %1514 = vst [vmem:[#allocation2] sm:$0xff] %v1513_v44  ;;  %v1519_v46 = vadd.f32 %v1518_v45, %v1515_v39 }
 0x150   : > { %1520 = vst [vmem:[#allocation3] sm:$0xff] %v1519_v46 }
 0x151 PF: > { %p1521_p11 = scmp.eq.s32.totalorder %s2080_s19, 1 }
 0x153   : > { %p1522_p12 = pnand %p1521_p11, %p1487_p7 }
 0x154   : > { %v1545_v1 = vld [vmem:[#allocation4] sm:$0x1] (!%p1522_p12)  ;;  %v1549_v2 = vld [vmem:[%s2605_s3] sm:$0x1] (!%p1522_p12) }
 0x155   : > { %1525 = sbr.rel (%p1522_p12) target bundleno = 382 (0x17e), region = 52  ;;  %v1526_v40 = vld [vmem:[#allocation2] sm:$0xff] (!%p1522_p12) }
 0x156   : > { %v1527_v53 = vrot.slane (!%p1522_p12), %v1526_v40, 4  ;;  %v1552_v5 = vld [vmem:[%s2606_s4] sm:$0x1] (!%p1522_p12) }
 0x157   : > { %v1534_v41 = vld [vmem:[#allocation3] sm:$0xff] (!%p1522_p12) }
 0x158   : > { %v1535_v54 = vrot.slane (!%p1522_p12), %v1534_v41, 4  ;;  %v1528_v55 = vadd.f32 (!%p1522_p12), %v1527_v53, %v1526_v40 }
 0x15a   : > { %v1536_v30 = vadd.f32 (!%p1522_p12), %v1535_v54, %v1534_v41  ;;  %v1529_v56 = vrot.slane (!%p1522_p12), %v1528_v55, 2 }
 0x15c   : > { %v1537_v57 = vrot.slane %v1536_v30, 2  ;;  %v1530_v4 = vadd.f32 %v1529_v56, %v1528_v55 }
 0x15e   : > { %v1538_v58 = vadd.f32 %v1537_v57, %v1536_v30  ;;  %v1531_v59 = vrot.slane %v1530_v4, 1 }
 0x160   : > { %v1539_v27 = vrot.slane %v1538_v58, 1  ;;  %v1532_v33 = vadd.f32 %v1531_v59, %v1530_v4 }
 0x162   : > { %v1540_v42 = vadd.f32 %v1539_v27, %v1538_v58  ;;  %v1533_v60 = vmul.f32 0.03125, %v1532_v33 }
 0x164   : > { %v1541_v48 = vmul.f32 0.03125, %v1540_v42  ;;  %v1542_v61 = vmul.f32 %v1533_v60, %v1533_v60  ;;  %v1546_v16 = vadd.f32 %v1545_v1, %v1533_v60 }
 0x166   : > { %v1543_v62 = vsub.f32 %v1541_v48, %v1542_v61 }
 0x168   : > { %v1544_v63 = vmax.f32 %v1543_v62, 0.0 }
 0x16a   : > { %v1547_v0 = vadd.f32 1e-05, %v1544_v63 }
 0x16c   : > { %2050 = vrsqrt.f32 %v1547_v0 }
 0x176   : > { %v2051_v34 = vpop.eup %2050 }
 0x177   : > { %v1550_v3 = vmul.f32 %v2051_v34, %v1549_v2 }
 0x179   : > { %1551 = vst [vmem:[#allocation5] sm:$0x1] %v1550_v3  ;;  %v1553_v6 = vmul.f32 %v1550_v3, %v1546_v16 }
 0x17b   : > { %v1554_v7 = vsub.f32 %v1552_v5, %v1553_v6 }
 0x17d   : > { %1555 = vst [vmem:[#allocation5 + $0x1] sm:$0x1] %v1554_v7 }
 0x17e PF: > { %p1797_p13 = scmp.ne.s32.totalorder %s2080_s19, 1 }
 0x180   : > { %1558 = sbr.rel (%p1797_p13) target bundleno = 399 (0x18f), region = 56  ;;  %v1798_v8 = vld [vmem:[#allocation5] ss:$0 sm:$0xff] (!%p1797_p13) }
 0x181   : > { %v1564_v10 = vmul.f32 (!%p1797_p13), %v1798_v8, %v2561_v32  ;;  %v1565_v11 = vmul.f32 (!%p1797_p13), %v1798_v8, %v2563_v47 }
 0x184   : > { %v1799_v9 = vld [vmem:[#allocation5 + $0x1] ss:$0 sm:$0xff] (!%p1797_p13) }
 0x185   : > { %v1571_v12 = vadd.f32 (!%p1797_p13), %v1799_v9, %v1564_v10  ;;  %v1572_v13 = vadd.f32 (!%p1797_p13), %v1799_v9, %v1565_v11 }
 0x187   : > { %vm1573_vm8 = vcmp.gt.f32.partialorder %v1571_v12, 0.0  ;;  %v1575_v14 = vmul.f32 0.01, %v1571_v12  ;;  %vm1574_vm9 = vcmp.gt.f32.partialorder %v1572_v13, 0.0  ;;  %v1576_v15 = vmul.f32 0.01, %v1572_v13 }
 0x189   : > { %v1577_v17 = vsel %vm1573_vm8, %v1571_v12, %v1575_v14  ;;  %v1578_v19 = vsel %vm1574_vm9, %v1572_v13, %v1576_v15 }
 0x18a   : > { %v1585_v20 = vpack.c.bf16 %v1577_v17, %v1577_v17  ;;  %v1581_v21 = vcombine.high %v1577_v17, %v1577_v17  ;;  %v1587_v22 = vpack.c.bf16 %v1578_v19, %v1578_v19  ;;  %v1582_v23 = vcombine.high %v1578_v19, %v1578_v19 }
 0x18c   : > { %1589 = vst [vmem:[%s2188_s26] sm:$0x3] %v1585_v20  ;;  %v1586_v24 = vpack.c.bf16 %v1581_v21, %v1581_v21  ;;  %1591 = vst [vmem:[%s2188_s26 + $0x4] sm:$0x3] %v1587_v22  ;;  %v1588_v18 = vpack.c.bf16 %v1582_v23, %v1582_v23 }
 0x18e   : > { %1590 = vst [vmem:[%s2188_s26 + $0x2] sm:$0x3] %v1586_v24  ;;  %1592 = vst [vmem:[%s2188_s26 + $0x6] sm:$0x3] %v1588_v18 }
 0x18f PF: > { %s15_s22 = sadd.s32 1, %s2092_s22   ;;  %s2613_s18 = smov %s2084_s20 }
 0x190   : > { %p12_p0 = scmp.ge.s32.totalorder %s15_s22, 6   ;;  %s2614_s19 = smov %s2088_s21 }
 0x191   : > { %s2615_s20 = smov %s2618_s23  ;;  %s2616_s21 = smov %s2622_s24 }
 0x192   :  { %14 = sbr.rel (!%p12_p0) target bundleno = 3 (0x3), region = 90 }

// kernel: _lambda_.5
= control target key start
LH: loop header
LB: loop body
LE: loop exit
PB: predicated region body
PF: predicated region fallthrough
CT: control target
= control target key end

     0   :  { %v1925_v22 = vmov 1966171168   ;;  %v286_v24 = vlaneseq  ;;  %s2376_s1 = inlined_call_operand.vmem [shape: bf16[2048,128], index: 1, kind: input, shape index: {}]   ;;  %s2377_s0 = inlined_call_operand.vmem [shape: bf16[2,2048], index: 0, kind: input, shape index: {}]   ;;  %s2378_s2 = inlined_call_operand.vmem [shape: f32[1,128], index: 2, kind: input, shape index: {}]   ;;  %s2379_s3 = inlined_call_operand.vmem [shape: f32[2,128], index: 3, kind: output, shape index: {}]  }
   0x1   :  { %v1795_v0 = vld [vmem:[%s2376_s1 + $0x40] sm:$0xff]   ;;  %v1799_v4 = vld [vmem:[%s2376_s1 + $0x48] sm:$0xff]   ;;  %v1803_v8 = vld [vmem:[%s2376_s1 + $0x50] sm:$0xff]   ;;  %v284_v23 = vunpack.c.l.s4 %v1925_v22 }
   0x2   :  { %v1796_v1 = vld [vmem:[%s2376_s1 + $0xc0] sm:$0xff]   ;;  %1618 = vmatprep.subr.bf16.mxu0 %v1795_v0  ;;  %v1800_v5 = vld [vmem:[%s2376_s1 + $0xc8] sm:$0xff]   ;;  %v1804_v9 = vld [vmem:[%s2376_s1 + $0xd0] sm:$0xff]   ;;  %v287_v30 = vshrl.u32 %v286_v24, 7 }
   0x3   :  { %v1797_v2 = vld [vmem:[%s2376_s1] sm:$0xff]   ;;  %1640 = vmatprep.subr.bf16.mxu1 %v1796_v1  ;;  %v1801_v6 = vld [vmem:[%s2376_s1 + $0x8] sm:$0xff]   ;;  %v1805_v10 = vld [vmem:[%s2376_s1 + $0x10] sm:$0xff]   ;;  %v285_v29 = vunpack.c.0.s8 %v284_v23 }
   0x4   :  { %v1798_v3 = vld [vmem:[%s2376_s1 + $0x80] sm:$0xff]   ;;  %1619 = vmatpush3.bf16.msra.mxu0 %v1797_v2  ;;  %v1802_v7 = vld [vmem:[%s2376_s1 + $0x88] sm:$0xff]   ;;  %v1806_v11 = vld [vmem:[%s2376_s1 + $0x90] sm:$0xff]  }
   0x5   :  { %1641 = vmatpush3.bf16.msra.mxu1 %v1798_v3  ;;  %1620 = vmatprep.subr.bf16.mxu0 %v1799_v4  ;;  %v1807_v12 = vld [vmem:[%s2376_s1 + $0x58] sm:$0xff]   ;;  %v1811_v16 = vld [vmem:[%s2376_s1 + $0x60] sm:$0xff]   ;;  %v1815_v20 = vld [vmem:[%s2376_s1 + $0x68] sm:$0xff]   ;;  %v2036_v35 = vsub.s32 %v285_v29, %v287_v30 }
   0x6   :  { %1642 = vmatprep.subr.bf16.mxu1 %v1800_v5  ;;  %v1808_v13 = vld [vmem:[%s2376_s1 + $0xd8] sm:$0xff]   ;;  %v1812_v17 = vld [vmem:[%s2376_s1 + $0xe0] sm:$0xff]   ;;  %v1816_v21 = vld [vmem:[%s2376_s1 + $0xe8] sm:$0xff]  }
   0x7   :  { %v1809_v14 = vld [vmem:[%s2376_s1 + $0x18] sm:$0xff]   ;;  %v1813_v18 = vld [vmem:[%s2376_s1 + $0x20] sm:$0xff]   ;;  %v1817_v25 = vld [vmem:[%s2376_s1 + $0x28] sm:$0xff]  }
   0x8   :  { %1621 = vmatpush3.bf16.msra.mxu0 %v1801_v6  ;;  %v1810_v15 = vld [vmem:[%s2376_s1 + $0x98] sm:$0xff]   ;;  %v1814_v19 = vld [vmem:[%s2376_s1 + $0xa0] sm:$0xff]   ;;  %v1818_v26 = vld [vmem:[%s2376_s1 + $0xa8] sm:$0xff]  }
   0x9   :  { %1643 = vmatpush3.bf16.msra.mxu1 %v1802_v7  ;;  %1622 = vmatprep.subr.bf16.mxu0 %v1803_v8  ;;  %v1819_v27 = vld [vmem:[%s2376_s1 + $0x70] sm:$0xff]   ;;  %v1823_v33 = vld [vmem:[%s2376_s1 + $0x78] sm:$0xff]   ;;  %v15_v38 = vld [vmem:[%s2377_s0] sm:$0xff] }
   0xa   :  { %1644 = vmatprep.subr.bf16.mxu1 %v1804_v9  ;;  %v1820_v28 = vld [vmem:[%s2376_s1 + $0xf0] sm:$0xff]   ;;  %v1824_v34 = vld [vmem:[%s2376_s1 + $0xf8] sm:$0xff]   ;;  %v282_v39 = vcombine.high %v15_v38, %v15_v38  ;;  %v289_v40 = vrot.slane %v15_v38, %v2036_v35  ;;  %v1829_v41 = vld [vmem:[%s2376_s1 + $0x140] sm:$0xff]  }
   0xb   :  { %v1821_v31 = vld [vmem:[%s2376_s1 + $0x30] sm:$0xff]   ;;  %v1825_v36 = vld [vmem:[%s2376_s1 + $0x38] sm:$0xff]   ;;  %v1830_v42 = vld [vmem:[%s2376_s1 + $0x1c0] sm:$0xff]  }
   0xc   :  { %1623 = vmatpush3.bf16.msra.mxu0 %v1805_v10  ;;  %v1822_v32 = vld [vmem:[%s2376_s1 + $0xb0] sm:$0xff]   ;;  %v1826_v37 = vld [vmem:[%s2376_s1 + $0xb8] sm:$0xff]   ;;  %v297_v43 = vcombine.high %v289_v40, %v289_v40  ;;  %v305_v44 = vrot.slane %v289_v40, %v2036_v35  ;;  %v2056_v45 = vrot.slane %v282_v39, %v2036_v35  ;;  %v1831_v47 = vld [vmem:[%s2376_s1 + $0x100] sm:$0xff]  }
   0xd   :  { %1645 = vmatpush3.bf16.msra.mxu1 %v1806_v11  ;;  %1624 = vmatprep.subr.bf16.mxu0 %v1807_v12  ;;  %v1833_v50 = vld [vmem:[%s2376_s1 + $0x148] sm:$0xff]   ;;  %v1832_v52 = vld [vmem:[%s2376_s1 + $0x180] sm:$0xff]   ;;  %v1837_v57 = vld [vmem:[%s2376_s1 + $0x150] sm:$0xff]  }
   0xe   :  { %1646 = vmatprep.subr.bf16.mxu1 %v1808_v13  ;;  %v319_v46 = vrot.slane %v297_v43, %v2036_v35  ;;  %v298_v48 = vcombine.high %v2056_v45, %v2056_v45  ;;  %v327_v49 = vcombine.high %v305_v44, %v305_v44  ;;  %v1834_v54 = vld [vmem:[%s2376_s1 + $0x1c8] sm:$0xff]   ;;  %v1838_v59 = vld [vmem:[%s2376_s1 + $0x1d0] sm:$0xff]   ;;  %v1841_v61 = vld [vmem:[%s2376_s1 + $0x158] sm:$0xff]  }
   0xf   :  { %v1835_v55 = vld [vmem:[%s2376_s1 + $0x108] sm:$0xff]   ;;  %v1839_v60 = vld [vmem:[%s2376_s1 + $0x110] sm:$0xff]   ;;  %v1842_v63 = vld [vmem:[%s2376_s1 + $0x1d8] sm:$0xff]  }
  0x10   :  { %1625 = vmatpush3.bf16.msra.mxu0 %v1809_v14  ;;  %1196 = vmatprep.mubr.bf16.mxu0 %v319_v46  ;;  %v329_v51 = vcombine.high %v319_v46, %v319_v46  ;;  %v326_v53 = vrot.slane %v298_v48, %v2036_v35  ;;  %v1836_v58 = vld [vmem:[%s2376_s1 + $0x188] sm:$0xff]   ;;  %v1840_v62 = vld [vmem:[%s2376_s1 + $0x190] sm:$0xff]   ;;  %v1843_v0 = vld [vmem:[%s2376_s1 + $0x118] sm:$0xff]  }
  0x11   :  { %1647 = vmatpush3.bf16.msra.mxu1 %v1810_v15  ;;  %1626 = vmatprep.subr.bf16.mxu0 %v1811_v16  ;;  %v1845_v1 = vld [vmem:[%s2376_s1 + $0x160] sm:$0xff]   ;;  %v1844_v2 = vld [vmem:[%s2376_s1 + $0x198] sm:$0xff]   ;;  %v2116_v5 = vld [vmem:[%s2377_s0 + $0x8] sm:$0xff] }
  0x12   :  { %1648 = vmatprep.subr.bf16.mxu1 %v1812_v17  ;;  %1236 = vmatprep.mubr.bf16.mxu1 %v329_v51  ;;  %v330_v56 = vcombine.high %v326_v53, %v326_v53  ;;  %v1846_v3 = vld [vmem:[%s2376_s1 + $0x1e0] sm:$0xff]   ;;  %v1849_v6 = vld [vmem:[%s2376_s1 + $0x168] sm:$0xff]   ;;  %v1853_v10 = vld [vmem:[%s2376_s1 + $0x170] sm:$0xff]   ;;  %v2138_v12 = vrot.slane %v2116_v5, %v2036_v35  ;;  %v331_v46 = vcombine.high %v2116_v5, %v2116_v5 }
  0x13   :  { %v1847_v4 = vld [vmem:[%s2376_s1 + $0x120] sm:$0xff]   ;;  %v1850_v8 = vld [vmem:[%s2376_s1 + $0x1e8] sm:$0xff]   ;;  %v1854_v13 = vld [vmem:[%s2376_s1 + $0x1f0] sm:$0xff]  }
  0x14   :  { %1627 = vmatpush3.bf16.msra.mxu0 %v1813_v18  ;;  %v1848_v7 = vld [vmem:[%s2376_s1 + $0x1a0] sm:$0xff]   ;;  %v1851_v9 = vld [vmem:[%s2376_s1 + $0x128] sm:$0xff]   ;;  %v1855_v14 = vld [vmem:[%s2376_s1 + $0x130] sm:$0xff]   ;;  %v346_v17 = vcombine.high %v2138_v12, %v2138_v12 }
  0x15   :  { %1649 = vmatpush3.bf16.msra.mxu1 %v1814_v19  ;;  %1628 = vmatprep.subr.bf16.mxu0 %v1815_v20  ;;  %v1852_v11 = vld [vmem:[%s2376_s1 + $0x1a8] sm:$0xff]   ;;  %v1857_v15 = vld [vmem:[%s2376_s1 + $0x178] sm:$0xff]   ;;  %v1856_v16 = vld [vmem:[%s2376_s1 + $0x1b0] sm:$0xff]   ;;  %v312_v20 = vrot.slane %v2056_v45, %v2036_v35 }
  0x16   :  { %1650 = vmatprep.subr.bf16.mxu1 %v1816_v21  ;;  %v1858_v18 = vld [vmem:[%s2376_s1 + $0x1f8] sm:$0xff]   ;;  %v1861_v21 = vld [vmem:[%s2376_s1 + $0x240] sm:$0xff]   ;;  %v368_v23 = vrot.slane %v346_v17, %v2036_v35  ;;  %v1866_v30 = vld [vmem:[%s2376_s1 + $0x2c8] sm:$0xff]  }
  0x17   :  { %v1859_v19 = vld [vmem:[%s2376_s1 + $0x138] sm:$0xff]   ;;  %v1862_v24 = vld [vmem:[%s2376_s1 + $0x2c0] sm:$0xff]   ;;  %v1872_v38 = vld [vmem:[%s2376_s1 + $0x290] sm:$0xff]  }
  0x18   :  { %1629 = vmatpush3.bf16.msra.mxu0 %v1817_v25  ;;  %v1860_v22 = vld [vmem:[%s2376_s1 + $0x1b8] sm:$0xff]   ;;  %v1863_v25 = vld [vmem:[%s2376_s1 + $0x200] sm:$0xff]   ;;  %v378_v29 = vcombine.high %v368_v23, %v368_v23  ;;  %v1881_v45 = vld [vmem:[%s2376_s1 + $0x268] sm:$0xff]  }
  0x19   :  { %1651 = vmatpush3.bf16.msra.mxu1 %v1818_v26  ;;  %1630 = vmatprep.subr.bf16.mxu0 %v1819_v27  ;;  %v328_v26 = vcombine.high %v312_v20, %v312_v20  ;;  %v1865_v27 = vld [vmem:[%s2376_s1 + $0x248] sm:$0xff]   ;;  %v1874_v39 = vld [vmem:[%s2376_s1 + $0x2d8] sm:$0xff]   ;;  %v1878_v43 = vld [vmem:[%s2376_s1 + $0x2e0] sm:$0xff]  }
  0x1a   :  { %1652 = vmatprep.subr.bf16.mxu1 %v1820_v28  ;;  %v1864_v28 = vld [vmem:[%s2376_s1 + $0x280] sm:$0xff]   ;;  %v1875_v40 = vld [vmem:[%s2376_s1 + $0x218] sm:$0xff]   ;;  %v1882_v48 = vld [vmem:[%s2376_s1 + $0x2e8] sm:$0xff]  }
  0x1b   :  { %v1884_v51 = vld [vmem:[%s2376_s1 + $0x2a8] sm:$0xff]   ;;  %v1908_v17 = vld [vmem:[%s2376_s1 + $0x398] sm:$0xff]  }
  0x1c   :  { %1631 = vmatpush3.bf16.msra.mxu0 %v1821_v31  ;;  %v1867_v31 = vld [vmem:[%s2376_s1 + $0x208] sm:$0xff]  }
  0x1d   :  { %1653 = vmatpush3.bf16.msra.mxu1 %v1822_v32  ;;  %1632 = vmatprep.subr.bf16.mxu0 %v1823_v33  ;;  %v1869_v32 = vld [vmem:[%s2376_s1 + $0x250] sm:$0xff]   ;;  %v1868_v33 = vld [vmem:[%s2376_s1 + $0x288] sm:$0xff]  }
  0x1e   :  { %1654 = vmatprep.subr.bf16.mxu1 %v1824_v34  ;;  %v1870_v34 = vld [vmem:[%s2376_s1 + $0x2d0] sm:$0xff]  }
  0x20   :  { %1633 = vmatpush3.bf16.msra.mxu0 %v1825_v36  ;;  %v1871_v36 = vld [vmem:[%s2376_s1 + $0x210] sm:$0xff]  }
  0x21   :  { %1655 = vmatpush3.bf16.msra.mxu1 %v1826_v37  ;;  %1662 = vmatprep.subr.bf16.mxu0 %v1829_v41  ;;  %v1873_v37 = vld [vmem:[%s2376_s1 + $0x258] sm:$0xff]   ;;  %v1877_v41 = vld [vmem:[%s2376_s1 + $0x260] sm:$0xff]  }
  0x22   :  { %1684 = vmatprep.subr.bf16.mxu1 %v1830_v42  ;;  %v1876_v42 = vld [vmem:[%s2376_s1 + $0x298] sm:$0xff]  }
  0x23   :  { %1197 = vmatmul.mubr.bf16.vlgmr.msra.gmra.mrb[0].mxu0 %v305_v44  ;;  %v1879_v44 = vld [vmem:[%s2376_s1 + $0x220] sm:$0xff]  }
  0x24   :  { %1663 = vmatpush3.bf16.msra.mxu0 %v1831_v47  ;;  %1237 = vmatmul.mubr.bf16.vlgmr.msra.gmra.mrb[0].mxu1 %v327_v49  ;;  %v1880_v47 = vld [vmem:[%s2376_s1 + $0x2a0] sm:$0xff]   ;;  %v1883_v49 = vld [vmem:[%s2376_s1 + $0x228] sm:$0xff]  }
  0x25   :  { %1664 = vmatprep.subr.bf16.mxu0 %v1833_v50  ;;  %1685 = vmatpush3.bf16.msra.mxu1 %v1832_v52  ;;  %v1885_v50 = vld [vmem:[%s2376_s1 + $0x270] sm:$0xff]   ;;  %v2244_v52 = vrot.slane %v331_v46, %v2036_v35 }
  0x26   :  { %1276 = vmatprep.mubr.bf16.mxu0 %v326_v53  ;;  %1686 = vmatprep.subr.bf16.mxu1 %v1834_v54  ;;  %v1886_v53 = vld [vmem:[%s2376_s1 + $0x2f0] sm:$0xff]  }
  0x27   :  { %1316 = vmatprep.mubr.bf16.mxu1 %v330_v56  ;;  %v1887_v54 = vld [vmem:[%s2376_s1 + $0x230] sm:$0xff]  }
  0x28   :  { %1665 = vmatpush3.bf16.msra.mxu0 %v1835_v55  ;;  %v1889_v55 = vld [vmem:[%s2376_s1 + $0x278] sm:$0xff]   ;;  %v1888_v56 = vld [vmem:[%s2376_s1 + $0x2b0] sm:$0xff]  }
  0x29   :  { %1666 = vmatprep.subr.bf16.mxu0 %v1837_v57  ;;  %1687 = vmatpush3.bf16.msra.mxu1 %v1836_v58  ;;  %v347_v57 = vcombine.high %v2244_v52, %v2244_v52  ;;  %v1890_v58 = vld [vmem:[%s2376_s1 + $0x2f8] sm:$0xff]  }
  0x2a   :  { %1688 = vmatprep.subr.bf16.mxu1 %v1838_v59  ;;  %v1891_v59 = vld [vmem:[%s2376_s1 + $0x238] sm:$0xff]  }
  0x2c   :  { %1667 = vmatpush3.bf16.msra.mxu0 %v1839_v60  ;;  %v354_v60 = vrot.slane %v2138_v12, %v2036_v35  ;;  %v1905_v12 = vld [vmem:[%s2376_s1 + $0x358] sm:$0xff]  }
  0x2d   :  { %1668 = vmatprep.subr.bf16.mxu0 %v1841_v61  ;;  %1689 = vmatpush3.bf16.msra.mxu1 %v1840_v62  ;;  %v1893_v61 = vld [vmem:[%s2376_s1 + $0x340] sm:$0xff]   ;;  %v1892_v62 = vld [vmem:[%s2376_s1 + $0x2b8] sm:$0xff]  }
  0x2e   :  { %1690 = vmatprep.subr.bf16.mxu1 %v1842_v63  ;;  %v375_v63 = vrot.slane %v347_v57, %v2036_v35 }
  0x30   :  { %1669 = vmatpush3.bf16.msra.mxu0 %v1843_v0  ;;  %v1894_v0 = vld [vmem:[%s2376_s1 + $0x3c0] sm:$0xff]   ;;  %v379_v5 = vcombine.high %v375_v63, %v375_v63 }
  0x31   :  { %1670 = vmatprep.subr.bf16.mxu0 %v1845_v1  ;;  %1691 = vmatpush3.bf16.msra.mxu1 %v1844_v2  ;;  %v1895_v1 = vld [vmem:[%s2376_s1 + $0x300] sm:$0xff]   ;;  %v376_v2 = vcombine.high %v354_v60, %v354_v60 }
  0x32   :  { %1692 = vmatprep.subr.bf16.mxu1 %v1846_v3  ;;  %v1897_v3 = vld [vmem:[%s2376_s1 + $0x348] sm:$0xff]  }
  0x34   :  { %1671 = vmatpush3.bf16.msra.mxu0 %v1847_v4  ;;  %v1896_v4 = vld [vmem:[%s2376_s1 + $0x380] sm:$0xff]  }
  0x35   :  { %1672 = vmatprep.subr.bf16.mxu0 %v1849_v6  ;;  %1693 = vmatpush3.bf16.msra.mxu1 %v1848_v7  ;;  %v1898_v6 = vld [vmem:[%s2376_s1 + $0x3c8] sm:$0xff]  }
  0x36   :  { %1694 = vmatprep.subr.bf16.mxu1 %v1850_v8  ;;  %v1899_v7 = vld [vmem:[%s2376_s1 + $0x308] sm:$0xff]   ;;  %v1901_v8 = vld [vmem:[%s2376_s1 + $0x350] sm:$0xff]  }
  0x38   :  { %1673 = vmatpush3.bf16.msra.mxu0 %v1851_v9  ;;  %v1900_v9 = vld [vmem:[%s2376_s1 + $0x388] sm:$0xff]  }
  0x39   :  { %1674 = vmatprep.subr.bf16.mxu0 %v1853_v10  ;;  %1695 = vmatpush3.bf16.msra.mxu1 %v1852_v11  ;;  %v1902_v10 = vld [vmem:[%s2376_s1 + $0x3d0] sm:$0xff]  }
  0x3a   :  { %1696 = vmatprep.subr.bf16.mxu1 %v1854_v13  ;;  %v1903_v11 = vld [vmem:[%s2376_s1 + $0x310] sm:$0xff]  }
  0x3b   :  { %v1904_v13 = vld [vmem:[%s2376_s1 + $0x390] sm:$0xff]  }
  0x3c   :  { %1675 = vmatpush3.bf16.msra.mxu0 %v1855_v14  ;;  %v1906_v14 = vld [vmem:[%s2376_s1 + $0x3d8] sm:$0xff]  }
  0x3d   :  { %1676 = vmatprep.subr.bf16.mxu0 %v1857_v15  ;;  %1697 = vmatpush3.bf16.msra.mxu1 %v1856_v16  ;;  %v1907_v15 = vld [vmem:[%s2376_s1 + $0x318] sm:$0xff]   ;;  %v1909_v16 = vld [vmem:[%s2376_s1 + $0x360] sm:$0xff]  }
  0x3e   :  { %1698 = vmatprep.subr.bf16.mxu1 %v1858_v18  ;;  %v1910_v18 = vld [vmem:[%s2376_s1 + $0x3e0] sm:$0xff]  }
  0x40   :  { %1677 = vmatpush3.bf16.msra.mxu0 %v1859_v19  ;;  %v1911_v19 = vld [vmem:[%s2376_s1 + $0x320] sm:$0xff]  }
  0x41   :  { %1706 = vmatprep.subr.bf16.mxu0 %v1861_v21  ;;  %1699 = vmatpush3.bf16.msra.mxu1 %v1860_v22  ;;  %v1912_v21 = vld [vmem:[%s2376_s1 + $0x3a0] sm:$0xff]   ;;  %v1914_v22 = vld [vmem:[%s2376_s1 + $0x3e8] sm:$0xff]  }
  0x42   :  { %1728 = vmatprep.subr.bf16.mxu1 %v1862_v24  ;;  %v1917_v24 = vld [vmem:[%s2376_s1 + $0x370] sm:$0xff]  }
  0x43   :  { %1277 = vmatmul.mubr.bf16.vlgmr.msra.gmra.mrb[4].mxu0 %v312_v20  ;;  %v1913_v20 = vld [vmem:[%s2376_s1 + $0x368] sm:$0xff]  }
  0x44   :  { %1707 = vmatpush3.bf16.msra.mxu0 %v1863_v25  ;;  %1356 = vmatprep.mubr.bf16.mxu0 %v368_v23  ;;  %v1915_v23 = vld [vmem:[%s2376_s1 + $0x328] sm:$0xff]  }
  0x45   :  { %1317 = vmatmul.mubr.bf16.vlgmr.msra.gmra.mrb[4].mxu1 %v328_v26  ;;  %1708 = vmatprep.subr.bf16.mxu0 %v1865_v27  ;;  %v1916_v25 = vld [vmem:[%s2376_s1 + $0x3a8] sm:$0xff]   ;;  %v1918_v26 = vld [vmem:[%s2376_s1 + $0x3f0] sm:$0xff]  }
  0x46   :  { %1729 = vmatpush3.bf16.msra.mxu1 %v1864_v28  ;;  %1396 = vmatprep.mubr.bf16.mxu1 %v378_v29  ;;  %v1919_v27 = vld [vmem:[%s2376_s1 + $0x330] sm:$0xff]   ;;  %v1921_v28 = vld [vmem:[%s2376_s1 + $0x378] sm:$0xff]  }
  0x47   :  { %1730 = vmatprep.subr.bf16.mxu1 %v1866_v30  ;;  %v1920_v29 = vld [vmem:[%s2376_s1 + $0x3b0] sm:$0xff]   ;;  %v1922_v30 = vld [vmem:[%s2376_s1 + $0x3f8] sm:$0xff]  }
  0x48   :  { %1709 = vmatpush3.bf16.msra.mxu0 %v1867_v31  ;;  %v1923_v31 = vld [vmem:[%s2376_s1 + $0x338] sm:$0xff]  }
  0x49   :  { %1710 = vmatprep.subr.bf16.mxu0 %v1869_v32  ;;  %v361_v32 = vrot.slane %v2244_v52, %v2036_v35 }
  0x4a   :  { %1731 = vmatpush3.bf16.msra.mxu1 %v1868_v33  ;;  %v1924_v33 = vld [vmem:[%s2376_s1 + $0x3b8] sm:$0xff]  }
  0x4b   :  { %1732 = vmatprep.subr.bf16.mxu1 %v1870_v34  ;;  %v377_v34 = vcombine.high %v361_v32, %v361_v32 }
  0x4c   :  { %1711 = vmatpush3.bf16.msra.mxu0 %v1871_v36 }
  0x4d   :  { %1712 = vmatprep.subr.bf16.mxu0 %v1873_v37  ;;  %v1489_v37 = vld [vmem:[%s2378_s2] ss:$0 sm:$0xff] }
  0x4e   :  { %1733 = vmatpush3.bf16.msra.mxu1 %v1872_v38 }
  0x4f   :  { %1734 = vmatprep.subr.bf16.mxu1 %v1874_v39 }
  0x50   :  { %1713 = vmatpush3.bf16.msra.mxu0 %v1875_v40 }
  0x51   :  { %1714 = vmatprep.subr.bf16.mxu0 %v1877_v41 }
  0x52   :  { %1735 = vmatpush3.bf16.msra.mxu1 %v1876_v42 }
  0x53   :  { %1736 = vmatprep.subr.bf16.mxu1 %v1878_v43 }
  0x54   :  { %1715 = vmatpush3.bf16.msra.mxu0 %v1879_v44 }
  0x55   :  { %1716 = vmatprep.subr.bf16.mxu0 %v1881_v45 }
  0x56   :  { %1737 = vmatpush3.bf16.msra.mxu1 %v1880_v47 }
  0x57   :  { %1738 = vmatprep.subr.bf16.mxu1 %v1882_v48 }
  0x58   :  { %1717 = vmatpush3.bf16.msra.mxu0 %v1883_v49 }
  0x59   :  { %1718 = vmatprep.subr.bf16.mxu0 %v1885_v50 }
  0x5a   :  { %1739 = vmatpush3.bf16.msra.mxu1 %v1884_v51 }
  0x5b   :  { %1740 = vmatprep.subr.bf16.mxu1 %v1886_v53 }
  0x5c   :  { %1719 = vmatpush3.bf16.msra.mxu0 %v1887_v54 }
  0x5d   :  { %1720 = vmatprep.subr.bf16.mxu0 %v1889_v55 }
  0x5e   :  { %1741 = vmatpush3.bf16.msra.mxu1 %v1888_v56 }
  0x5f   :  { %1742 = vmatprep.subr.bf16.mxu1 %v1890_v58 }
  0x60   :  { %1721 = vmatpush3.bf16.msra.mxu0 %v1891_v59 }
  0x61   :  { %1750 = vmatprep.subr.bf16.mxu0 %v1893_v61 }
  0x62   :  { %1743 = vmatpush3.bf16.msra.mxu1 %v1892_v62 }
  0x63   :  { %1357 = vmatmul.mubr.bf16.vlgmr.msra.gmra.mrb[8].mxu0 %v354_v60  ;;  %1772 = vmatprep.subr.bf16.mxu1 %v1894_v0 }
  0x64   :  { %1751 = vmatpush3.bf16.msra.mxu0 %v1895_v1  ;;  %1436 = vmatprep.mubr.bf16.mxu0 %v375_v63 }
  0x65   :  { %1397 = vmatmul.mubr.bf16.vlgmr.msra.gmra.mrb[8].mxu1 %v376_v2  ;;  %1752 = vmatprep.subr.bf16.mxu0 %v1897_v3 }
  0x66   :  { %1773 = vmatpush3.bf16.msra.mxu1 %v1896_v4  ;;  %1476 = vmatprep.mubr.bf16.mxu1 %v379_v5 }
  0x67   :  { %1774 = vmatprep.subr.bf16.mxu1 %v1898_v6 }
  0x68   :  { %1753 = vmatpush3.bf16.msra.mxu0 %v1899_v7 }
  0x69   :  { %1754 = vmatprep.subr.bf16.mxu0 %v1901_v8 }
  0x6a   :  { %1775 = vmatpush3.bf16.msra.mxu1 %v1900_v9 }
  0x6b   :  { %1776 = vmatprep.subr.bf16.mxu1 %v1902_v10 }
  0x6c   :  { %1755 = vmatpush3.bf16.msra.mxu0 %v1903_v11 }
  0x6d   :  { %1756 = vmatprep.subr.bf16.mxu0 %v1905_v12 }
  0x6e   :  { %1777 = vmatpush3.bf16.msra.mxu1 %v1904_v13 }
  0x6f   :  { %1778 = vmatprep.subr.bf16.mxu1 %v1906_v14 }
  0x70   :  { %1757 = vmatpush3.bf16.msra.mxu0 %v1907_v15 }
  0x71   :  { %1758 = vmatprep.subr.bf16.mxu0 %v1909_v16 }
  0x72   :  { %1779 = vmatpush3.bf16.msra.mxu1 %v1908_v17 }
  0x73   :  { %1780 = vmatprep.subr.bf16.mxu1 %v1910_v18 }
  0x74   :  { %1759 = vmatpush3.bf16.msra.mxu0 %v1911_v19 }
  0x75   :  { %1760 = vmatprep.subr.bf16.mxu0 %v1913_v20 }
  0x76   :  { %1781 = vmatpush3.bf16.msra.mxu1 %v1912_v21 }
  0x77   :  { %1782 = vmatprep.subr.bf16.mxu1 %v1914_v22 }
  0x78   :  { %1761 = vmatpush3.bf16.msra.mxu0 %v1915_v23 }
  0x79   :  { %1762 = vmatprep.subr.bf16.mxu0 %v1917_v24 }
  0x7a   :  { %1783 = vmatpush3.bf16.msra.mxu1 %v1916_v25 }
  0x7b   :  { %1784 = vmatprep.subr.bf16.mxu1 %v1918_v26 }
  0x7c   :  { %1763 = vmatpush3.bf16.msra.mxu0 %v1919_v27 }
  0x7d   :  { %1764 = vmatprep.subr.bf16.mxu0 %v1921_v28 }
  0x7e   :  { %1785 = vmatpush3.bf16.msra.mxu1 %v1920_v29 }
  0x7f   :  { %1786 = vmatprep.subr.bf16.mxu1 %v1922_v30 }
  0x80   :  { %1765 = vmatpush3.bf16.msra.mxu0 %v1923_v31 }
  0x82   :  { %1787 = vmatpush3.bf16.msra.mxu1 %v1924_v33 }
  0x83   :  { %1437 = vmatmul.mubr.bf16.vlgmr.msra.gmra.mrb[12].mxu0 %v361_v32 }
  0x85   :  { %1477 = vmatmul.mubr.bf16.vlgmr.msra.gmra.mrb[12].mxu1 %v377_v34 }
  0xf6   :  { %v1634_v36 = vpop.f32.mrb[0].mxu0 }
  0xf7   :  { %v1635_v38 = vpop.f32.mrb[1].mxu0  ;;  %v1656_v39 = vpop.f32.mrb[0].mxu1 }
  0xf8   :  { %v1636_v40 = vadd.f32 %v1635_v38, %v1634_v36  ;;  %v1637_v35 = vpop.f32.mrb[2].mxu0  ;;  %v1657_v41 = vpop.f32.mrb[1].mxu1 }
  0xf9   :  { %v1638_v42 = vpop.f32.mrb[3].mxu0  ;;  %v1658_v44 = vadd.f32 %v1657_v41, %v1656_v39  ;;  %v1659_v45 = vpop.f32.mrb[2].mxu1 }
  0xfa   :  { %v1199_v43 = vadd.f32 %v1636_v40, %v1489_v37  ;;  %v1660_v46 = vpop.f32.mrb[3].mxu1 }
  0xfc   :  { %v1239_v47 = vadd.f32 %v1658_v44, %v1199_v43 }
 0x116   :  { %v1678_v48 = vpop.f32.mrb[4].mxu0 }
 0x117   :  { %v1679_v49 = vpop.f32.mrb[5].mxu0 }
 0x118   :  { %v1700_v50 = vpop.f32.mrb[4].mxu1  ;;  %v1680_v51 = vadd.f32 %v1679_v49, %v1678_v48  ;;  %v1681_v52 = vpop.f32.mrb[6].mxu0 }
 0x119   :  { %v1701_v53 = vpop.f32.mrb[5].mxu1  ;;  %v1682_v54 = vpop.f32.mrb[7].mxu0 }
 0x11a   :  { %v1279_v55 = vadd.f32 %v1680_v51, %v1239_v47  ;;  %v1702_v56 = vadd.f32 %v1701_v53, %v1700_v50  ;;  %v1703_v57 = vpop.f32.mrb[6].mxu1 }
 0x11b   :  { %v1704_v58 = vpop.f32.mrb[7].mxu1 }
 0x11c   :  { %v1319_v59 = vadd.f32 %v1702_v56, %v1279_v55 }
 0x136   :  { %v1722_v60 = vpop.f32.mrb[8].mxu0 }
 0x137   :  { %v1723_v61 = vpop.f32.mrb[9].mxu0 }
 0x138   :  { %v1744_v62 = vpop.f32.mrb[8].mxu1  ;;  %v1724_v63 = vadd.f32 %v1723_v61, %v1722_v60  ;;  %v1725_v0 = vpop.f32.mrb[10].mxu0 }
 0x139   :  { %v1745_v1 = vpop.f32.mrb[9].mxu1  ;;  %v1726_v2 = vpop.f32.mrb[11].mxu0 }
 0x13a   :  { %v1359_v3 = vadd.f32 %v1724_v63, %v1319_v59  ;;  %v1746_v4 = vadd.f32 %v1745_v1, %v1744_v62  ;;  %v1747_v5 = vpop.f32.mrb[10].mxu1 }
 0x13b   :  { %v1748_v6 = vpop.f32.mrb[11].mxu1 }
 0x13c   :  { %v1399_v7 = vadd.f32 %v1746_v4, %v1359_v3 }
 0x156   :  { %v1766_v8 = vpop.f32.mrb[12].mxu0 }
 0x157   :  { %v1767_v9 = vpop.f32.mrb[13].mxu0 }
 0x158   :  { %v1788_v10 = vpop.f32.mrb[12].mxu1  ;;  %v1768_v11 = vadd.f32 %v1767_v9, %v1766_v8  ;;  %v1769_v12 = vpop.f32.mrb[14].mxu0 }
 0x159   :  { %v1789_v13 = vpop.f32.mrb[13].mxu1  ;;  %v1770_v14 = vpop.f32.mrb[15].mxu0 }
 0x15a   :  { %v1439_v15 = vadd.f32 %v1768_v11, %v1399_v7  ;;  %v1790_v16 = vadd.f32 %v1789_v13, %v1788_v10  ;;  %v1791_v17 = vpop.f32.mrb[14].mxu1 }
 0x15b   :  { %v1792_v18 = vpop.f32.mrb[15].mxu1 }
 0x15c   :  { %v1479_v19 = vadd.f32 %v1790_v16, %v1439_v15 }
 0x15e   :  { %1484 = vst [vmem:[%s2379_s3] sm:$0x3] %v1479_v19 }

</bundles_post_ra>
